<compile_context>
chip_gen: v5e
topology: v5e:2x2
jax: 0.10.0
libtpu: 0.0.40
codegen_flags: <defaults>
</compile_context>

<pallas_src>
import functools

import jax
import jax.numpy as jnp
from jax import lax
from jax.experimental import pallas as pl
from jax.experimental.pallas import tpu as pltpu


_PAD = 8  # sublane-aligned causal-conv left context carried across chunks (>= d_conv-1)


def _silu(v):
    return v * jax.nn.sigmoid(v)


def _softplus(v):
    return jnp.where(v > 20.0, v, jnp.log1p(jnp.exp(jnp.minimum(v, 20.0))))


def mamba_layer_kernel(
    x_ref, gamma_ref, beta_ref, w_in_ref, conv_w_ref, conv_b_ref,
    w_x_ref, b_dt_ref, a_negw_ref, d_skip_ref, w_out_ref,
    o_ref,
    xpad_sc, convcarry_sc, hcarry_sc, da_sc, dbu_sc, cm_sc, y_sc,
    *, scan_unroll: int,
):
    Lc = x_ref.shape[1]
    d_conv = conv_w_ref.shape[0]
    d_inner = conv_w_ref.shape[1]
    d_state = cm_sc.shape[1]

    # ---- reset sequential carries at the first chunk of every sequence ----
    @pl.when(pl.program_id(1) == 0)
    def _():
        convcarry_sc[...] = jnp.zeros_like(convcarry_sc)
        hcarry_sc[...] = jnp.zeros_like(hcarry_sc)

    x = x_ref[0].astype(jnp.float32)                                    # (Lc, C)

    # ---- LayerNorm(dim), eps=1e-5, affine (f32) ----
    mu = jnp.mean(x, axis=-1, keepdims=True)
    var = jnp.mean(jnp.square(x - mu), axis=-1, keepdims=True)
    xn = (x - mu) * lax.rsqrt(var + 1e-5) * gamma_ref[...] + beta_ref[...]

    # ---- fused in_proj (bias=False): one (C, 2*Din) bf16 matmul, f32 accumulate ----
    xz = jnp.dot(xn.astype(w_in_ref.dtype), w_in_ref[...],
                 preferred_element_type=jnp.float32)                    # (Lc, 2*Din)
    xi = xz[:, :d_inner]                                                # x branch
    z = xz[:, d_inner:]                                                 # gate branch

    # ---- causal depthwise conv1d + SiLU; left context carried across chunks ----
    xpad_sc[0:_PAD, :] = convcarry_sc[...]                              # prev-chunk tail
    xpad_sc[_PAD:_PAD + Lc, :] = xi
    convcarry_sc[...] = xi[Lc - _PAD:, :]                               # tail for next chunk
    conv_w = conv_w_ref[...]                                            # (d_conv, Din)
    conv = xi * conv_w[d_conv - 1:d_conv, :]                            # shift s = 0 tap
    for s in range(1, d_conv):
        conv = conv + (xpad_sc[_PAD - s:_PAD - s + Lc, :]
                       * conv_w[d_conv - 1 - s:d_conv - s, :])
    u = _silu(conv + conv_b_ref[...])                                   # (Lc, Din)

    # ---- fused x_proj (dt_proj folded offline): [dt | B | C], kept f32 ----
    proj = jnp.dot(u, w_x_ref[...], preferred_element_type=jnp.float32)  # (Lc, Din+2N)
    dt = _softplus(proj[:, :d_inner] + b_dt_ref[...])                   # (Lc, Din)
    bmat = proj[:, d_inner:d_inner + d_state]                           # (Lc, N)
    cmat = proj[:, d_inner + d_state:]                                  # (Lc, N)

    # ---- lane-dense scan precompute (one full-width exp pass + full-width stores).
    #      Wide layout: state n occupies lanes [n*Din, (n+1)*Din). ----
    dt_w = jnp.concatenate([dt] * d_state, axis=1)                      # (Lc, N*Din)
    da_sc[...] = jnp.exp(dt_w * a_negw_ref[...])                        # exp(dt*A)
    dtu = dt * u
    dbu_sc[...] = jnp.concatenate(
        [jnp.broadcast_to(bmat[:, n:n + 1], (Lc, d_inner)) * dtu
         for n in range(d_state)], axis=1)                              # B*dt*u
    cm_sc[...] = cmat

    # ---- serial recurrence with C.h folded in (no h history array):
    #      h[t] = dA[t]*h[t-1] + dBu[t];  y[t] = sum_n C[t,n]*h[t,n*Din:(n+1)*Din].
    #      Only the 2-FMA h update is on the critical chain; the C.h reduction fills
    #      idle VALU slots.  y rows are batched into one aligned (U, Din) store / block. ----
    U = scan_unroll

    def blk(b_i, h):
        base = pl.multiple_of(b_i * U, U)
        da_blk = da_sc[pl.ds(base, U), :]                               # aligned (U, N*Din)
        dbu_blk = dbu_sc[pl.ds(base, U), :]
        cm_blk = cm_sc[pl.ds(base, U), :]                               # (U, N)
        cmb = [jnp.broadcast_to(cm_blk[:, n:n + 1], (U, d_inner))       # hoisted broadcasts
               for n in range(d_state)]
        y_rows = []
        for j in range(U):                                              # static unroll
            h = da_blk[j:j + 1, :] * h + dbu_blk[j:j + 1, :]
            yr = cmb[0][j:j + 1, :] * h[:, 0:d_inner]
            for n in range(1, d_state):
                yr = yr + cmb[n][j:j + 1, :] * h[:, n * d_inner:(n + 1) * d_inner]
            y_rows.append(yr)
        y_sc[pl.ds(base, U), :] = jnp.concatenate(y_rows, axis=0)       # one dense store
        return h

    h_fin = lax.fori_loop(0, Lc // U, blk, hcarry_sc[...])
    hcarry_sc[...] = h_fin                                              # carry to next chunk

    # ---- epilogue: D-skip, SiLU(z) gate, out_proj (bias=False, bf16 MXU) ----
    y = (y_sc[...] + u * d_skip_ref[...]) * _silu(z)
    out = jnp.dot(y.astype(w_out_ref.dtype), w_out_ref[...],
                  preferred_element_type=jnp.float32)                   # (Lc, C)
    o_ref[0] = out.astype(o_ref.dtype)


def init_params(key, dim, d_state=16, d_conv=4, expand=2):
    d_inner = expand * dim
    dt_rank = -(-dim // 16)  # "auto" = ceil(dim / 16)
    ks = jax.random.split(key, 8)

    def bf16_exact(w):
        # in_proj / out_proj run on the bf16 MXU inside the kernel; keep those weights
        # exactly bf16-representable so the f32 reference shares identical values.
        return w.astype(jnp.bfloat16).astype(jnp.float32)

    w_in = bf16_exact(jax.random.normal(ks[0], (dim, 2 * d_inner), jnp.float32) * (dim ** -0.5))
    w_xp = jax.random.normal(ks[1], (d_inner, dt_rank + 2 * d_state), jnp.float32) * (d_inner ** -0.5)
    return dict(
        gamma=jnp.ones((1, dim), jnp.float32),
        beta=jnp.zeros((1, dim), jnp.float32),
        w_in_x=w_in[:, :d_inner],
        w_in_z=w_in[:, d_inner:],
        conv_w=jax.random.normal(ks[2], (d_conv, d_inner), jnp.float32) * 0.3,
        conv_b=jax.random.normal(ks[3], (1, d_inner), jnp.float32) * 0.02,
        w_xdt=w_xp[:, :dt_rank],
        w_xb=w_xp[:, dt_rank:dt_rank + d_state],
        w_xc=w_xp[:, dt_rank + d_state:],
        w_dt=jax.random.normal(ks[4], (dt_rank, d_inner), jnp.float32) * (dt_rank ** -0.5),
        b_dt=jax.random.uniform(ks[5], (1, d_inner), jnp.float32, minval=-3.0, maxval=-1.0),
        a_t=jnp.tile(jnp.log(jnp.arange(1, d_state + 1, dtype=jnp.float32))[:, None], (1, d_inner)),
        d=jnp.ones((1, d_inner), jnp.float32),
        w_out=bf16_exact(jax.random.normal(ks[6], (d_inner, dim), jnp.float32) * (d_inner ** -0.5)),
    )


def _pad_bytes(shape, itemsize):
    """Bytes of an array padded to (8, 128) minor tiles (approximate for sub-32-bit)."""
    shape = (1,) + tuple(shape) if len(shape) == 1 else tuple(shape)
    lead = 1
    for d in shape[:-2]:
        lead *= d
    rows = -(-shape[-2] // 8) * 8
    cols = -(-shape[-1] // 128) * 128
    return lead * rows * cols * itemsize


def mamba_layer_forward(x, H, W, T, params, *, d_state=16, d_conv=4, l_chunk=None):
    B, L, C = x.shape
    assert C == params["gamma"].shape[-1]
    assert L == H * W * T
    assert d_conv - 1 <= _PAD
    d_inner = params["w_in_x"].shape[1]
    hw = d_state * d_inner

    # ---- choose an L-chunk (inner "arbitrary" grid axis) so VMEM is O(L_chunk) ----
    if l_chunk is None:
        l_chunk = L
        for cand in (512, 384, 256, 192, 128, 96, 64, 32, 16, 8):
            if L % cand == 0:
                l_chunk = cand
                break
    assert L % l_chunk == 0 and l_chunk % 8 == 0 and l_chunk >= _PAD
    num_chunks = L // l_chunk
    scan_unroll = max(u for u in (8, 4, 2, 1) if l_chunk % u == 0)

    # ---- fold / fuse weights outside the kernel (exact up to fp reordering) ----
    w_in = jnp.concatenate([params["w_in_x"], params["w_in_z"]], axis=1).astype(jnp.bfloat16)
    w_x_all = jnp.concatenate(
        [params["w_xdt"] @ params["w_dt"], params["w_xb"], params["w_xc"]], axis=1)  # (Din, Din+2N) f32
    a_negw = (-jnp.exp(params["a_t"])).reshape(1, hw)                   # (1, N*Din) wide layout
    w_out = params["w_out"].astype(jnp.bfloat16)

    ordered = [
        params["gamma"], params["beta"], w_in,
        params["conv_w"], params["conv_b"],
        w_x_all, params["b_dt"], a_negw, params["d"], w_out,
    ]

    kernel = functools.partial(mamba_layer_kernel, scan_unroll=scan_unroll)

    def param_spec(p):
        nd = p.ndim
        return pl.BlockSpec(p.shape, lambda b, l, _nd=nd: (0,) * _nd)

    scratch_defs = [
        ((_PAD + l_chunk, d_inner), jnp.float32),   # zero/carry-padded conv input
        ((_PAD, d_inner), jnp.float32),             # conv left-context carry (persists)
        ((1, hw), jnp.float32),                     # scan state carry (persists)
        ((l_chunk, hw), jnp.float32),               # exp(dt*A)
        ((l_chunk, hw), jnp.float32),               # B*dt*u
        ((l_chunk, d_state), jnp.float32),          # per-token C
        ((l_chunk, d_inner), jnp.float32),          # y = C.h
    ]
    scratch_shapes = [pltpu.VMEM(s, d) for s, d in scratch_defs]

    # ---- VMEM budget: scratch single-buffered + double-buffered I/O blocks + weights ----
    itemsize = jnp.dtype(x.dtype).itemsize
    scratch_bytes = sum(_pad_bytes(s, 4) for s, _ in scratch_defs)
    io_bytes = 2 * 2 * _pad_bytes((l_chunk, C), itemsize)
    weight_bytes = 2 * sum(_pad_bytes(p.shape, jnp.dtype(p.dtype).itemsize) for p in ordered)
    try:
        vmem_cap = int(pltpu.get_tpu_info().vmem_capacity_bytes)
    except Exception:
        vmem_cap = 64 << 20                          # conservative (v7x per-TC VMEM)
    needed = scratch_bytes + io_bytes + weight_bytes + (4 << 20)
    vmem_limit = int(min(max(needed, 32 << 20), int(vmem_cap * 0.875)))

    grid_spec = pltpu.PrefetchScalarGridSpec(
        num_scalar_prefetch=0,
        grid=(B, num_chunks),
        in_specs=[pl.BlockSpec((1, l_chunk, C), lambda b, l: (b, l, 0))]
                 + [param_spec(p) for p in ordered],
        out_specs=pl.BlockSpec((1, l_chunk, C), lambda b, l: (b, l, 0)),
        scratch_shapes=scratch_shapes,
    )

    y = pl.pallas_call(
        kernel,
        out_shape=jax.ShapeDtypeStruct((B, L, C), x.dtype),
        grid_spec=grid_spec,
        compiler_params=pltpu.CompilerParams(
            dimension_semantics=("parallel", "arbitrary"),
            vmem_limit_bytes=vmem_limit),
    )(x, *ordered)

    # MambaLayer.forward with downsample=None returns (x, H, W, T, x, H, W, T)
    # TODO(synk): downsample(dim, norm_layer, reduce_factor) branch not instantiated (downsample=None).
    return y, H, W, T, y, H, W, T


def mamba_layer_ref(x, params, *, d_state=16, d_conv=4):
    """Pure-JAX f32 reference of the same forward pass (correctness check)."""
    B, L, C = x.shape
    mu = x.mean(-1, keepdims=True)
    var = ((x - mu) ** 2).mean(-1, keepdims=True)
    xn = (x - mu) / jnp.sqrt(var + 1e-5) * params["gamma"][0] + params["beta"][0]
    xi = xn @ params["w_in_x"]
    z = xn @ params["w_in_z"]
    d_inner = xi.shape[-1]
    xp = jnp.pad(xi, ((0, 0), (d_conv - 1, 0), (0, 0)))
    conv = sum(xp[:, k:k + L, :] * params["conv_w"][k] for k in range(d_conv))
    u = jax.nn.silu(conv + params["conv_b"][0])
    dt = jax.nn.softplus((u @ params["w_xdt"]) @ params["w_dt"] + params["b_dt"][0])
    bm = u @ params["w_xb"]
    cm = u @ params["w_xc"]
    a = -jnp.exp(params["a_t"])                                  # (N, Din)
    dA = jnp.exp(dt[:, :, None, :] * a[None, None])              # (B, L, N, Din)
    dBu = bm[..., None] * (dt * u)[:, :, None, :]                # (B, L, N, Din)

    def scan_one(dA_s, dBu_s, c_s):
        def step(h, inp):
            da_t, dbu_t = inp
            h = da_t * h + dbu_t
            return h, h
        _, hs = lax.scan(step, jnp.zeros((d_state, d_inner), jnp.float32), (dA_s, dBu_s))
        return jnp.sum(hs * c_s[:, :, None], axis=1)

    y = jax.vmap(scan_one)(dA, dBu, cm)
    y = (y + u * params["d"][0]) * jax.nn.silu(z)
    return y @ params["w_out"]


if __name__ == "__main__":
    dim = 32
    d_state, d_conv, expand = 16, 4, 2
    B, H, W, T = 2, 4, 4, 8
    L = H * W * T                                   # 128 tokens

    key = jax.random.PRNGKey(0)
    k_x, k_p = jax.random.split(key)
    x = jax.random.normal(k_x, (B, L, dim), jnp.float32)
    params = init_params(k_p, dim, d_state=d_state, d_conv=d_conv, expand=expand)

    # l_chunk=64 -> 2 chunks per sequence: exercises the conv / scan-state carries.
    y, Ho, Wo, To, y_ds, Wh, Ww, Wt = mamba_layer_forward(
        x, H, W, T, params, d_state=d_state, d_conv=d_conv, l_chunk=64)
    y = jax.block_until_ready(y)

    assert y.shape == (B, L, dim) and y.dtype == x.dtype
    assert (Ho, Wo, To) == (H, W, T) and (Wh, Ww, Wt) == (H, W, T)
    assert bool(jnp.all(jnp.isfinite(y)))

    y_ref = mamba_layer_ref(x, params, d_state=d_state, d_conv=d_conv)
    err = float(jnp.max(jnp.abs(y - y_ref)))
    # in_proj / out_proj run in bf16 on the MXU (weights are bf16-exact); tolerance covers
    # the residual activation-rounding difference vs. the f32 reference.
    assert bool(jnp.allclose(y, y_ref, atol=5e-2, rtol=5e-2)), f"max abs err = {err}"
    print("KERNEL_OK")
</pallas_src>

<mosaic_0001>
module attributes {stable_mosaic.version = 11 : i64} {
  func.func @mamba_layer_kernel(%arg0: i32, %arg1: i32, %arg2: memref<1x64x32xf32, #tpu.memory_space<vmem>>, %arg3: memref<1x32xf32, #tpu.memory_space<vmem>>, %arg4: memref<1x32xf32, #tpu.memory_space<vmem>>, %arg5: memref<32x128xbf16, #tpu.memory_space<vmem>>, %arg6: memref<4x64xf32, #tpu.memory_space<vmem>>, %arg7: memref<1x64xf32, #tpu.memory_space<vmem>>, %arg8: memref<64x96xf32, #tpu.memory_space<vmem>>, %arg9: memref<1x64xf32, #tpu.memory_space<vmem>>, %arg10: memref<1x1024xf32, #tpu.memory_space<vmem>>, %arg11: memref<1x64xf32, #tpu.memory_space<vmem>>, %arg12: memref<64x32xbf16, #tpu.memory_space<vmem>>, %arg13: memref<1x64x32xf32, #tpu.memory_space<vmem>>, %arg14: memref<72x64xf32, #tpu.memory_space<vmem>>, %arg15: memref<8x64xf32, #tpu.memory_space<vmem>>, %arg16: memref<1x1024xf32, #tpu.memory_space<vmem>>, %arg17: memref<64x1024xf32, #tpu.memory_space<vmem>>, %arg18: memref<64x1024xf32, #tpu.memory_space<vmem>>, %arg19: memref<64x16xf32, #tpu.memory_space<vmem>>, %arg20: memref<64x64xf32, #tpu.memory_space<vmem>>) attributes {dimension_semantics = [#tpu.dimension_semantics<parallel>, #tpu.dimension_semantics<arbitrary>], iteration_bounds = array<i64: 2, 2>, scalar_prefetch = 0 : i64, scratch_operands = 7 : i64, tpu.core_type = #tpu.core_type<tc>, window_params = [{transform_indices = @transform_0, window_bounds = array<i64: 1, 64, 32>}, {pipeline_mode = #tpu.pipeline_mode<synchronous>, transform_indices = @transform_1, window_bounds = array<i64: 1, 32>}, {pipeline_mode = #tpu.pipeline_mode<synchronous>, transform_indices = @transform_2, window_bounds = array<i64: 1, 32>}, {pipeline_mode = #tpu.pipeline_mode<synchronous>, transform_indices = @transform_3, window_bounds = array<i64: 32, 128>}, {pipeline_mode = #tpu.pipeline_mode<synchronous>, transform_indices = @transform_4, window_bounds = array<i64: 4, 64>}, {pipeline_mode = #tpu.pipeline_mode<synchronous>, transform_indices = @transform_5, window_bounds = array<i64: 1, 64>}, {pipeline_mode = #tpu.pipeline_mode<synchronous>, transform_indices = @transform_6, window_bounds = array<i64: 64, 96>}, {pipeline_mode = #tpu.pipeline_mode<synchronous>, transform_indices = @transform_7, window_bounds = array<i64: 1, 64>}, {pipeline_mode = #tpu.pipeline_mode<synchronous>, transform_indices = @transform_8, window_bounds = array<i64: 1, 1024>}, {pipeline_mode = #tpu.pipeline_mode<synchronous>, transform_indices = @transform_9, window_bounds = array<i64: 1, 64>}, {pipeline_mode = #tpu.pipeline_mode<synchronous>, transform_indices = @transform_10, window_bounds = array<i64: 64, 32>}, {transform_indices = @transform_11, window_bounds = array<i64: 1, 64, 32>}]} {
    %c0_i32 = arith.constant 0 : i32
    %0 = arith.cmpi eq, %arg1, %c0_i32 : i32
    %1 = arith.extui %0 : i1 to i32
    %c0_i32_0 = arith.constant 0 : i32
    %2 = arith.cmpi ne, %1, %c0_i32_0 : i32
    scf.if %2 {
      %cst_61 = arith.constant 0.000000e+00 : f32
      %178 = vector.broadcast %cst_61 : f32 to vector<8x64xf32>
      %c0_62 = arith.constant 0 : index
      %c0_63 = arith.constant 0 : index
      %179 = vector.load %arg15[%c0_62, %c0_63] : memref<8x64xf32, #tpu.memory_space<vmem>>, vector<8x64xf32>
      tpu.vector_store %arg15[%c0_62, %c0_63], %178 {strides = array<i32>} : memref<8x64xf32, #tpu.memory_space<vmem>>, vector<8x64xf32>,
      %cst_64 = arith.constant 0.000000e+00 : f32
      %180 = vector.broadcast %cst_64 : f32 to vector<1x1024xf32>
      %c0_65 = arith.constant 0 : index
      %c0_66 = arith.constant 0 : index
      %181 = vector.load %arg16[%c0_65, %c0_66] : memref<1x1024xf32, #tpu.memory_space<vmem>>, vector<1x1024xf32>
      tpu.vector_store %arg16[%c0_65, %c0_66], %180 {strides = array<i32>} : memref<1x1024xf32, #tpu.memory_space<vmem>>, vector<1x1024xf32>,
    } else {
    }
    %c0 = arith.constant 0 : index
    %c0_1 = arith.constant 0 : index
    %c0_2 = arith.constant 0 : index
    %3 = vector.load %arg2[%c0, %c0_1, %c0_2] : memref<1x64x32xf32, #tpu.memory_space<vmem>>, vector<1x64x32xf32>
    %4 = vector.shape_cast %3 : vector<1x64x32xf32> to vector<64x32xf32>
    %cst = arith.constant dense<0.000000e+00> : vector<64xf32>
    %5 = vector.multi_reduction <add>, %4, %cst [1] : vector<64x32xf32> to vector<64xf32>
    %6 = vector.shape_cast %5 : vector<64xf32> to vector<64x1xf32>
    %cst_3 = arith.constant 3.200000e+01 : f32
    %7 = vector.broadcast %cst_3 : f32 to vector<64x1xf32>
    %8 = arith.divf %6, %7 : vector<64x1xf32>
    %9 = vector.broadcast %8 : vector<64x1xf32> to vector<64x32xf32>
    %10 = arith.subf %4, %9 : vector<64x32xf32>
    %11 = arith.mulf %10, %10 : vector<64x32xf32>
    %cst_4 = arith.constant dense<0.000000e+00> : vector<64xf32>
    %12 = vector.multi_reduction <add>, %11, %cst_4 [1] : vector<64x32xf32> to vector<64xf32>
    %13 = vector.shape_cast %12 : vector<64xf32> to vector<64x1xf32>
    %cst_5 = arith.constant 3.200000e+01 : f32
    %14 = vector.broadcast %cst_5 : f32 to vector<64x1xf32>
    %15 = arith.divf %13, %14 : vector<64x1xf32>
    %16 = vector.broadcast %8 : vector<64x1xf32> to vector<64x32xf32>
    %17 = arith.subf %4, %16 : vector<64x32xf32>
    %cst_6 = arith.constant 9.99999974E-6 : f32
    %18 = vector.broadcast %cst_6 : f32 to vector<64x1xf32>
    %19 = arith.addf %15, %18 : vector<64x1xf32>
    %20 = math.rsqrt %19 : vector<64x1xf32>
    %21 = vector.broadcast %20 : vector<64x1xf32> to vector<64x32xf32>
    %22 = arith.mulf %17, %21 : vector<64x32xf32>
    %c0_7 = arith.constant 0 : index
    %c0_8 = arith.constant 0 : index
    %23 = vector.load %arg3[%c0_7, %c0_8] : memref<1x32xf32, #tpu.memory_space<vmem>>, vector<1x32xf32>
    %24 = vector.broadcast %23 : vector<1x32xf32> to vector<64x32xf32>
    %25 = arith.mulf %22, %24 : vector<64x32xf32>
    %c0_9 = arith.constant 0 : index
    %c0_10 = arith.constant 0 : index
    %26 = vector.load %arg4[%c0_9, %c0_10] : memref<1x32xf32, #tpu.memory_space<vmem>>, vector<1x32xf32>
    %27 = vector.broadcast %26 : vector<1x32xf32> to vector<64x32xf32>
    %28 = arith.addf %25, %27 : vector<64x32xf32>
    %29 = arith.truncf %28 : vector<64x32xf32> to vector<64x32xbf16>
    %c0_11 = arith.constant 0 : index
    %c0_12 = arith.constant 0 : index
    %30 = vector.load %arg5[%c0_11, %c0_12] : memref<32x128xbf16, #tpu.memory_space<vmem>>, vector<32x128xbf16>
    %cst_13 = arith.constant dense<0.000000e+00> : vector<64x128xf32>
    %31 = tpu.matmul %29, %30, %cst_13 {dimension_numbers = #tpu.dot_dimension_numbers<[1], [0], [0], [1], [0, 0, 1, 1], [], []>} : vector<64x32xbf16>, vector<32x128xbf16>, vector<64x128xf32> -> vector<64x128xf32>
    %32 = vector.extract_strided_slice %31 {offsets = [0, 0], sizes = [64, 64], strides = [1, 1]} : vector<64x128xf32> to vector<64x64xf32>
    %33 = vector.extract_strided_slice %31 {offsets = [0, 64], sizes = [64, 64], strides = [1, 1]} : vector<64x128xf32> to vector<64x64xf32>
    %c0_14 = arith.constant 0 : index
    %c0_15 = arith.constant 0 : index
    %34 = vector.load %arg15[%c0_14, %c0_15] : memref<8x64xf32, #tpu.memory_space<vmem>>, vector<8x64xf32>
    %c0_16 = arith.constant 0 : index
    %c0_17 = arith.constant 0 : index
    %35 = vector.load %arg14[%c0_16, %c0_17] : memref<72x64xf32, #tpu.memory_space<vmem>>, vector<8x64xf32>
    tpu.vector_store %arg14[%c0_16, %c0_17], %34 {strides = array<i32>} : memref<72x64xf32, #tpu.memory_space<vmem>>, vector<8x64xf32>,
    %c8 = arith.constant 8 : index
    %c0_18 = arith.constant 0 : index
    %36 = vector.load %arg14[%c8, %c0_18] : memref<72x64xf32, #tpu.memory_space<vmem>>, vector<64x64xf32>
    tpu.vector_store %arg14[%c8, %c0_18], %32 {strides = array<i32>} : memref<72x64xf32, #tpu.memory_space<vmem>>, vector<64x64xf32>,
    %37 = vector.extract_strided_slice %32 {offsets = [56, 0], sizes = [8, 64], strides = [1, 1]} : vector<64x64xf32> to vector<8x64xf32>
    %c0_19 = arith.constant 0 : index
    %c0_20 = arith.constant 0 : index
    %38 = vector.load %arg15[%c0_19, %c0_20] : memref<8x64xf32, #tpu.memory_space<vmem>>, vector<8x64xf32>
    tpu.vector_store %arg15[%c0_19, %c0_20], %37 {strides = array<i32>} : memref<8x64xf32, #tpu.memory_space<vmem>>, vector<8x64xf32>,
    %c0_21 = arith.constant 0 : index
    %c0_22 = arith.constant 0 : index
    %39 = vector.load %arg6[%c0_21, %c0_22] : memref<4x64xf32, #tpu.memory_space<vmem>>, vector<4x64xf32>
    %40 = vector.extract_strided_slice %39 {offsets = [3, 0], sizes = [1, 64], strides = [1, 1]} : vector<4x64xf32> to vector<1x64xf32>
    %41 = vector.broadcast %40 : vector<1x64xf32> to vector<64x64xf32>
    %42 = arith.mulf %32, %41 : vector<64x64xf32>
    %c7 = arith.constant 7 : index
    %c0_23 = arith.constant 0 : index
    %43 = vector.load %arg14[%c7, %c0_23] : memref<72x64xf32, #tpu.memory_space<vmem>>, vector<64x64xf32>
    %44 = vector.extract_strided_slice %39 {offsets = [2, 0], sizes = [1, 64], strides = [1, 1]} : vector<4x64xf32> to vector<1x64xf32>
    %45 = vector.broadcast %44 : vector<1x64xf32> to vector<64x64xf32>
    %46 = arith.mulf %43, %45 : vector<64x64xf32>
    %47 = arith.addf %42, %46 : vector<64x64xf32>
    %c6 = arith.constant 6 : index
    %c0_24 = arith.constant 0 : index
    %48 = vector.load %arg14[%c6, %c0_24] : memref<72x64xf32, #tpu.memory_space<vmem>>, vector<64x64xf32>
    %49 = vector.extract_strided_slice %39 {offsets = [1, 0], sizes = [1, 64], strides = [1, 1]} : vector<4x64xf32> to vector<1x64xf32>
    %50 = vector.broadcast %49 : vector<1x64xf32> to vector<64x64xf32>
    %51 = arith.mulf %48, %50 : vector<64x64xf32>
    %52 = arith.addf %47, %51 : vector<64x64xf32>
    %c5 = arith.constant 5 : index
    %c0_25 = arith.constant 0 : index
    %53 = vector.load %arg14[%c5, %c0_25] : memref<72x64xf32, #tpu.memory_space<vmem>>, vector<64x64xf32>
    %54 = vector.extract_strided_slice %39 {offsets = [0, 0], sizes = [1, 64], strides = [1, 1]} : vector<4x64xf32> to vector<1x64xf32>
    %55 = vector.broadcast %54 : vector<1x64xf32> to vector<64x64xf32>
    %56 = arith.mulf %53, %55 : vector<64x64xf32>
    %57 = arith.addf %52, %56 : vector<64x64xf32>
    %c0_26 = arith.constant 0 : index
    %c0_27 = arith.constant 0 : index
    %58 = vector.load %arg7[%c0_26, %c0_27] : memref<1x64xf32, #tpu.memory_space<vmem>>, vector<1x64xf32>
    %59 = vector.broadcast %58 : vector<1x64xf32> to vector<64x64xf32>
    %60 = arith.addf %57, %59 : vector<64x64xf32>
    %61 = arith.negf %60 : vector<64x64xf32>
    %62 = math.exp %61 : vector<64x64xf32>
    %cst_28 = arith.constant 1.000000e+00 : f32
    %63 = vector.broadcast %cst_28 : f32 to vector<64x64xf32>
    %64 = arith.addf %63, %62 : vector<64x64xf32>
    %65 = arith.divf %63, %64 : vector<64x64xf32>
    %66 = arith.mulf %60, %65 : vector<64x64xf32>
    %c0_29 = arith.constant 0 : index
    %c0_30 = arith.constant 0 : index
    %67 = vector.load %arg8[%c0_29, %c0_30] : memref<64x96xf32, #tpu.memory_space<vmem>>, vector<64x96xf32>
    %cst_31 = arith.constant dense<0.000000e+00> : vector<64x96xf32>
    %68 = tpu.matmul %66, %67, %cst_31 {dimension_numbers = #tpu.dot_dimension_numbers<[1], [0], [0], [1], [0, 0, 1, 1], [], []>} : vector<64x64xf32>, vector<64x96xf32>, vector<64x96xf32> -> vector<64x96xf32>
    %69 = vector.extract_strided_slice %68 {offsets = [0, 0], sizes = [64, 64], strides = [1, 1]} : vector<64x96xf32> to vector<64x64xf32>
    %c0_32 = arith.constant 0 : index
    %c0_33 = arith.constant 0 : index
    %70 = vector.load %arg9[%c0_32, %c0_33] : memref<1x64xf32, #tpu.memory_space<vmem>>, vector<1x64xf32>
    %71 = vector.broadcast %70 : vector<1x64xf32> to vector<64x64xf32>
    %72 = arith.addf %69, %71 : vector<64x64xf32>
    %cst_34 = arith.constant 2.000000e+01 : f32
    %73 = vector.broadcast %cst_34 : f32 to vector<64x64xf32>
    %74 = arith.cmpf ogt, %72, %73 : vector<64x64xf32>
    %cst_35 = arith.constant 2.000000e+01 : f32
    %75 = vector.broadcast %cst_35 : f32 to vector<64x64xf32>
    %76 = arith.minimumf %72, %75 : vector<64x64xf32>
    %77 = math.exp %76 : vector<64x64xf32>
    %78 = math.log1p %77 : vector<64x64xf32>
    %79 = arith.select %74, %72, %78 : vector<64x64xi1>, vector<64x64xf32>
    %80 = vector.extract_strided_slice %68 {offsets = [0, 64], sizes = [64, 16], strides = [1, 1]} : vector<64x96xf32> to vector<64x16xf32>
    %81 = vector.extract_strided_slice %68 {offsets = [0, 80], sizes = [64, 16], strides = [1, 1]} : vector<64x96xf32> to vector<64x16xf32>
    %82 = tpu.concatenate %79, %79, %79, %79, %79, %79, %79, %79, %79, %79, %79, %79, %79, %79, %79, %79 in 1 : vector<64x64xf32>, vector<64x64xf32>, vector<64x64xf32>, vector<64x64xf32>, vector<64x64xf32>, vector<64x64xf32>, vector<64x64xf32>, vector<64x64xf32>, vector<64x64xf32>, vector<64x64xf32>, vector<64x64xf32>, vector<64x64xf32>, vector<64x64xf32>, vector<64x64xf32>, vector<64x64xf32>, vector<64x64xf32> -> vector<64x1024xf32>
    %c0_36 = arith.constant 0 : index
    %c0_37 = arith.constant 0 : index
    %83 = vector.load %arg10[%c0_36, %c0_37] : memref<1x1024xf32, #tpu.memory_space<vmem>>, vector<1x1024xf32>
    %84 = vector.broadcast %83 : vector<1x1024xf32> to vector<64x1024xf32>
    %85 = arith.mulf %82, %84 : vector<64x1024xf32>
    %86 = math.exp %85 : vector<64x1024xf32>
    %c0_38 = arith.constant 0 : index
    %c0_39 = arith.constant 0 : index
    %87 = vector.load %arg17[%c0_38, %c0_39] : memref<64x1024xf32, #tpu.memory_space<vmem>>, vector<64x1024xf32>
    tpu.vector_store %arg17[%c0_38, %c0_39], %86 {strides = array<i32>} : memref<64x1024xf32, #tpu.memory_space<vmem>>, vector<64x1024xf32>,
    %88 = arith.mulf %79, %66 : vector<64x64xf32>
    %89 = vector.extract_strided_slice %80 {offsets = [0, 0], sizes = [64, 1], strides = [1, 1]} : vector<64x16xf32> to vector<64x1xf32>
    %90 = vector.shape_cast %89 : vector<64x1xf32> to vector<64x1xf32>
    %91 = vector.broadcast %90 : vector<64x1xf32> to vector<64x64xf32>
    %92 = arith.mulf %91, %88 : vector<64x64xf32>
    %93 = vector.extract_strided_slice %80 {offsets = [0, 1], sizes = [64, 1], strides = [1, 1]} : vector<64x16xf32> to vector<64x1xf32>
    %94 = vector.shape_cast %93 : vector<64x1xf32> to vector<64x1xf32>
    %95 = vector.broadcast %94 : vector<64x1xf32> to vector<64x64xf32>
    %96 = arith.mulf %95, %88 : vector<64x64xf32>
    %97 = vector.extract_strided_slice %80 {offsets = [0, 2], sizes = [64, 1], strides = [1, 1]} : vector<64x16xf32> to vector<64x1xf32>
    %98 = vector.shape_cast %97 : vector<64x1xf32> to vector<64x1xf32>
    %99 = vector.broadcast %98 : vector<64x1xf32> to vector<64x64xf32>
    %100 = arith.mulf %99, %88 : vector<64x64xf32>
    %101 = vector.extract_strided_slice %80 {offsets = [0, 3], sizes = [64, 1], strides = [1, 1]} : vector<64x16xf32> to vector<64x1xf32>
    %102 = vector.shape_cast %101 : vector<64x1xf32> to vector<64x1xf32>
    %103 = vector.broadcast %102 : vector<64x1xf32> to vector<64x64xf32>
    %104 = arith.mulf %103, %88 : vector<64x64xf32>
    %105 = vector.extract_strided_slice %80 {offsets = [0, 4], sizes = [64, 1], strides = [1, 1]} : vector<64x16xf32> to vector<64x1xf32>
    %106 = vector.shape_cast %105 : vector<64x1xf32> to vector<64x1xf32>
    %107 = vector.broadcast %106 : vector<64x1xf32> to vector<64x64xf32>
    %108 = arith.mulf %107, %88 : vector<64x64xf32>
    %109 = vector.extract_strided_slice %80 {offsets = [0, 5], sizes = [64, 1], strides = [1, 1]} : vector<64x16xf32> to vector<64x1xf32>
    %110 = vector.shape_cast %109 : vector<64x1xf32> to vector<64x1xf32>
    %111 = vector.broadcast %110 : vector<64x1xf32> to vector<64x64xf32>
    %112 = arith.mulf %111, %88 : vector<64x64xf32>
    %113 = vector.extract_strided_slice %80 {offsets = [0, 6], sizes = [64, 1], strides = [1, 1]} : vector<64x16xf32> to vector<64x1xf32>
    %114 = vector.shape_cast %113 : vector<64x1xf32> to vector<64x1xf32>
    %115 = vector.broadcast %114 : vector<64x1xf32> to vector<64x64xf32>
    %116 = arith.mulf %115, %88 : vector<64x64xf32>
    %117 = vector.extract_strided_slice %80 {offsets = [0, 7], sizes = [64, 1], strides = [1, 1]} : vector<64x16xf32> to vector<64x1xf32>
    %118 = vector.shape_cast %117 : vector<64x1xf32> to vector<64x1xf32>
    %119 = vector.broadcast %118 : vector<64x1xf32> to vector<64x64xf32>
    %120 = arith.mulf %119, %88 : vector<64x64xf32>
    %121 = vector.extract_strided_slice %80 {offsets = [0, 8], sizes = [64, 1], strides = [1, 1]} : vector<64x16xf32> to vector<64x1xf32>
    %122 = vector.shape_cast %121 : vector<64x1xf32> to vector<64x1xf32>
    %123 = vector.broadcast %122 : vector<64x1xf32> to vector<64x64xf32>
    %124 = arith.mulf %123, %88 : vector<64x64xf32>
    %125 = vector.extract_strided_slice %80 {offsets = [0, 9], sizes = [64, 1], strides = [1, 1]} : vector<64x16xf32> to vector<64x1xf32>
    %126 = vector.shape_cast %125 : vector<64x1xf32> to vector<64x1xf32>
    %127 = vector.broadcast %126 : vector<64x1xf32> to vector<64x64xf32>
    %128 = arith.mulf %127, %88 : vector<64x64xf32>
    %129 = vector.extract_strided_slice %80 {offsets = [0, 10], sizes = [64, 1], strides = [1, 1]} : vector<64x16xf32> to vector<64x1xf32>
    %130 = vector.shape_cast %129 : vector<64x1xf32> to vector<64x1xf32>
    %131 = vector.broadcast %130 : vector<64x1xf32> to vector<64x64xf32>
    %132 = arith.mulf %131, %88 : vector<64x64xf32>
    %133 = vector.extract_strided_slice %80 {offsets = [0, 11], sizes = [64, 1], strides = [1, 1]} : vector<64x16xf32> to vector<64x1xf32>
    %134 = vector.shape_cast %133 : vector<64x1xf32> to vector<64x1xf32>
    %135 = vector.broadcast %134 : vector<64x1xf32> to vector<64x64xf32>
    %136 = arith.mulf %135, %88 : vector<64x64xf32>
    %137 = vector.extract_strided_slice %80 {offsets = [0, 12], sizes = [64, 1], strides = [1, 1]} : vector<64x16xf32> to vector<64x1xf32>
    %138 = vector.shape_cast %137 : vector<64x1xf32> to vector<64x1xf32>
    %139 = vector.broadcast %138 : vector<64x1xf32> to vector<64x64xf32>
    %140 = arith.mulf %139, %88 : vector<64x64xf32>
    %141 = vector.extract_strided_slice %80 {offsets = [0, 13], sizes = [64, 1], strides = [1, 1]} : vector<64x16xf32> to vector<64x1xf32>
    %142 = vector.shape_cast %141 : vector<64x1xf32> to vector<64x1xf32>
    %143 = vector.broadcast %142 : vector<64x1xf32> to vector<64x64xf32>
    %144 = arith.mulf %143, %88 : vector<64x64xf32>
    %145 = vector.extract_strided_slice %80 {offsets = [0, 14], sizes = [64, 1], strides = [1, 1]} : vector<64x16xf32> to vector<64x1xf32>
    %146 = vector.shape_cast %145 : vector<64x1xf32> to vector<64x1xf32>
    %147 = vector.broadcast %146 : vector<64x1xf32> to vector<64x64xf32>
    %148 = arith.mulf %147, %88 : vector<64x64xf32>
    %149 = vector.extract_strided_slice %80 {offsets = [0, 15], sizes = [64, 1], strides = [1, 1]} : vector<64x16xf32> to vector<64x1xf32>
    %150 = vector.shape_cast %149 : vector<64x1xf32> to vector<64x1xf32>
    %151 = vector.broadcast %150 : vector<64x1xf32> to vector<64x64xf32>
    %152 = arith.mulf %151, %88 : vector<64x64xf32>
    %153 = tpu.concatenate %92, %96, %100, %104, %108, %112, %116, %120, %124, %128, %132, %136, %140, %144, %148, %152 in 1 : vector<64x64xf32>, vector<64x64xf32>, vector<64x64xf32>, vector<64x64xf32>, vector<64x64xf32>, vector<64x64xf32>, vector<64x64xf32>, vector<64x64xf32>, vector<64x64xf32>, vector<64x64xf32>, vector<64x64xf32>, vector<64x64xf32>, vector<64x64xf32>, vector<64x64xf32>, vector<64x64xf32>, vector<64x64xf32> -> vector<64x1024xf32>
    %c0_40 = arith.constant 0 : index
    %c0_41 = arith.constant 0 : index
    %154 = vector.load %arg18[%c0_40, %c0_41] : memref<64x1024xf32, #tpu.memory_space<vmem>>, vector<64x1024xf32>
    tpu.vector_store %arg18[%c0_40, %c0_41], %153 {strides = array<i32>} : memref<64x1024xf32, #tpu.memory_space<vmem>>, vector<64x1024xf32>,
    %c0_42 = arith.constant 0 : index
    %c0_43 = arith.constant 0 : index
    %155 = vector.load %arg19[%c0_42, %c0_43] : memref<64x16xf32, #tpu.memory_space<vmem>>, vector<64x16xf32>
    tpu.vector_store %arg19[%c0_42, %c0_43], %81 {strides = array<i32>} : memref<64x16xf32, #tpu.memory_space<vmem>>, vector<64x16xf32>,
    %c0_44 = arith.constant 0 : index
    %c0_45 = arith.constant 0 : index
    %156 = vector.load %arg16[%c0_44, %c0_45] : memref<1x1024xf32, #tpu.memory_space<vmem>>, vector<1x1024xf32>
    %c0_i32_46 = arith.constant 0 : i32
    %c8_i32 = arith.constant 8 : i32
    %157 = arith.addi %c0_i32_46, %c8_i32 : i32
    %c1_i32 = arith.constant 1 : i32
    %158 = scf.for %arg21 = %c0_i32_46 to %157 step %c1_i32 iter_args(%arg22 = %156) -> (vector<1x1024xf32>)  : i32 {
      %c8_i32_61 = arith.constant 8 : i32
      %178 = arith.muli %arg21, %c8_i32_61 : i32
      %179 = tpu.assume_multiple %178, 8 : i32
      %180 = arith.index_cast %179 : i32 to index
      %c0_62 = arith.constant 0 : index
      %181 = vector.load %arg17[%180, %c0_62] : memref<64x1024xf32, #tpu.memory_space<vmem>>, vector<8x1024xf32>
      %182 = arith.index_cast %179 : i32 to index
      %c0_63 = arith.constant 0 : index
      %183 = vector.load %arg18[%182, %c0_63] : memref<64x1024xf32, #tpu.memory_space<vmem>>, vector<8x1024xf32>
      %184 = arith.index_cast %179 : i32 to index
      %c0_64 = arith.constant 0 : index
      %185 = vector.load %arg19[%184, %c0_64] : memref<64x16xf32, #tpu.memory_space<vmem>>, vector<8x16xf32>
      %186 = vector.extract_strided_slice %185 {offsets = [0, 0], sizes = [8, 1], strides = [1, 1]} : vector<8x16xf32> to vector<8x1xf32>
      %187 = vector.shape_cast %186 : vector<8x1xf32> to vector<8x1xf32>
      %188 = vector.broadcast %187 : vector<8x1xf32> to vector<8x64xf32>
      %189 = vector.extract_strided_slice %185 {offsets = [0, 1], sizes = [8, 1], strides = [1, 1]} : vector<8x16xf32> to vector<8x1xf32>
      %190 = vector.shape_cast %189 : vector<8x1xf32> to vector<8x1xf32>
      %191 = vector.broadcast %190 : vector<8x1xf32> to vector<8x64xf32>
      %192 = vector.extract_strided_slice %185 {offsets = [0, 2], sizes = [8, 1], strides = [1, 1]} : vector<8x16xf32> to vector<8x1xf32>
      %193 = vector.shape_cast %192 : vector<8x1xf32> to vector<8x1xf32>
      %194 = vector.broadcast %193 : vector<8x1xf32> to vector<8x64xf32>
      %195 = vector.extract_strided_slice %185 {offsets = [0, 3], sizes = [8, 1], strides = [1, 1]} : vector<8x16xf32> to vector<8x1xf32>
      %196 = vector.shape_cast %195 : vector<8x1xf32> to vector<8x1xf32>
      %197 = vector.broadcast %196 : vector<8x1xf32> to vector<8x64xf32>
      %198 = vector.extract_strided_slice %185 {offsets = [0, 4], sizes = [8, 1], strides = [1, 1]} : vector<8x16xf32> to vector<8x1xf32>
      %199 = vector.shape_cast %198 : vector<8x1xf32> to vector<8x1xf32>
      %200 = vector.broadcast %199 : vector<8x1xf32> to vector<8x64xf32>
      %201 = vector.extract_strided_slice %185 {offsets = [0, 5], sizes = [8, 1], strides = [1, 1]} : vector<8x16xf32> to vector<8x1xf32>
      %202 = vector.shape_cast %201 : vector<8x1xf32> to vector<8x1xf32>
      %203 = vector.broadcast %202 : vector<8x1xf32> to vector<8x64xf32>
      %204 = vector.extract_strided_slice %185 {offsets = [0, 6], sizes = [8, 1], strides = [1, 1]} : vector<8x16xf32> to vector<8x1xf32>
      %205 = vector.shape_cast %204 : vector<8x1xf32> to vector<8x1xf32>
      %206 = vector.broadcast %205 : vector<8x1xf32> to vector<8x64xf32>
      %207 = vector.extract_strided_slice %185 {offsets = [0, 7], sizes = [8, 1], strides = [1, 1]} : vector<8x16xf32> to vector<8x1xf32>
      %208 = vector.shape_cast %207 : vector<8x1xf32> to vector<8x1xf32>
      %209 = vector.broadcast %208 : vector<8x1xf32> to vector<8x64xf32>
      %210 = vector.extract_strided_slice %185 {offsets = [0, 8], sizes = [8, 1], strides = [1, 1]} : vector<8x16xf32> to vector<8x1xf32>
      %211 = vector.shape_cast %210 : vector<8x1xf32> to vector<8x1xf32>
      %212 = vector.broadcast %211 : vector<8x1xf32> to vector<8x64xf32>
      %213 = vector.extract_strided_slice %185 {offsets = [0, 9], sizes = [8, 1], strides = [1, 1]} : vector<8x16xf32> to vector<8x1xf32>
      %214 = vector.shape_cast %213 : vector<8x1xf32> to vector<8x1xf32>
      %215 = vector.broadcast %214 : vector<8x1xf32> to vector<8x64xf32>
      %216 = vector.extract_strided_slice %185 {offsets = [0, 10], sizes = [8, 1], strides = [1, 1]} : vector<8x16xf32> to vector<8x1xf32>
      %217 = vector.shape_cast %216 : vector<8x1xf32> to vector<8x1xf32>
      %218 = vector.broadcast %217 : vector<8x1xf32> to vector<8x64xf32>
      %219 = vector.extract_strided_slice %185 {offsets = [0, 11], sizes = [8, 1], strides = [1, 1]} : vector<8x16xf32> to vector<8x1xf32>
      %220 = vector.shape_cast %219 : vector<8x1xf32> to vector<8x1xf32>
      %221 = vector.broadcast %220 : vector<8x1xf32> to vector<8x64xf32>
      %222 = vector.extract_strided_slice %185 {offsets = [0, 12], sizes = [8, 1], strides = [1, 1]} : vector<8x16xf32> to vector<8x1xf32>
      %223 = vector.shape_cast %222 : vector<8x1xf32> to vector<8x1xf32>
      %224 = vector.broadcast %223 : vector<8x1xf32> to vector<8x64xf32>
      %225 = vector.extract_strided_slice %185 {offsets = [0, 13], sizes = [8, 1], strides = [1, 1]} : vector<8x16xf32> to vector<8x1xf32>
      %226 = vector.shape_cast %225 : vector<8x1xf32> to vector<8x1xf32>
      %227 = vector.broadcast %226 : vector<8x1xf32> to vector<8x64xf32>
      %228 = vector.extract_strided_slice %185 {offsets = [0, 14], sizes = [8, 1], strides = [1, 1]} : vector<8x16xf32> to vector<8x1xf32>
      %229 = vector.shape_cast %228 : vector<8x1xf32> to vector<8x1xf32>
      %230 = vector.broadcast %229 : vector<8x1xf32> to vector<8x64xf32>
      %231 = vector.extract_strided_slice %185 {offsets = [0, 15], sizes = [8, 1], strides = [1, 1]} : vector<8x16xf32> to vector<8x1xf32>
      %232 = vector.shape_cast %231 : vector<8x1xf32> to vector<8x1xf32>
      %233 = vector.broadcast %232 : vector<8x1xf32> to vector<8x64xf32>
      %234 = vector.extract_strided_slice %181 {offsets = [0, 0], sizes = [1, 1024], strides = [1, 1]} : vector<8x1024xf32> to vector<1x1024xf32>
      %235 = arith.mulf %234, %arg22 : vector<1x1024xf32>
      %236 = vector.extract_strided_slice %183 {offsets = [0, 0], sizes = [1, 1024], strides = [1, 1]} : vector<8x1024xf32> to vector<1x1024xf32>
      %237 = arith.addf %235, %236 : vector<1x1024xf32>
      %238 = vector.extract_strided_slice %188 {offsets = [0, 0], sizes = [1, 64], strides = [1, 1]} : vector<8x64xf32> to vector<1x64xf32>
      %239 = vector.extract_strided_slice %237 {offsets = [0, 0], sizes = [1, 64], strides = [1, 1]} : vector<1x1024xf32> to vector<1x64xf32>
      %240 = arith.mulf %238, %239 : vector<1x64xf32>
      %241 = vector.extract_strided_slice %191 {offsets = [0, 0], sizes = [1, 64], strides = [1, 1]} : vector<8x64xf32> to vector<1x64xf32>
      %242 = vector.extract_strided_slice %237 {offsets = [0, 64], sizes = [1, 64], strides = [1, 1]} : vector<1x1024xf32> to vector<1x64xf32>
      %243 = arith.mulf %241, %242 : vector<1x64xf32>
      %244 = arith.addf %240, %243 : vector<1x64xf32>
      %245 = vector.extract_strided_slice %194 {offsets = [0, 0], sizes = [1, 64], strides = [1, 1]} : vector<8x64xf32> to vector<1x64xf32>
      %246 = vector.extract_strided_slice %237 {offsets = [0, 128], sizes = [1, 64], strides = [1, 1]} : vector<1x1024xf32> to vector<1x64xf32>
      %247 = arith.mulf %245, %246 : vector<1x64xf32>
      %248 = arith.addf %244, %247 : vector<1x64xf32>
      %249 = vector.extract_strided_slice %197 {offsets = [0, 0], sizes = [1, 64], strides = [1, 1]} : vector<8x64xf32> to vector<1x64xf32>
      %250 = vector.extract_strided_slice %237 {offsets = [0, 192], sizes = [1, 64], strides = [1, 1]} : vector<1x1024xf32> to vector<1x64xf32>
      %251 = arith.mulf %249, %250 : vector<1x64xf32>
      %252 = arith.addf %248, %251 : vector<1x64xf32>
      %253 = vector.extract_strided_slice %200 {offsets = [0, 0], sizes = [1, 64], strides = [1, 1]} : vector<8x64xf32> to vector<1x64xf32>
      %254 = vector.extract_strided_slice %237 {offsets = [0, 256], sizes = [1, 64], strides = [1, 1]} : vector<1x1024xf32> to vector<1x64xf32>
      %255 = arith.mulf %253, %254 : vector<1x64xf32>
      %256 = arith.addf %252, %255 : vector<1x64xf32>
      %257 = vector.extract_strided_slice %203 {offsets = [0, 0], sizes = [1, 64], strides = [1, 1]} : vector<8x64xf32> to vector<1x64xf32>
      %258 = vector.extract_strided_slice %237 {offsets = [0, 320], sizes = [1, 64], strides = [1, 1]} : vector<1x1024xf32> to vector<1x64xf32>
      %259 = arith.mulf %257, %258 : vector<1x64xf32>
      %260 = arith.addf %256, %259 : vector<1x64xf32>
      %261 = vector.extract_strided_slice %206 {offsets = [0, 0], sizes = [1, 64], strides = [1, 1]} : vector<8x64xf32> to vector<1x64xf32>
      %262 = vector.extract_strided_slice %237 {offsets = [0, 384], sizes = [1, 64], strides = [1, 1]} : vector<1x1024xf32> to vector<1x64xf32>
      %263 = arith.mulf %261, %262 : vector<1x64xf32>
      %264 = arith.addf %260, %263 : vector<1x64xf32>
      %265 = vector.extract_strided_slice %209 {offsets = [0, 0], sizes = [1, 64], strides = [1, 1]} : vector<8x64xf32> to vector<1x64xf32>
      %266 = vector.extract_strided_slice %237 {offsets = [0, 448], sizes = [1, 64], strides = [1, 1]} : vector<1x1024xf32> to vector<1x64xf32>
      %267 = arith.mulf %265, %266 : vector<1x64xf32>
      %268 = arith.addf %264, %267 : vector<1x64xf32>
      %269 = vector.extract_strided_slice %212 {offsets = [0, 0], sizes = [1, 64], strides = [1, 1]} : vector<8x64xf32> to vector<1x64xf32>
      %270 = vector.extract_strided_slice %237 {offsets = [0, 512], sizes = [1, 64], strides = [1, 1]} : vector<1x1024xf32> to vector<1x64xf32>
      %271 = arith.mulf %269, %270 : vector<1x64xf32>
      %272 = arith.addf %268, %271 : vector<1x64xf32>
      %273 = vector.extract_strided_slice %215 {offsets = [0, 0], sizes = [1, 64], strides = [1, 1]} : vector<8x64xf32> to vector<1x64xf32>
      %274 = vector.extract_strided_slice %237 {offsets = [0, 576], sizes = [1, 64], strides = [1, 1]} : vector<1x1024xf32> to vector<1x64xf32>
      %275 = arith.mulf %273, %274 : vector<1x64xf32>
      %276 = arith.addf %272, %275 : vector<1x64xf32>
      %277 = vector.extract_strided_slice %218 {offsets = [0, 0], sizes = [1, 64], strides = [1, 1]} : vector<8x64xf32> to vector<1x64xf32>
      %278 = vector.extract_strided_slice %237 {offsets = [0, 640], sizes = [1, 64], strides = [1, 1]} : vector<1x1024xf32> to vector<1x64xf32>
      %279 = arith.mulf %277, %278 : vector<1x64xf32>
      %280 = arith.addf %276, %279 : vector<1x64xf32>
      %281 = vector.extract_strided_slice %221 {offsets = [0, 0], sizes = [1, 64], strides = [1, 1]} : vector<8x64xf32> to vector<1x64xf32>
      %282 = vector.extract_strided_slice %237 {offsets = [0, 704], sizes = [1, 64], strides = [1, 1]} : vector<1x1024xf32> to vector<1x64xf32>
      %283 = arith.mulf %281, %282 : vector<1x64xf32>
      %284 = arith.addf %280, %283 : vector<1x64xf32>
      %285 = vector.extract_strided_slice %224 {offsets = [0, 0], sizes = [1, 64], strides = [1, 1]} : vector<8x64xf32> to vector<1x64xf32>
      %286 = vector.extract_strided_slice %237 {offsets = [0, 768], sizes = [1, 64], strides = [1, 1]} : vector<1x1024xf32> to vector<1x64xf32>
      %287 = arith.mulf %285, %286 : vector<1x64xf32>
      %288 = arith.addf %284, %287 : vector<1x64xf32>
      %289 = vector.extract_strided_slice %227 {offsets = [0, 0], sizes = [1, 64], strides = [1, 1]} : vector<8x64xf32> to vector<1x64xf32>
      %290 = vector.extract_strided_slice %237 {offsets = [0, 832], sizes = [1, 64], strides = [1, 1]} : vector<1x1024xf32> to vector<1x64xf32>
      %291 = arith.mulf %289, %290 : vector<1x64xf32>
      %292 = arith.addf %288, %291 : vector<1x64xf32>
      %293 = vector.extract_strided_slice %230 {offsets = [0, 0], sizes = [1, 64], strides = [1, 1]} : vector<8x64xf32> to vector<1x64xf32>
      %294 = vector.extract_strided_slice %237 {offsets = [0, 896], sizes = [1, 64], strides = [1, 1]} : vector<1x1024xf32> to vector<1x64xf32>
      %295 = arith.mulf %293, %294 : vector<1x64xf32>
      %296 = arith.addf %292, %295 : vector<1x64xf32>
      %297 = vector.extract_strided_slice %233 {offsets = [0, 0], sizes = [1, 64], strides = [1, 1]} : vector<8x64xf32> to vector<1x64xf32>
      %298 = vector.extract_strided_slice %237 {offsets = [0, 960], sizes = [1, 64], strides = [1, 1]} : vector<1x1024xf32> to vector<1x64xf32>
      %299 = arith.mulf %297, %298 : vector<1x64xf32>
      %300 = arith.addf %296, %299 : vector<1x64xf32>
      %301 = vector.extract_strided_slice %181 {offsets = [1, 0], sizes = [1, 1024], strides = [1, 1]} : vector<8x1024xf32> to vector<1x1024xf32>
      %302 = arith.mulf %301, %237 : vector<1x1024xf32>
      %303 = vector.extract_strided_slice %183 {offsets = [1, 0], sizes = [1, 1024], strides = [1, 1]} : vector<8x1024xf32> to vector<1x1024xf32>
      %304 = arith.addf %302, %303 : vector<1x1024xf32>
      %305 = vector.extract_strided_slice %188 {offsets = [1, 0], sizes = [1, 64], strides = [1, 1]} : vector<8x64xf32> to vector<1x64xf32>
      %306 = vector.extract_strided_slice %304 {offsets = [0, 0], sizes = [1, 64], strides = [1, 1]} : vector<1x1024xf32> to vector<1x64xf32>
      %307 = arith.mulf %305, %306 : vector<1x64xf32>
      %308 = vector.extract_strided_slice %191 {offsets = [1, 0], sizes = [1, 64], strides = [1, 1]} : vector<8x64xf32> to vector<1x64xf32>
      %309 = vector.extract_strided_slice %304 {offsets = [0, 64], sizes = [1, 64], strides = [1, 1]} : vector<1x1024xf32> to vector<1x64xf32>
      %310 = arith.mulf %308, %309 : vector<1x64xf32>
      %311 = arith.addf %307, %310 : vector<1x64xf32>
      %312 = vector.extract_strided_slice %194 {offsets = [1, 0], sizes = [1, 64], strides = [1, 1]} : vector<8x64xf32> to vector<1x64xf32>
      %313 = vector.extract_strided_slice %304 {offsets = [0, 128], sizes = [1, 64], strides = [1, 1]} : vector<1x1024xf32> to vector<1x64xf32>
      %314 = arith.mulf %312, %313 : vector<1x64xf32>
      %315 = arith.addf %311, %314 : vector<1x64xf32>
      %316 = vector.extract_strided_slice %197 {offsets = [1, 0], sizes = [1, 64], strides = [1, 1]} : vector<8x64xf32> to vector<1x64xf32>
      %317 = vector.extract_strided_slice %304 {offsets = [0, 192], sizes = [1, 64], strides = [1, 1]} : vector<1x1024xf32> to vector<1x64xf32>
      %318 = arith.mulf %316, %317 : vector<1x64xf32>
      %319 = arith.addf %315, %318 : vector<1x64xf32>
      %320 = vector.extract_strided_slice %200 {offsets = [1, 0], sizes = [1, 64], strides = [1, 1]} : vector<8x64xf32> to vector<1x64xf32>
      %321 = vector.extract_strided_slice %304 {offsets = [0, 256], sizes = [1, 64], strides = [1, 1]} : vector<1x1024xf32> to vector<1x64xf32>
      %322 = arith.mulf %320, %321 : vector<1x64xf32>
      %323 = arith.addf %319, %322 : vector<1x64xf32>
      %324 = vector.extract_strided_slice %203 {offsets = [1, 0], sizes = [1, 64], strides = [1, 1]} : vector<8x64xf32> to vector<1x64xf32>
      %325 = vector.extract_strided_slice %304 {offsets = [0, 320], sizes = [1, 64], strides = [1, 1]} : vector<1x1024xf32> to vector<1x64xf32>
      %326 = arith.mulf %324, %325 : vector<1x64xf32>
      %327 = arith.addf %323, %326 : vector<1x64xf32>
      %328 = vector.extract_strided_slice %206 {offsets = [1, 0], sizes = [1, 64], strides = [1, 1]} : vector<8x64xf32> to vector<1x64xf32>
      %329 = vector.extract_strided_slice %304 {offsets = [0, 384], sizes = [1, 64], strides = [1, 1]} : vector<1x1024xf32> to vector<1x64xf32>
      %330 = arith.mulf %328, %329 : vector<1x64xf32>
      %331 = arith.addf %327, %330 : vector<1x64xf32>
      %332 = vector.extract_strided_slice %209 {offsets = [1, 0], sizes = [1, 64], strides = [1, 1]} : vector<8x64xf32> to vector<1x64xf32>
      %333 = vector.extract_strided_slice %304 {offsets = [0, 448], sizes = [1, 64], strides = [1, 1]} : vector<1x1024xf32> to vector<1x64xf32>
      %334 = arith.mulf %332, %333 : vector<1x64xf32>
      %335 = arith.addf %331, %334 : vector<1x64xf32>
      %336 = vector.extract_strided_slice %212 {offsets = [1, 0], sizes = [1, 64], strides = [1, 1]} : vector<8x64xf32> to vector<1x64xf32>
      %337 = vector.extract_strided_slice %304 {offsets = [0, 512], sizes = [1, 64], strides = [1, 1]} : vector<1x1024xf32> to vector<1x64xf32>
      %338 = arith.mulf %336, %337 : vector<1x64xf32>
      %339 = arith.addf %335, %338 : vector<1x64xf32>
      %340 = vector.extract_strided_slice %215 {offsets = [1, 0], sizes = [1, 64], strides = [1, 1]} : vector<8x64xf32> to vector<1x64xf32>
      %341 = vector.extract_strided_slice %304 {offsets = [0, 576], sizes = [1, 64], strides = [1, 1]} : vector<1x1024xf32> to vector<1x64xf32>
      %342 = arith.mulf %340, %341 : vector<1x64xf32>
      %343 = arith.addf %339, %342 : vector<1x64xf32>
      %344 = vector.extract_strided_slice %218 {offsets = [1, 0], sizes = [1, 64], strides = [1, 1]} : vector<8x64xf32> to vector<1x64xf32>
      %345 = vector.extract_strided_slice %304 {offsets = [0, 640], sizes = [1, 64], strides = [1, 1]} : vector<1x1024xf32> to vector<1x64xf32>
      %346 = arith.mulf %344, %345 : vector<1x64xf32>
      %347 = arith.addf %343, %346 : vector<1x64xf32>
      %348 = vector.extract_strided_slice %221 {offsets = [1, 0], sizes = [1, 64], strides = [1, 1]} : vector<8x64xf32> to vector<1x64xf32>
      %349 = vector.extract_strided_slice %304 {offsets = [0, 704], sizes = [1, 64], strides = [1, 1]} : vector<1x1024xf32> to vector<1x64xf32>
      %350 = arith.mulf %348, %349 : vector<1x64xf32>
      %351 = arith.addf %347, %350 : vector<1x64xf32>
      %352 = vector.extract_strided_slice %224 {offsets = [1, 0], sizes = [1, 64], strides = [1, 1]} : vector<8x64xf32> to vector<1x64xf32>
      %353 = vector.extract_strided_slice %304 {offsets = [0, 768], sizes = [1, 64], strides = [1, 1]} : vector<1x1024xf32> to vector<1x64xf32>
      %354 = arith.mulf %352, %353 : vector<1x64xf32>
      %355 = arith.addf %351, %354 : vector<1x64xf32>
      %356 = vector.extract_strided_slice %227 {offsets = [1, 0], sizes = [1, 64], strides = [1, 1]} : vector<8x64xf32> to vector<1x64xf32>
      %357 = vector.extract_strided_slice %304 {offsets = [0, 832], sizes = [1, 64], strides = [1, 1]} : vector<1x1024xf32> to vector<1x64xf32>
      %358 = arith.mulf %356, %357 : vector<1x64xf32>
      %359 = arith.addf %355, %358 : vector<1x64xf32>
      %360 = vector.extract_strided_slice %230 {offsets = [1, 0], sizes = [1, 64], strides = [1, 1]} : vector<8x64xf32> to vector<1x64xf32>
      %361 = vector.extract_strided_slice %304 {offsets = [0, 896], sizes = [1, 64], strides = [1, 1]} : vector<1x1024xf32> to vector<1x64xf32>
      %362 = arith.mulf %360, %361 : vector<1x64xf32>
      %363 = arith.addf %359, %362 : vector<1x64xf32>
      %364 = vector.extract_strided_slice %233 {offsets = [1, 0], sizes = [1, 64], strides = [1, 1]} : vector<8x64xf32> to vector<1x64xf32>
      %365 = vector.extract_strided_slice %304 {offsets = [0, 960], sizes = [1, 64], strides = [1, 1]} : vector<1x1024xf32> to vector<1x64xf32>
      %366 = arith.mulf %364, %365 : vector<1x64xf32>
      %367 = arith.addf %363, %366 : vector<1x64xf32>
      %368 = vector.extract_strided_slice %181 {offsets = [2, 0], sizes = [1, 1024], strides = [1, 1]} : vector<8x1024xf32> to vector<1x1024xf32>
      %369 = arith.mulf %368, %304 : vector<1x1024xf32>
      %370 = vector.extract_strided_slice %183 {offsets = [2, 0], sizes = [1, 1024], strides = [1, 1]} : vector<8x1024xf32> to vector<1x1024xf32>
      %371 = arith.addf %369, %370 : vector<1x1024xf32>
      %372 = vector.extract_strided_slice %188 {offsets = [2, 0], sizes = [1, 64], strides = [1, 1]} : vector<8x64xf32> to vector<1x64xf32>
      %373 = vector.extract_strided_slice %371 {offsets = [0, 0], sizes = [1, 64], strides = [1, 1]} : vector<1x1024xf32> to vector<1x64xf32>
      %374 = arith.mulf %372, %373 : vector<1x64xf32>
      %375 = vector.extract_strided_slice %191 {offsets = [2, 0], sizes = [1, 64], strides = [1, 1]} : vector<8x64xf32> to vector<1x64xf32>
      %376 = vector.extract_strided_slice %371 {offsets = [0, 64], sizes = [1, 64], strides = [1, 1]} : vector<1x1024xf32> to vector<1x64xf32>
      %377 = arith.mulf %375, %376 : vector<1x64xf32>
      %378 = arith.addf %374, %377 : vector<1x64xf32>
      %379 = vector.extract_strided_slice %194 {offsets = [2, 0], sizes = [1, 64], strides = [1, 1]} : vector<8x64xf32> to vector<1x64xf32>
      %380 = vector.extract_strided_slice %371 {offsets = [0, 128], sizes = [1, 64], strides = [1, 1]} : vector<1x1024xf32> to vector<1x64xf32>
      %381 = arith.mulf %379, %380 : vector<1x64xf32>
      %382 = arith.addf %378, %381 : vector<1x64xf32>
      %383 = vector.extract_strided_slice %197 {offsets = [2, 0], sizes = [1, 64], strides = [1, 1]} : vector<8x64xf32> to vector<1x64xf32>
      %384 = vector.extract_strided_slice %371 {offsets = [0, 192], sizes = [1, 64], strides = [1, 1]} : vector<1x1024xf32> to vector<1x64xf32>
      %385 = arith.mulf %383, %384 : vector<1x64xf32>
      %386 = arith.addf %382, %385 : vector<1x64xf32>
      %387 = vector.extract_strided_slice %200 {offsets = [2, 0], sizes = [1, 64], strides = [1, 1]} : vector<8x64xf32> to vector<1x64xf32>
      %388 = vector.extract_strided_slice %371 {offsets = [0, 256], sizes = [1, 64], strides = [1, 1]} : vector<1x1024xf32> to vector<1x64xf32>
      %389 = arith.mulf %387, %388 : vector<1x64xf32>
      %390 = arith.addf %386, %389 : vector<1x64xf32>
      %391 = vector.extract_strided_slice %203 {offsets = [2, 0], sizes = [1, 64], strides = [1, 1]} : vector<8x64xf32> to vector<1x64xf32>
      %392 = vector.extract_strided_slice %371 {offsets = [0, 320], sizes = [1, 64], strides = [1, 1]} : vector<1x1024xf32> to vector<1x64xf32>
      %393 = arith.mulf %391, %392 : vector<1x64xf32>
      %394 = arith.addf %390, %393 : vector<1x64xf32>
      %395 = vector.extract_strided_slice %206 {offsets = [2, 0], sizes = [1, 64], strides = [1, 1]} : vector<8x64xf32> to vector<1x64xf32>
      %396 = vector.extract_strided_slice %371 {offsets = [0, 384], sizes = [1, 64], strides = [1, 1]} : vector<1x1024xf32> to vector<1x64xf32>
      %397 = arith.mulf %395, %396 : vector<1x64xf32>
      %398 = arith.addf %394, %397 : vector<1x64xf32>
      %399 = vector.extract_strided_slice %209 {offsets = [2, 0], sizes = [1, 64], strides = [1, 1]} : vector<8x64xf32> to vector<1x64xf32>
      %400 = vector.extract_strided_slice %371 {offsets = [0, 448], sizes = [1, 64], strides = [1, 1]} : vector<1x1024xf32> to vector<1x64xf32>
      %401 = arith.mulf %399, %400 : vector<1x64xf32>
      %402 = arith.addf %398, %401 : vector<1x64xf32>
      %403 = vector.extract_strided_slice %212 {offsets = [2, 0], sizes = [1, 64], strides = [1, 1]} : vector<8x64xf32> to vector<1x64xf32>
      %404 = vector.extract_strided_slice %371 {offsets = [0, 512], sizes = [1, 64], strides = [1, 1]} : vector<1x1024xf32> to vector<1x64xf32>
      %405 = arith.mulf %403, %404 : vector<1x64xf32>
      %406 = arith.addf %402, %405 : vector<1x64xf32>
      %407 = vector.extract_strided_slice %215 {offsets = [2, 0], sizes = [1, 64], strides = [1, 1]} : vector<8x64xf32> to vector<1x64xf32>
      %408 = vector.extract_strided_slice %371 {offsets = [0, 576], sizes = [1, 64], strides = [1, 1]} : vector<1x1024xf32> to vector<1x64xf32>
      %409 = arith.mulf %407, %408 : vector<1x64xf32>
      %410 = arith.addf %406, %409 : vector<1x64xf32>
      %411 = vector.extract_strided_slice %218 {offsets = [2, 0], sizes = [1, 64], strides = [1, 1]} : vector<8x64xf32> to vector<1x64xf32>
      %412 = vector.extract_strided_slice %371 {offsets = [0, 640], sizes = [1, 64], strides = [1, 1]} : vector<1x1024xf32> to vector<1x64xf32>
      %413 = arith.mulf %411, %412 : vector<1x64xf32>
      %414 = arith.addf %410, %413 : vector<1x64xf32>
      %415 = vector.extract_strided_slice %221 {offsets = [2, 0], sizes = [1, 64], strides = [1, 1]} : vector<8x64xf32> to vector<1x64xf32>
      %416 = vector.extract_strided_slice %371 {offsets = [0, 704], sizes = [1, 64], strides = [1, 1]} : vector<1x1024xf32> to vector<1x64xf32>
      %417 = arith.mulf %415, %416 : vector<1x64xf32>
      %418 = arith.addf %414, %417 : vector<1x64xf32>
      %419 = vector.extract_strided_slice %224 {offsets = [2, 0], sizes = [1, 64], strides = [1, 1]} : vector<8x64xf32> to vector<1x64xf32>
      %420 = vector.extract_strided_slice %371 {offsets = [0, 768], sizes = [1, 64], strides = [1, 1]} : vector<1x1024xf32> to vector<1x64xf32>
      %421 = arith.mulf %419, %420 : vector<1x64xf32>
      %422 = arith.addf %418, %421 : vector<1x64xf32>
      %423 = vector.extract_strided_slice %227 {offsets = [2, 0], sizes = [1, 64], strides = [1, 1]} : vector<8x64xf32> to vector<1x64xf32>
      %424 = vector.extract_strided_slice %371 {offsets = [0, 832], sizes = [1, 64], strides = [1, 1]} : vector<1x1024xf32> to vector<1x64xf32>
      %425 = arith.mulf %423, %424 : vector<1x64xf32>
      %426 = arith.addf %422, %425 : vector<1x64xf32>
      %427 = vector.extract_strided_slice %230 {offsets = [2, 0], sizes = [1, 64], strides = [1, 1]} : vector<8x64xf32> to vector<1x64xf32>
      %428 = vector.extract_strided_slice %371 {offsets = [0, 896], sizes = [1, 64], strides = [1, 1]} : vector<1x1024xf32> to vector<1x64xf32>
      %429 = arith.mulf %427, %428 : vector<1x64xf32>
      %430 = arith.addf %426, %429 : vector<1x64xf32>
      %431 = vector.extract_strided_slice %233 {offsets = [2, 0], sizes = [1, 64], strides = [1, 1]} : vector<8x64xf32> to vector<1x64xf32>
      %432 = vector.extract_strided_slice %371 {offsets = [0, 960], sizes = [1, 64], strides = [1, 1]} : vector<1x1024xf32> to vector<1x64xf32>
      %433 = arith.mulf %431, %432 : vector<1x64xf32>
      %434 = arith.addf %430, %433 : vector<1x64xf32>
      %435 = vector.extract_strided_slice %181 {offsets = [3, 0], sizes = [1, 1024], strides = [1, 1]} : vector<8x1024xf32> to vector<1x1024xf32>
      %436 = arith.mulf %435, %371 : vector<1x1024xf32>
      %437 = vector.extract_strided_slice %183 {offsets = [3, 0], sizes = [1, 1024], strides = [1, 1]} : vector<8x1024xf32> to vector<1x1024xf32>
      %438 = arith.addf %436, %437 : vector<1x1024xf32>
      %439 = vector.extract_strided_slice %188 {offsets = [3, 0], sizes = [1, 64], strides = [1, 1]} : vector<8x64xf32> to vector<1x64xf32>
      %440 = vector.extract_strided_slice %438 {offsets = [0, 0], sizes = [1, 64], strides = [1, 1]} : vector<1x1024xf32> to vector<1x64xf32>
      %441 = arith.mulf %439, %440 : vector<1x64xf32>
      %442 = vector.extract_strided_slice %191 {offsets = [3, 0], sizes = [1, 64], strides = [1, 1]} : vector<8x64xf32> to vector<1x64xf32>
      %443 = vector.extract_strided_slice %438 {offsets = [0, 64], sizes = [1, 64], strides = [1, 1]} : vector<1x1024xf32> to vector<1x64xf32>
      %444 = arith.mulf %442, %443 : vector<1x64xf32>
      %445 = arith.addf %441, %444 : vector<1x64xf32>
      %446 = vector.extract_strided_slice %194 {offsets = [3, 0], sizes = [1, 64], strides = [1, 1]} : vector<8x64xf32> to vector<1x64xf32>
      %447 = vector.extract_strided_slice %438 {offsets = [0, 128], sizes = [1, 64], strides = [1, 1]} : vector<1x1024xf32> to vector<1x64xf32>
      %448 = arith.mulf %446, %447 : vector<1x64xf32>
      %449 = arith.addf %445, %448 : vector<1x64xf32>
      %450 = vector.extract_strided_slice %197 {offsets = [3, 0], sizes = [1, 64], strides = [1, 1]} : vector<8x64xf32> to vector<1x64xf32>
      %451 = vector.extract_strided_slice %438 {offsets = [0, 192], sizes = [1, 64], strides = [1, 1]} : vector<1x1024xf32> to vector<1x64xf32>
      %452 = arith.mulf %450, %451 : vector<1x64xf32>
      %453 = arith.addf %449, %452 : vector<1x64xf32>
      %454 = vector.extract_strided_slice %200 {offsets = [3, 0], sizes = [1, 64], strides = [1, 1]} : vector<8x64xf32> to vector<1x64xf32>
      %455 = vector.extract_strided_slice %438 {offsets = [0, 256], sizes = [1, 64], strides = [1, 1]} : vector<1x1024xf32> to vector<1x64xf32>
      %456 = arith.mulf %454, %455 : vector<1x64xf32>
      %457 = arith.addf %453, %456 : vector<1x64xf32>
      %458 = vector.extract_strided_slice %203 {offsets = [3, 0], sizes = [1, 64], strides = [1, 1]} : vector<8x64xf32> to vector<1x64xf32>
      %459 = vector.extract_strided_slice %438 {offsets = [0, 320], sizes = [1, 64], strides = [1, 1]} : vector<1x1024xf32> to vector<1x64xf32>
      %460 = arith.mulf %458, %459 : vector<1x64xf32>
      %461 = arith.addf %457, %460 : vector<1x64xf32>
      %462 = vector.extract_strided_slice %206 {offsets = [3, 0], sizes = [1, 64], strides = [1, 1]} : vector<8x64xf32> to vector<1x64xf32>
      %463 = vector.extract_strided_slice %438 {offsets = [0, 384], sizes = [1, 64], strides = [1, 1]} : vector<1x1024xf32> to vector<1x64xf32>
      %464 = arith.mulf %462, %463 : vector<1x64xf32>
      %465 = arith.addf %461, %464 : vector<1x64xf32>
      %466 = vector.extract_strided_slice %209 {offsets = [3, 0], sizes = [1, 64], strides = [1, 1]} : vector<8x64xf32> to vector<1x64xf32>
      %467 = vector.extract_strided_slice %438 {offsets = [0, 448], sizes = [1, 64], strides = [1, 1]} : vector<1x1024xf32> to vector<1x64xf32>
      %468 = arith.mulf %466, %467 : vector<1x64xf32>
      %469 = arith.addf %465, %468 : vector<1x64xf32>
      %470 = vector.extract_strided_slice %212 {offsets = [3, 0], sizes = [1, 64], strides = [1, 1]} : vector<8x64xf32> to vector<1x64xf32>
      %471 = vector.extract_strided_slice %438 {offsets = [0, 512], sizes = [1, 64], strides = [1, 1]} : vector<1x1024xf32> to vector<1x64xf32>
      %472 = arith.mulf %470, %471 : vector<1x64xf32>
      %473 = arith.addf %469, %472 : vector<1x64xf32>
      %474 = vector.extract_strided_slice %215 {offsets = [3, 0], sizes = [1, 64], strides = [1, 1]} : vector<8x64xf32> to vector<1x64xf32>
      %475 = vector.extract_strided_slice %438 {offsets = [0, 576], sizes = [1, 64], strides = [1, 1]} : vector<1x1024xf32> to vector<1x64xf32>
      %476 = arith.mulf %474, %475 : vector<1x64xf32>
      %477 = arith.addf %473, %476 : vector<1x64xf32>
      %478 = vector.extract_strided_slice %218 {offsets = [3, 0], sizes = [1, 64], strides = [1, 1]} : vector<8x64xf32> to vector<1x64xf32>
      %479 = vector.extract_strided_slice %438 {offsets = [0, 640], sizes = [1, 64], strides = [1, 1]} : vector<1x1024xf32> to vector<1x64xf32>
      %480 = arith.mulf %478, %479 : vector<1x64xf32>
      %481 = arith.addf %477, %480 : vector<1x64xf32>
      %482 = vector.extract_strided_slice %221 {offsets = [3, 0], sizes = [1, 64], strides = [1, 1]} : vector<8x64xf32> to vector<1x64xf32>
      %483 = vector.extract_strided_slice %438 {offsets = [0, 704], sizes = [1, 64], strides = [1, 1]} : vector<1x1024xf32> to vector<1x64xf32>
      %484 = arith.mulf %482, %483 : vector<1x64xf32>
      %485 = arith.addf %481, %484 : vector<1x64xf32>
      %486 = vector.extract_strided_slice %224 {offsets = [3, 0], sizes = [1, 64], strides = [1, 1]} : vector<8x64xf32> to vector<1x64xf32>
      %487 = vector.extract_strided_slice %438 {offsets = [0, 768], sizes = [1, 64], strides = [1, 1]} : vector<1x1024xf32> to vector<1x64xf32>
      %488 = arith.mulf %486, %487 : vector<1x64xf32>
      %489 = arith.addf %485, %488 : vector<1x64xf32>
      %490 = vector.extract_strided_slice %227 {offsets = [3, 0], sizes = [1, 64], strides = [1, 1]} : vector<8x64xf32> to vector<1x64xf32>
      %491 = vector.extract_strided_slice %438 {offsets = [0, 832], sizes = [1, 64], strides = [1, 1]} : vector<1x1024xf32> to vector<1x64xf32>
      %492 = arith.mulf %490, %491 : vector<1x64xf32>
      %493 = arith.addf %489, %492 : vector<1x64xf32>
      %494 = vector.extract_strided_slice %230 {offsets = [3, 0], sizes = [1, 64], strides = [1, 1]} : vector<8x64xf32> to vector<1x64xf32>
      %495 = vector.extract_strided_slice %438 {offsets = [0, 896], sizes = [1, 64], strides = [1, 1]} : vector<1x1024xf32> to vector<1x64xf32>
      %496 = arith.mulf %494, %495 : vector<1x64xf32>
      %497 = arith.addf %493, %496 : vector<1x64xf32>
      %498 = vector.extract_strided_slice %233 {offsets = [3, 0], sizes = [1, 64], strides = [1, 1]} : vector<8x64xf32> to vector<1x64xf32>
      %499 = vector.extract_strided_slice %438 {offsets = [0, 960], sizes = [1, 64], strides = [1, 1]} : vector<1x1024xf32> to vector<1x64xf32>
      %500 = arith.mulf %498, %499 : vector<1x64xf32>
      %501 = arith.addf %497, %500 : vector<1x64xf32>
      %502 = vector.extract_strided_slice %181 {offsets = [4, 0], sizes = [1, 1024], strides = [1, 1]} : vector<8x1024xf32> to vector<1x1024xf32>
      %503 = arith.mulf %502, %438 : vector<1x1024xf32>
      %504 = vector.extract_strided_slice %183 {offsets = [4, 0], sizes = [1, 1024], strides = [1, 1]} : vector<8x1024xf32> to vector<1x1024xf32>
      %505 = arith.addf %503, %504 : vector<1x1024xf32>
      %506 = vector.extract_strided_slice %188 {offsets = [4, 0], sizes = [1, 64], strides = [1, 1]} : vector<8x64xf32> to vector<1x64xf32>
      %507 = vector.extract_strided_slice %505 {offsets = [0, 0], sizes = [1, 64], strides = [1, 1]} : vector<1x1024xf32> to vector<1x64xf32>
      %508 = arith.mulf %506, %507 : vector<1x64xf32>
      %509 = vector.extract_strided_slice %191 {offsets = [4, 0], sizes = [1, 64], strides = [1, 1]} : vector<8x64xf32> to vector<1x64xf32>
      %510 = vector.extract_strided_slice %505 {offsets = [0, 64], sizes = [1, 64], strides = [1, 1]} : vector<1x1024xf32> to vector<1x64xf32>
      %511 = arith.mulf %509, %510 : vector<1x64xf32>
      %512 = arith.addf %508, %511 : vector<1x64xf32>
      %513 = vector.extract_strided_slice %194 {offsets = [4, 0], sizes = [1, 64], strides = [1, 1]} : vector<8x64xf32> to vector<1x64xf32>
      %514 = vector.extract_strided_slice %505 {offsets = [0, 128], sizes = [1, 64], strides = [1, 1]} : vector<1x1024xf32> to vector<1x64xf32>
      %515 = arith.mulf %513, %514 : vector<1x64xf32>
      %516 = arith.addf %512, %515 : vector<1x64xf32>
      %517 = vector.extract_strided_slice %197 {offsets = [4, 0], sizes = [1, 64], strides = [1, 1]} : vector<8x64xf32> to vector<1x64xf32>
      %518 = vector.extract_strided_slice %505 {offsets = [0, 192], sizes = [1, 64], strides = [1, 1]} : vector<1x1024xf32> to vector<1x64xf32>
      %519 = arith.mulf %517, %518 : vector<1x64xf32>
      %520 = arith.addf %516, %519 : vector<1x64xf32>
      %521 = vector.extract_strided_slice %200 {offsets = [4, 0], sizes = [1, 64], strides = [1, 1]} : vector<8x64xf32> to vector<1x64xf32>
      %522 = vector.extract_strided_slice %505 {offsets = [0, 256], sizes = [1, 64], strides = [1, 1]} : vector<1x1024xf32> to vector<1x64xf32>
      %523 = arith.mulf %521, %522 : vector<1x64xf32>
      %524 = arith.addf %520, %523 : vector<1x64xf32>
      %525 = vector.extract_strided_slice %203 {offsets = [4, 0], sizes = [1, 64], strides = [1, 1]} : vector<8x64xf32> to vector<1x64xf32>
      %526 = vector.extract_strided_slice %505 {offsets = [0, 320], sizes = [1, 64], strides = [1, 1]} : vector<1x1024xf32> to vector<1x64xf32>
      %527 = arith.mulf %525, %526 : vector<1x64xf32>
      %528 = arith.addf %524, %527 : vector<1x64xf32>
      %529 = vector.extract_strided_slice %206 {offsets = [4, 0], sizes = [1, 64], strides = [1, 1]} : vector<8x64xf32> to vector<1x64xf32>
      %530 = vector.extract_strided_slice %505 {offsets = [0, 384], sizes = [1, 64], strides = [1, 1]} : vector<1x1024xf32> to vector<1x64xf32>
      %531 = arith.mulf %529, %530 : vector<1x64xf32>
      %532 = arith.addf %528, %531 : vector<1x64xf32>
      %533 = vector.extract_strided_slice %209 {offsets = [4, 0], sizes = [1, 64], strides = [1, 1]} : vector<8x64xf32> to vector<1x64xf32>
      %534 = vector.extract_strided_slice %505 {offsets = [0, 448], sizes = [1, 64], strides = [1, 1]} : vector<1x1024xf32> to vector<1x64xf32>
      %535 = arith.mulf %533, %534 : vector<1x64xf32>
      %536 = arith.addf %532, %535 : vector<1x64xf32>
      %537 = vector.extract_strided_slice %212 {offsets = [4, 0], sizes = [1, 64], strides = [1, 1]} : vector<8x64xf32> to vector<1x64xf32>
      %538 = vector.extract_strided_slice %505 {offsets = [0, 512], sizes = [1, 64], strides = [1, 1]} : vector<1x1024xf32> to vector<1x64xf32>
      %539 = arith.mulf %537, %538 : vector<1x64xf32>
      %540 = arith.addf %536, %539 : vector<1x64xf32>
      %541 = vector.extract_strided_slice %215 {offsets = [4, 0], sizes = [1, 64], strides = [1, 1]} : vector<8x64xf32> to vector<1x64xf32>
      %542 = vector.extract_strided_slice %505 {offsets = [0, 576], sizes = [1, 64], strides = [1, 1]} : vector<1x1024xf32> to vector<1x64xf32>
      %543 = arith.mulf %541, %542 : vector<1x64xf32>
      %544 = arith.addf %540, %543 : vector<1x64xf32>
      %545 = vector.extract_strided_slice %218 {offsets = [4, 0], sizes = [1, 64], strides = [1, 1]} : vector<8x64xf32> to vector<1x64xf32>
      %546 = vector.extract_strided_slice %505 {offsets = [0, 640], sizes = [1, 64], strides = [1, 1]} : vector<1x1024xf32> to vector<1x64xf32>
      %547 = arith.mulf %545, %546 : vector<1x64xf32>
      %548 = arith.addf %544, %547 : vector<1x64xf32>
      %549 = vector.extract_strided_slice %221 {offsets = [4, 0], sizes = [1, 64], strides = [1, 1]} : vector<8x64xf32> to vector<1x64xf32>
      %550 = vector.extract_strided_slice %505 {offsets = [0, 704], sizes = [1, 64], strides = [1, 1]} : vector<1x1024xf32> to vector<1x64xf32>
      %551 = arith.mulf %549, %550 : vector<1x64xf32>
      %552 = arith.addf %548, %551 : vector<1x64xf32>
      %553 = vector.extract_strided_slice %224 {offsets = [4, 0], sizes = [1, 64], strides = [1, 1]} : vector<8x64xf32> to vector<1x64xf32>
      %554 = vector.extract_strided_slice %505 {offsets = [0, 768], sizes = [1, 64], strides = [1, 1]} : vector<1x1024xf32> to vector<1x64xf32>
      %555 = arith.mulf %553, %554 : vector<1x64xf32>
      %556 = arith.addf %552, %555 : vector<1x64xf32>
      %557 = vector.extract_strided_slice %227 {offsets = [4, 0], sizes = [1, 64], strides = [1, 1]} : vector<8x64xf32> to vector<1x64xf32>
      %558 = vector.extract_strided_slice %505 {offsets = [0, 832], sizes = [1, 64], strides = [1, 1]} : vector<1x1024xf32> to vector<1x64xf32>
      %559 = arith.mulf %557, %558 : vector<1x64xf32>
      %560 = arith.addf %556, %559 : vector<1x64xf32>
      %561 = vector.extract_strided_slice %230 {offsets = [4, 0], sizes = [1, 64], strides = [1, 1]} : vector<8x64xf32> to vector<1x64xf32>
      %562 = vector.extract_strided_slice %505 {offsets = [0, 896], sizes = [1, 64], strides = [1, 1]} : vector<1x1024xf32> to vector<1x64xf32>
      %563 = arith.mulf %561, %562 : vector<1x64xf32>
      %564 = arith.addf %560, %563 : vector<1x64xf32>
      %565 = vector.extract_strided_slice %233 {offsets = [4, 0], sizes = [1, 64], strides = [1, 1]} : vector<8x64xf32> to vector<1x64xf32>
      %566 = vector.extract_strided_slice %505 {offsets = [0, 960], sizes = [1, 64], strides = [1, 1]} : vector<1x1024xf32> to vector<1x64xf32>
      %567 = arith.mulf %565, %566 : vector<1x64xf32>
      %568 = arith.addf %564, %567 : vector<1x64xf32>
      %569 = vector.extract_strided_slice %181 {offsets = [5, 0], sizes = [1, 1024], strides = [1, 1]} : vector<8x1024xf32> to vector<1x1024xf32>
      %570 = arith.mulf %569, %505 : vector<1x1024xf32>
      %571 = vector.extract_strided_slice %183 {offsets = [5, 0], sizes = [1, 1024], strides = [1, 1]} : vector<8x1024xf32> to vector<1x1024xf32>
      %572 = arith.addf %570, %571 : vector<1x1024xf32>
      %573 = vector.extract_strided_slice %188 {offsets = [5, 0], sizes = [1, 64], strides = [1, 1]} : vector<8x64xf32> to vector<1x64xf32>
      %574 = vector.extract_strided_slice %572 {offsets = [0, 0], sizes = [1, 64], strides = [1, 1]} : vector<1x1024xf32> to vector<1x64xf32>
      %575 = arith.mulf %573, %574 : vector<1x64xf32>
      %576 = vector.extract_strided_slice %191 {offsets = [5, 0], sizes = [1, 64], strides = [1, 1]} : vector<8x64xf32> to vector<1x64xf32>
      %577 = vector.extract_strided_slice %572 {offsets = [0, 64], sizes = [1, 64], strides = [1, 1]} : vector<1x1024xf32> to vector<1x64xf32>
      %578 = arith.mulf %576, %577 : vector<1x64xf32>
      %579 = arith.addf %575, %578 : vector<1x64xf32>
      %580 = vector.extract_strided_slice %194 {offsets = [5, 0], sizes = [1, 64], strides = [1, 1]} : vector<8x64xf32> to vector<1x64xf32>
      %581 = vector.extract_strided_slice %572 {offsets = [0, 128], sizes = [1, 64], strides = [1, 1]} : vector<1x1024xf32> to vector<1x64xf32>
      %582 = arith.mulf %580, %581 : vector<1x64xf32>
      %583 = arith.addf %579, %582 : vector<1x64xf32>
      %584 = vector.extract_strided_slice %197 {offsets = [5, 0], sizes = [1, 64], strides = [1, 1]} : vector<8x64xf32> to vector<1x64xf32>
      %585 = vector.extract_strided_slice %572 {offsets = [0, 192], sizes = [1, 64], strides = [1, 1]} : vector<1x1024xf32> to vector<1x64xf32>
      %586 = arith.mulf %584, %585 : vector<1x64xf32>
      %587 = arith.addf %583, %586 : vector<1x64xf32>
      %588 = vector.extract_strided_slice %200 {offsets = [5, 0], sizes = [1, 64], strides = [1, 1]} : vector<8x64xf32> to vector<1x64xf32>
      %589 = vector.extract_strided_slice %572 {offsets = [0, 256], sizes = [1, 64], strides = [1, 1]} : vector<1x1024xf32> to vector<1x64xf32>
      %590 = arith.mulf %588, %589 : vector<1x64xf32>
      %591 = arith.addf %587, %590 : vector<1x64xf32>
      %592 = vector.extract_strided_slice %203 {offsets = [5, 0], sizes = [1, 64], strides = [1, 1]} : vector<8x64xf32> to vector<1x64xf32>
      %593 = vector.extract_strided_slice %572 {offsets = [0, 320], sizes = [1, 64], strides = [1, 1]} : vector<1x1024xf32> to vector<1x64xf32>
      %594 = arith.mulf %592, %593 : vector<1x64xf32>
      %595 = arith.addf %591, %594 : vector<1x64xf32>
      %596 = vector.extract_strided_slice %206 {offsets = [5, 0], sizes = [1, 64], strides = [1, 1]} : vector<8x64xf32> to vector<1x64xf32>
      %597 = vector.extract_strided_slice %572 {offsets = [0, 384], sizes = [1, 64], strides = [1, 1]} : vector<1x1024xf32> to vector<1x64xf32>
      %598 = arith.mulf %596, %597 : vector<1x64xf32>
      %599 = arith.addf %595, %598 : vector<1x64xf32>
      %600 = vector.extract_strided_slice %209 {offsets = [5, 0], sizes = [1, 64], strides = [1, 1]} : vector<8x64xf32> to vector<1x64xf32>
      %601 = vector.extract_strided_slice %572 {offsets = [0, 448], sizes = [1, 64], strides = [1, 1]} : vector<1x1024xf32> to vector<1x64xf32>
      %602 = arith.mulf %600, %601 : vector<1x64xf32>
      %603 = arith.addf %599, %602 : vector<1x64xf32>
      %604 = vector.extract_strided_slice %212 {offsets = [5, 0], sizes = [1, 64], strides = [1, 1]} : vector<8x64xf32> to vector<1x64xf32>
      %605 = vector.extract_strided_slice %572 {offsets = [0, 512], sizes = [1, 64], strides = [1, 1]} : vector<1x1024xf32> to vector<1x64xf32>
      %606 = arith.mulf %604, %605 : vector<1x64xf32>
      %607 = arith.addf %603, %606 : vector<1x64xf32>
      %608 = vector.extract_strided_slice %215 {offsets = [5, 0], sizes = [1, 64], strides = [1, 1]} : vector<8x64xf32> to vector<1x64xf32>
      %609 = vector.extract_strided_slice %572 {offsets = [0, 576], sizes = [1, 64], strides = [1, 1]} : vector<1x1024xf32> to vector<1x64xf32>
      %610 = arith.mulf %608, %609 : vector<1x64xf32>
      %611 = arith.addf %607, %610 : vector<1x64xf32>
      %612 = vector.extract_strided_slice %218 {offsets = [5, 0], sizes = [1, 64], strides = [1, 1]} : vector<8x64xf32> to vector<1x64xf32>
      %613 = vector.extract_strided_slice %572 {offsets = [0, 640], sizes = [1, 64], strides = [1, 1]} : vector<1x1024xf32> to vector<1x64xf32>
      %614 = arith.mulf %612, %613 : vector<1x64xf32>
      %615 = arith.addf %611, %614 : vector<1x64xf32>
      %616 = vector.extract_strided_slice %221 {offsets = [5, 0], sizes = [1, 64], strides = [1, 1]} : vector<8x64xf32> to vector<1x64xf32>
      %617 = vector.extract_strided_slice %572 {offsets = [0, 704], sizes = [1, 64], strides = [1, 1]} : vector<1x1024xf32> to vector<1x64xf32>
      %618 = arith.mulf %616, %617 : vector<1x64xf32>
      %619 = arith.addf %615, %618 : vector<1x64xf32>
      %620 = vector.extract_strided_slice %224 {offsets = [5, 0], sizes = [1, 64], strides = [1, 1]} : vector<8x64xf32> to vector<1x64xf32>
      %621 = vector.extract_strided_slice %572 {offsets = [0, 768], sizes = [1, 64], strides = [1, 1]} : vector<1x1024xf32> to vector<1x64xf32>
      %622 = arith.mulf %620, %621 : vector<1x64xf32>
      %623 = arith.addf %619, %622 : vector<1x64xf32>
      %624 = vector.extract_strided_slice %227 {offsets = [5, 0], sizes = [1, 64], strides = [1, 1]} : vector<8x64xf32> to vector<1x64xf32>
      %625 = vector.extract_strided_slice %572 {offsets = [0, 832], sizes = [1, 64], strides = [1, 1]} : vector<1x1024xf32> to vector<1x64xf32>
      %626 = arith.mulf %624, %625 : vector<1x64xf32>
      %627 = arith.addf %623, %626 : vector<1x64xf32>
      %628 = vector.extract_strided_slice %230 {offsets = [5, 0], sizes = [1, 64], strides = [1, 1]} : vector<8x64xf32> to vector<1x64xf32>
      %629 = vector.extract_strided_slice %572 {offsets = [0, 896], sizes = [1, 64], strides = [1, 1]} : vector<1x1024xf32> to vector<1x64xf32>
      %630 = arith.mulf %628, %629 : vector<1x64xf32>
      %631 = arith.addf %627, %630 : vector<1x64xf32>
      %632 = vector.extract_strided_slice %233 {offsets = [5, 0], sizes = [1, 64], strides = [1, 1]} : vector<8x64xf32> to vector<1x64xf32>
      %633 = vector.extract_strided_slice %572 {offsets = [0, 960], sizes = [1, 64], strides = [1, 1]} : vector<1x1024xf32> to vector<1x64xf32>
      %634 = arith.mulf %632, %633 : vector<1x64xf32>
      %635 = arith.addf %631, %634 : vector<1x64xf32>
      %636 = vector.extract_strided_slice %181 {offsets = [6, 0], sizes = [1, 1024], strides = [1, 1]} : vector<8x1024xf32> to vector<1x1024xf32>
      %637 = arith.mulf %636, %572 : vector<1x1024xf32>
      %638 = vector.extract_strided_slice %183 {offsets = [6, 0], sizes = [1, 1024], strides = [1, 1]} : vector<8x1024xf32> to vector<1x1024xf32>
      %639 = arith.addf %637, %638 : vector<1x1024xf32>
      %640 = vector.extract_strided_slice %188 {offsets = [6, 0], sizes = [1, 64], strides = [1, 1]} : vector<8x64xf32> to vector<1x64xf32>
      %641 = vector.extract_strided_slice %639 {offsets = [0, 0], sizes = [1, 64], strides = [1, 1]} : vector<1x1024xf32> to vector<1x64xf32>
      %642 = arith.mulf %640, %641 : vector<1x64xf32>
      %643 = vector.extract_strided_slice %191 {offsets = [6, 0], sizes = [1, 64], strides = [1, 1]} : vector<8x64xf32> to vector<1x64xf32>
      %644 = vector.extract_strided_slice %639 {offsets = [0, 64], sizes = [1, 64], strides = [1, 1]} : vector<1x1024xf32> to vector<1x64xf32>
      %645 = arith.mulf %643, %644 : vector<1x64xf32>
      %646 = arith.addf %642, %645 : vector<1x64xf32>
      %647 = vector.extract_strided_slice %194 {offsets = [6, 0], sizes = [1, 64], strides = [1, 1]} : vector<8x64xf32> to vector<1x64xf32>
      %648 = vector.extract_strided_slice %639 {offsets = [0, 128], sizes = [1, 64], strides = [1, 1]} : vector<1x1024xf32> to vector<1x64xf32>
      %649 = arith.mulf %647, %648 : vector<1x64xf32>
      %650 = arith.addf %646, %649 : vector<1x64xf32>
      %651 = vector.extract_strided_slice %197 {offsets = [6, 0], sizes = [1, 64], strides = [1, 1]} : vector<8x64xf32> to vector<1x64xf32>
      %652 = vector.extract_strided_slice %639 {offsets = [0, 192], sizes = [1, 64], strides = [1, 1]} : vector<1x1024xf32> to vector<1x64xf32>
      %653 = arith.mulf %651, %652 : vector<1x64xf32>
      %654 = arith.addf %650, %653 : vector<1x64xf32>
      %655 = vector.extract_strided_slice %200 {offsets = [6, 0], sizes = [1, 64], strides = [1, 1]} : vector<8x64xf32> to vector<1x64xf32>
      %656 = vector.extract_strided_slice %639 {offsets = [0, 256], sizes = [1, 64], strides = [1, 1]} : vector<1x1024xf32> to vector<1x64xf32>
      %657 = arith.mulf %655, %656 : vector<1x64xf32>
      %658 = arith.addf %654, %657 : vector<1x64xf32>
      %659 = vector.extract_strided_slice %203 {offsets = [6, 0], sizes = [1, 64], strides = [1, 1]} : vector<8x64xf32> to vector<1x64xf32>
      %660 = vector.extract_strided_slice %639 {offsets = [0, 320], sizes = [1, 64], strides = [1, 1]} : vector<1x1024xf32> to vector<1x64xf32>
      %661 = arith.mulf %659, %660 : vector<1x64xf32>
      %662 = arith.addf %658, %661 : vector<1x64xf32>
      %663 = vector.extract_strided_slice %206 {offsets = [6, 0], sizes = [1, 64], strides = [1, 1]} : vector<8x64xf32> to vector<1x64xf32>
      %664 = vector.extract_strided_slice %639 {offsets = [0, 384], sizes = [1, 64], strides = [1, 1]} : vector<1x1024xf32> to vector<1x64xf32>
      %665 = arith.mulf %663, %664 : vector<1x64xf32>
      %666 = arith.addf %662, %665 : vector<1x64xf32>
      %667 = vector.extract_strided_slice %209 {offsets = [6, 0], sizes = [1, 64], strides = [1, 1]} : vector<8x64xf32> to vector<1x64xf32>
      %668 = vector.extract_strided_slice %639 {offsets = [0, 448], sizes = [1, 64], strides = [1, 1]} : vector<1x1024xf32> to vector<1x64xf32>
      %669 = arith.mulf %667, %668 : vector<1x64xf32>
      %670 = arith.addf %666, %669 : vector<1x64xf32>
      %671 = vector.extract_strided_slice %212 {offsets = [6, 0], sizes = [1, 64], strides = [1, 1]} : vector<8x64xf32> to vector<1x64xf32>
      %672 = vector.extract_strided_slice %639 {offsets = [0, 512], sizes = [1, 64], strides = [1, 1]} : vector<1x1024xf32> to vector<1x64xf32>
      %673 = arith.mulf %671, %672 : vector<1x64xf32>
      %674 = arith.addf %670, %673 : vector<1x64xf32>
      %675 = vector.extract_strided_slice %215 {offsets = [6, 0], sizes = [1, 64], strides = [1, 1]} : vector<8x64xf32> to vector<1x64xf32>
      %676 = vector.extract_strided_slice %639 {offsets = [0, 576], sizes = [1, 64], strides = [1, 1]} : vector<1x1024xf32> to vector<1x64xf32>
      %677 = arith.mulf %675, %676 : vector<1x64xf32>
      %678 = arith.addf %674, %677 : vector<1x64xf32>
      %679 = vector.extract_strided_slice %218 {offsets = [6, 0], sizes = [1, 64], strides = [1, 1]} : vector<8x64xf32> to vector<1x64xf32>
      %680 = vector.extract_strided_slice %639 {offsets = [0, 640], sizes = [1, 64], strides = [1, 1]} : vector<1x1024xf32> to vector<1x64xf32>
      %681 = arith.mulf %679, %680 : vector<1x64xf32>
      %682 = arith.addf %678, %681 : vector<1x64xf32>
      %683 = vector.extract_strided_slice %221 {offsets = [6, 0], sizes = [1, 64], strides = [1, 1]} : vector<8x64xf32> to vector<1x64xf32>
      %684 = vector.extract_strided_slice %639 {offsets = [0, 704], sizes = [1, 64], strides = [1, 1]} : vector<1x1024xf32> to vector<1x64xf32>
      %685 = arith.mulf %683, %684 : vector<1x64xf32>
      %686 = arith.addf %682, %685 : vector<1x64xf32>
      %687 = vector.extract_strided_slice %224 {offsets = [6, 0], sizes = [1, 64], strides = [1, 1]} : vector<8x64xf32> to vector<1x64xf32>
      %688 = vector.extract_strided_slice %639 {offsets = [0, 768], sizes = [1, 64], strides = [1, 1]} : vector<1x1024xf32> to vector<1x64xf32>
      %689 = arith.mulf %687, %688 : vector<1x64xf32>
      %690 = arith.addf %686, %689 : vector<1x64xf32>
      %691 = vector.extract_strided_slice %227 {offsets = [6, 0], sizes = [1, 64], strides = [1, 1]} : vector<8x64xf32> to vector<1x64xf32>
      %692 = vector.extract_strided_slice %639 {offsets = [0, 832], sizes = [1, 64], strides = [1, 1]} : vector<1x1024xf32> to vector<1x64xf32>
      %693 = arith.mulf %691, %692 : vector<1x64xf32>
      %694 = arith.addf %690, %693 : vector<1x64xf32>
      %695 = vector.extract_strided_slice %230 {offsets = [6, 0], sizes = [1, 64], strides = [1, 1]} : vector<8x64xf32> to vector<1x64xf32>
      %696 = vector.extract_strided_slice %639 {offsets = [0, 896], sizes = [1, 64], strides = [1, 1]} : vector<1x1024xf32> to vector<1x64xf32>
      %697 = arith.mulf %695, %696 : vector<1x64xf32>
      %698 = arith.addf %694, %697 : vector<1x64xf32>
      %699 = vector.extract_strided_slice %233 {offsets = [6, 0], sizes = [1, 64], strides = [1, 1]} : vector<8x64xf32> to vector<1x64xf32>
      %700 = vector.extract_strided_slice %639 {offsets = [0, 960], sizes = [1, 64], strides = [1, 1]} : vector<1x1024xf32> to vector<1x64xf32>
      %701 = arith.mulf %699, %700 : vector<1x64xf32>
      %702 = arith.addf %698, %701 : vector<1x64xf32>
      %703 = vector.extract_strided_slice %181 {offsets = [7, 0], sizes = [1, 1024], strides = [1, 1]} : vector<8x1024xf32> to vector<1x1024xf32>
      %704 = arith.mulf %703, %639 : vector<1x1024xf32>
      %705 = vector.extract_strided_slice %183 {offsets = [7, 0], sizes = [1, 1024], strides = [1, 1]} : vector<8x1024xf32> to vector<1x1024xf32>
      %706 = arith.addf %704, %705 : vector<1x1024xf32>
      %707 = vector.extract_strided_slice %188 {offsets = [7, 0], sizes = [1, 64], strides = [1, 1]} : vector<8x64xf32> to vector<1x64xf32>
      %708 = vector.extract_strided_slice %706 {offsets = [0, 0], sizes = [1, 64], strides = [1, 1]} : vector<1x1024xf32> to vector<1x64xf32>
      %709 = arith.mulf %707, %708 : vector<1x64xf32>
      %710 = vector.extract_strided_slice %191 {offsets = [7, 0], sizes = [1, 64], strides = [1, 1]} : vector<8x64xf32> to vector<1x64xf32>
      %711 = vector.extract_strided_slice %706 {offsets = [0, 64], sizes = [1, 64], strides = [1, 1]} : vector<1x1024xf32> to vector<1x64xf32>
      %712 = arith.mulf %710, %711 : vector<1x64xf32>
      %713 = arith.addf %709, %712 : vector<1x64xf32>
      %714 = vector.extract_strided_slice %194 {offsets = [7, 0], sizes = [1, 64], strides = [1, 1]} : vector<8x64xf32> to vector<1x64xf32>
      %715 = vector.extract_strided_slice %706 {offsets = [0, 128], sizes = [1, 64], strides = [1, 1]} : vector<1x1024xf32> to vector<1x64xf32>
      %716 = arith.mulf %714, %715 : vector<1x64xf32>
      %717 = arith.addf %713, %716 : vector<1x64xf32>
      %718 = vector.extract_strided_slice %197 {offsets = [7, 0], sizes = [1, 64], strides = [1, 1]} : vector<8x64xf32> to vector<1x64xf32>
      %719 = vector.extract_strided_slice %706 {offsets = [0, 192], sizes = [1, 64], strides = [1, 1]} : vector<1x1024xf32> to vector<1x64xf32>
      %720 = arith.mulf %718, %719 : vector<1x64xf32>
      %721 = arith.addf %717, %720 : vector<1x64xf32>
      %722 = vector.extract_strided_slice %200 {offsets = [7, 0], sizes = [1, 64], strides = [1, 1]} : vector<8x64xf32> to vector<1x64xf32>
      %723 = vector.extract_strided_slice %706 {offsets = [0, 256], sizes = [1, 64], strides = [1, 1]} : vector<1x1024xf32> to vector<1x64xf32>
      %724 = arith.mulf %722, %723 : vector<1x64xf32>
      %725 = arith.addf %721, %724 : vector<1x64xf32>
      %726 = vector.extract_strided_slice %203 {offsets = [7, 0], sizes = [1, 64], strides = [1, 1]} : vector<8x64xf32> to vector<1x64xf32>
      %727 = vector.extract_strided_slice %706 {offsets = [0, 320], sizes = [1, 64], strides = [1, 1]} : vector<1x1024xf32> to vector<1x64xf32>
      %728 = arith.mulf %726, %727 : vector<1x64xf32>
      %729 = arith.addf %725, %728 : vector<1x64xf32>
      %730 = vector.extract_strided_slice %206 {offsets = [7, 0], sizes = [1, 64], strides = [1, 1]} : vector<8x64xf32> to vector<1x64xf32>
      %731 = vector.extract_strided_slice %706 {offsets = [0, 384], sizes = [1, 64], strides = [1, 1]} : vector<1x1024xf32> to vector<1x64xf32>
      %732 = arith.mulf %730, %731 : vector<1x64xf32>
      %733 = arith.addf %729, %732 : vector<1x64xf32>
      %734 = vector.extract_strided_slice %209 {offsets = [7, 0], sizes = [1, 64], strides = [1, 1]} : vector<8x64xf32> to vector<1x64xf32>
      %735 = vector.extract_strided_slice %706 {offsets = [0, 448], sizes = [1, 64], strides = [1, 1]} : vector<1x1024xf32> to vector<1x64xf32>
      %736 = arith.mulf %734, %735 : vector<1x64xf32>
      %737 = arith.addf %733, %736 : vector<1x64xf32>
      %738 = vector.extract_strided_slice %212 {offsets = [7, 0], sizes = [1, 64], strides = [1, 1]} : vector<8x64xf32> to vector<1x64xf32>
      %739 = vector.extract_strided_slice %706 {offsets = [0, 512], sizes = [1, 64], strides = [1, 1]} : vector<1x1024xf32> to vector<1x64xf32>
      %740 = arith.mulf %738, %739 : vector<1x64xf32>
      %741 = arith.addf %737, %740 : vector<1x64xf32>
      %742 = vector.extract_strided_slice %215 {offsets = [7, 0], sizes = [1, 64], strides = [1, 1]} : vector<8x64xf32> to vector<1x64xf32>
      %743 = vector.extract_strided_slice %706 {offsets = [0, 576], sizes = [1, 64], strides = [1, 1]} : vector<1x1024xf32> to vector<1x64xf32>
      %744 = arith.mulf %742, %743 : vector<1x64xf32>
      %745 = arith.addf %741, %744 : vector<1x64xf32>
      %746 = vector.extract_strided_slice %218 {offsets = [7, 0], sizes = [1, 64], strides = [1, 1]} : vector<8x64xf32> to vector<1x64xf32>
      %747 = vector.extract_strided_slice %706 {offsets = [0, 640], sizes = [1, 64], strides = [1, 1]} : vector<1x1024xf32> to vector<1x64xf32>
      %748 = arith.mulf %746, %747 : vector<1x64xf32>
      %749 = arith.addf %745, %748 : vector<1x64xf32>
      %750 = vector.extract_strided_slice %221 {offsets = [7, 0], sizes = [1, 64], strides = [1, 1]} : vector<8x64xf32> to vector<1x64xf32>
      %751 = vector.extract_strided_slice %706 {offsets = [0, 704], sizes = [1, 64], strides = [1, 1]} : vector<1x1024xf32> to vector<1x64xf32>
      %752 = arith.mulf %750, %751 : vector<1x64xf32>
      %753 = arith.addf %749, %752 : vector<1x64xf32>
      %754 = vector.extract_strided_slice %224 {offsets = [7, 0], sizes = [1, 64], strides = [1, 1]} : vector<8x64xf32> to vector<1x64xf32>
      %755 = vector.extract_strided_slice %706 {offsets = [0, 768], sizes = [1, 64], strides = [1, 1]} : vector<1x1024xf32> to vector<1x64xf32>
      %756 = arith.mulf %754, %755 : vector<1x64xf32>
      %757 = arith.addf %753, %756 : vector<1x64xf32>
      %758 = vector.extract_strided_slice %227 {offsets = [7, 0], sizes = [1, 64], strides = [1, 1]} : vector<8x64xf32> to vector<1x64xf32>
      %759 = vector.extract_strided_slice %706 {offsets = [0, 832], sizes = [1, 64], strides = [1, 1]} : vector<1x1024xf32> to vector<1x64xf32>
      %760 = arith.mulf %758, %759 : vector<1x64xf32>
      %761 = arith.addf %757, %760 : vector<1x64xf32>
      %762 = vector.extract_strided_slice %230 {offsets = [7, 0], sizes = [1, 64], strides = [1, 1]} : vector<8x64xf32> to vector<1x64xf32>
      %763 = vector.extract_strided_slice %706 {offsets = [0, 896], sizes = [1, 64], strides = [1, 1]} : vector<1x1024xf32> to vector<1x64xf32>
      %764 = arith.mulf %762, %763 : vector<1x64xf32>
      %765 = arith.addf %761, %764 : vector<1x64xf32>
      %766 = vector.extract_strided_slice %233 {offsets = [7, 0], sizes = [1, 64], strides = [1, 1]} : vector<8x64xf32> to vector<1x64xf32>
      %767 = vector.extract_strided_slice %706 {offsets = [0, 960], sizes = [1, 64], strides = [1, 1]} : vector<1x1024xf32> to vector<1x64xf32>
      %768 = arith.mulf %766, %767 : vector<1x64xf32>
      %769 = arith.addf %765, %768 : vector<1x64xf32>
      %770 = tpu.concatenate %300, %367, %434, %501, %568, %635, %702, %769 in 0 : vector<1x64xf32>, vector<1x64xf32>, vector<1x64xf32>, vector<1x64xf32>, vector<1x64xf32>, vector<1x64xf32>, vector<1x64xf32>, vector<1x64xf32> -> vector<8x64xf32>
      %771 = arith.index_cast %179 : i32 to index
      %c0_65 = arith.constant 0 : index
      %772 = vector.load %arg20[%771, %c0_65] : memref<64x64xf32, #tpu.memory_space<vmem>>, vector<8x64xf32>
      tpu.vector_store %arg20[%771, %c0_65], %770 {strides = array<i32>} : memref<64x64xf32, #tpu.memory_space<vmem>>, vector<8x64xf32>,
      scf.yield %706 : vector<1x1024xf32>
    }
    %c8_i32_47 = arith.constant 8 : i32
    %c0_48 = arith.constant 0 : index
    %c0_49 = arith.constant 0 : index
    %159 = vector.load %arg16[%c0_48, %c0_49] : memref<1x1024xf32, #tpu.memory_space<vmem>>, vector<1x1024xf32>
    tpu.vector_store %arg16[%c0_48, %c0_49], %158 {strides = array<i32>} : memref<1x1024xf32, #tpu.memory_space<vmem>>, vector<1x1024xf32>,
    %c0_50 = arith.constant 0 : index
    %c0_51 = arith.constant 0 : index
    %160 = vector.load %arg20[%c0_50, %c0_51] : memref<64x64xf32, #tpu.memory_space<vmem>>, vector<64x64xf32>
    %c0_52 = arith.constant 0 : index
    %c0_53 = arith.constant 0 : index
    %161 = vector.load %arg11[%c0_52, %c0_53] : memref<1x64xf32, #tpu.memory_space<vmem>>, vector<1x64xf32>
    %162 = vector.broadcast %161 : vector<1x64xf32> to vector<64x64xf32>
    %163 = arith.mulf %66, %162 : vector<64x64xf32>
    %164 = arith.addf %160, %163 : vector<64x64xf32>
    %165 = arith.negf %33 : vector<64x64xf32>
    %166 = math.exp %165 : vector<64x64xf32>
    %cst_54 = arith.constant 1.000000e+00 : f32
    %167 = vector.broadcast %cst_54 : f32 to vector<64x64xf32>
    %168 = arith.addf %167, %166 : vector<64x64xf32>
    %169 = arith.divf %167, %168 : vector<64x64xf32>
    %170 = arith.mulf %33, %169 : vector<64x64xf32>
    %171 = arith.mulf %164, %170 : vector<64x64xf32>
    %172 = arith.truncf %171 : vector<64x64xf32> to vector<64x64xbf16>
    %c0_55 = arith.constant 0 : index
    %c0_56 = arith.constant 0 : index
    %173 = vector.load %arg12[%c0_55, %c0_56] : memref<64x32xbf16, #tpu.memory_space<vmem>>, vector<64x32xbf16>
    %cst_57 = arith.constant dense<0.000000e+00> : vector<64x32xf32>
    %174 = tpu.matmul %172, %173, %cst_57 {dimension_numbers = #tpu.dot_dimension_numbers<[1], [0], [0], [1], [0, 0, 1, 1], [], []>} : vector<64x64xbf16>, vector<64x32xbf16>, vector<64x32xf32> -> vector<64x32xf32>
    %c0_58 = arith.constant 0 : index
    %c0_59 = arith.constant 0 : index
    %c0_60 = arith.constant 0 : index
    %175 = vector.load %arg13[%c0_58, %c0_59, %c0_60] : memref<1x64x32xf32, #tpu.memory_space<vmem>>, vector<1x64x32xf32>
    %176 = vector.shape_cast %175 : vector<1x64x32xf32> to vector<64x32xf32>
    %177 = vector.shape_cast %174 : vector<64x32xf32> to vector<1x64x32xf32>
    tpu.vector_store %arg13[%c0_58, %c0_59, %c0_60], %177 {strides = array<i32>} : memref<1x64x32xf32, #tpu.memory_space<vmem>>, vector<1x64x32xf32>,
    return
  }
  func.func @transform_0(%arg0: i32, %arg1: i32) -> (i32, i32, i32) {
    %c0_i32 = arith.constant 0 : i32
    %c0_i32_0 = arith.constant 0 : i32
    return %arg0, %arg1, %c0_i32 : i32, i32, i32
  }
  func.func @transform_1(%arg0: i32, %arg1: i32) -> (i32, i32) {
    %c0_i32 = arith.constant 0 : i32
    %c0_i32_0 = arith.constant 0 : i32
    %c0_i32_1 = arith.constant 0 : i32
    return %c0_i32, %c0_i32_0 : i32, i32
  }
  func.func @transform_2(%arg0: i32, %arg1: i32) -> (i32, i32) {
    %c0_i32 = arith.constant 0 : i32
    %c0_i32_0 = arith.constant 0 : i32
    %c0_i32_1 = arith.constant 0 : i32
    return %c0_i32, %c0_i32_0 : i32, i32
  }
  func.func @transform_3(%arg0: i32, %arg1: i32) -> (i32, i32) {
    %c0_i32 = arith.constant 0 : i32
    %c0_i32_0 = arith.constant 0 : i32
    %c0_i32_1 = arith.constant 0 : i32
    return %c0_i32, %c0_i32_0 : i32, i32
  }
  func.func @transform_4(%arg0: i32, %arg1: i32) -> (i32, i32) {
    %c0_i32 = arith.constant 0 : i32
    %c0_i32_0 = arith.constant 0 : i32
    %c0_i32_1 = arith.constant 0 : i32
    return %c0_i32, %c0_i32_0 : i32, i32
  }
  func.func @transform_5(%arg0: i32, %arg1: i32) -> (i32, i32) {
    %c0_i32 = arith.constant 0 : i32
    %c0_i32_0 = arith.constant 0 : i32
    %c0_i32_1 = arith.constant 0 : i32
    return %c0_i32, %c0_i32_0 : i32, i32
  }
  func.func @transform_6(%arg0: i32, %arg1: i32) -> (i32, i32) {
    %c0_i32 = arith.constant 0 : i32
    %c0_i32_0 = arith.constant 0 : i32
    %c0_i32_1 = arith.constant 0 : i32
    return %c0_i32, %c0_i32_0 : i32, i32
  }
  func.func @transform_7(%arg0: i32, %arg1: i32) -> (i32, i32) {
    %c0_i32 = arith.constant 0 : i32
    %c0_i32_0 = arith.constant 0 : i32
    %c0_i32_1 = arith.constant 0 : i32
    return %c0_i32, %c0_i32_0 : i32, i32
  }
  func.func @transform_8(%arg0: i32, %arg1: i32) -> (i32, i32) {
    %c0_i32 = arith.constant 0 : i32
    %c0_i32_0 = arith.constant 0 : i32
    %c0_i32_1 = arith.constant 0 : i32
    return %c0_i32, %c0_i32_0 : i32, i32
  }
  func.func @transform_9(%arg0: i32, %arg1: i32) -> (i32, i32) {
    %c0_i32 = arith.constant 0 : i32
    %c0_i32_0 = arith.constant 0 : i32
    %c0_i32_1 = arith.constant 0 : i32
    return %c0_i32, %c0_i32_0 : i32, i32
  }
  func.func @transform_10(%arg0: i32, %arg1: i32) -> (i32, i32) {
    %c0_i32 = arith.constant 0 : i32
    %c0_i32_0 = arith.constant 0 : i32
    %c0_i32_1 = arith.constant 0 : i32
    return %c0_i32, %c0_i32_0 : i32, i32
  }
  func.func @transform_11(%arg0: i32, %arg1: i32) -> (i32, i32, i32) {
    %c0_i32 = arith.constant 0 : i32
    %c0_i32_0 = arith.constant 0 : i32
    return %arg0, %arg1, %c0_i32 : i32, i32, i32
  }
}

</mosaic_0001>

<bundles_post_ra>
// kernel: tpu_custom_call.1
= control target key start
LH: loop header
LB: loop body
LE: loop exit
PB: predicated region body
PF: predicated region fallthrough
CT: control target
= control target key end

     0   :  { %s4843_s17 = smov 0   ;;  %s4845_s18 = smov 0   ;;  %s7545_s0 = inlined_call_operand.vmem [shape: f32[2,128,32], index: 0, kind: input, shape index: {}]   ;;  %s7546_s1 = inlined_call_operand.vmem [shape: f32[1,32], index: 1, kind: input, shape index: {}]   ;;  %s7547_s2 = inlined_call_operand.vmem [shape: f32[1,32], index: 2, kind: input, shape index: {}]   ;;  %s7548_s3 = inlined_call_operand.vmem [shape: bf16[32,128], index: 3, kind: input, shape index: {}]   ;;  %s7549_s4 = inlined_call_operand.vmem [shape: f32[4,64], index: 4, kind: input, shape index: {}]   ;;  %s7550_s5 = inlined_call_operand.vmem [shape: f32[1,64], index: 5, kind: input, shape index: {}]   ;;  %s7551_s6 = inlined_call_operand.vmem [shape: f32[64,96], index: 6, kind: input, shape index: {}]   ;;  %s7552_s7 = inlined_call_operand.vmem [shape: f32[1,64], index: 7, kind: input, shape index: {}]   ;;  %s7553_s8 = inlined_call_operand.vmem [shape: f32[1,1024], index: 8, kind: input, shape index: {}]   ;;  %s7554_s9 = inlined_call_operand.vmem [shape: f32[1,64], index: 9, kind: input, shape index: {}]   ;;  %s7555_s10 = inlined_call_operand.vmem [shape: bf16[64,32], index: 10, kind: input, shape index: {}]   ;;  %s7556_s11 = inlined_call_operand.vmem [shape: f32[2,128,32], index: 11, kind: output, shape index: {}]  }
   0x1   :  { %s4847_s19 = smov 0   ;;  %s4849_s20 = smov 0  }
   0x2   :  { %s4851_s21 = smov 0  }
   0x3 LB: > { %s30_s22 = sadd.s32 1, %s4700_s19  ;;  %s33_s23 = sadd.s32 1, %s4704_s20  ;;  %s4708_s21 = sphi %s4851_s21, %s21_s21   ;;  %s4704_s20 = sphi %s4849_s20, %s7995_s20   ;;  %s4700_s19 = sphi %s4847_s19, %s7994_s19   ;;  %s4696_s18 = sphi %s4845_s18, %s7993_s18   ;;  %s4692_s17 = sphi %s4843_s17, %s7992_s17  }
   0x4   : > { %p31_p0 = scmp.ge.s32.totalorder %s30_s22, 2  ;;  %p4002_p1 = scmp.ge.s32.totalorder %s4708_s21, 1 }
   0x5   : > { %p358_p2 = scmp.lt.s32.totalorder %s4708_s21, 5 }
   0x6   : > { %s7997_s22 = smov (%p31_p0, %s30_s22), 0  ;;  %s7999_s23 = smov (!%p31_p0, %s33_s23), %s4704_s20 }
   0x7   : > { %p359_p3 = pnand %p4002_p1, %p358_p2  ;;  %p35_p4 = scmp.ge.s32.totalorder %s7999_s23, 2 }
   0x9   : > { %s8001_s23 = smov (%p35_p4, %s7999_s23), 0  ;;  %362 = sbr.rel (%p359_p3) target bundleno = 2116 (0x844), region = 64 }
   0xe   : > { %s4003_s24 = sshll.u32 %s4692_s17, 3  ;;  %p407_p5 = scmp.lt.s32.totalorder %s4696_s18, 1 }
   0xf   : > { %p409_p6 = scmp.lt.s32.totalorder %s4003_s24, 15  ;;  %p4009_p7 = scmp.ne.s32.totalorder %s4692_s17, 0 }
  0x10   : > { %s8003_s18 = smov (!%p407_p5, %s4696_s18), 1 }
  0x11   : > { %s8005_s24 = smov (!%p409_p6, %s4003_s24), 15  ;;  %s4004_s25 = sshll.u32 %s8003_s18, 4 }
  0x12   : > { %s412_s26 = sadd.s32 %s4004_s25, %s8005_s24  ;;  %430 = sbr.rel (%p4009_p7) target bundleno = 26 (0x1a), region = 68 }
  0x13   : > { %s4005_s27 = sshll.u32 %s412_s26, 3 }
  0x14   : > { %s414_s30 = scalar_lea.vmem %s7545_s0, %s4005_s27  ;;  %s4879_s14 = scalar_lea.vmem %s7556_s11, %s4005_s27 }
  0x17   : > { %vm431_vm0 = vcmask 523264   ;;  %v4746_v0 = vmov 0.0  }
  0x18   : > { %432 = vst.msk [vmem:[#allocation3] sm:$0xff] %vm431_vm0, %v4746_v0 }
  0x19   : > { %433 = vst [vmem:[#allocation4] sm:$0xff] %v4746_v0 }
  0x1a PF: > { %v438_v1 = vld [vmem:[%s414_s30 + $0x20] sm:$0xff]  ;;  %vm7660_vm1 = vcmask 261120   ;;  %v436_v2 = vld [vmem:[%s414_s30 + $0x10] sm:$0xff]  ;;  %v439_v7 = vld [vmem:[%s414_s30 + $0x28] sm:$0xff]  ;;  %v4747_v17 = vmov 32.0   ;;  %s4749_s17 = smov 48  }
  0x1b   : > { %v434_v3 = vld [vmem:[%s414_s30] sm:$0xff]  ;;  %v455_v4 = vsel %vm7660_vm1, %v438_v1, 0.0  ;;  %v449_v5 = vsel %vm7660_vm1, %v436_v2, 0.0  ;;  %v437_v8 = vld [vmem:[%s414_s30 + $0x18] sm:$0xff]  ;;  %v435_v9 = vld [vmem:[%s414_s30 + $0x8] sm:$0xff]  ;;  %v458_v10 = vsel %vm7660_vm1, %v439_v7, 0.0  ;;  %4373 = vrcp.f32 %v4747_v17 }
  0x1c   : > { %v443_v6 = vsel %vm7660_vm1, %v434_v3, 0.0  ;;  %456 = vadd.xlane.f32.xlu2 %v455_v4  ;;  %450 = vadd.xlane.f32.xlu1 %v449_v5  ;;  %v452_v11 = vsel %vm7660_vm1, %v437_v8, 0.0  ;;  %v446_v12 = vsel %vm7660_vm1, %v435_v9, 0.0  ;;  %v441_v13 = vld [vmem:[%s414_s30 + $0x38] sm:$0xff]  ;;  %v440_v14 = vld [vmem:[%s414_s30 + $0x30] sm:$0xff]  ;;  %s4765_s25 = smov 64  }
  0x1d   : > { %444 = vadd.xlane.f32.xlu0 %v443_v6  ;;  %v464_v15 = vsel %vm7660_vm1, %v441_v13, 0.0  ;;  %v461_v16 = vsel %vm7660_vm1, %v440_v14, 0.0  ;;  %v4072_v6 = vld [vmem:[%s7548_s3] sm:$0xff]  ;;  %s6455_s30 = smov 0  }
  0x21   : > { %v4374_v18 = vpop.eup %4373 }
  0x22   : > { %v468_v19 = vmul.f32 32.0, %v4374_v18  ;;  %vm472_vm2 = vweird.f32 %v4374_v18 }
  0x24   : > { %459 = vadd.xlane.f32.xlu2 %v458_v10  ;;  %453 = vadd.xlane.f32.xlu1 %v452_v11  ;;  %v469_v20 = vsub.f32 1.0, %v468_v19 }
  0x25   : > { %447 = vadd.xlane.f32.xlu0 %v446_v12 }
  0x26   : > { %v470_v21 = vmul.f32 %v4374_v18, %v469_v20 }
  0x28   : > { %v471_v22 = vadd.f32 %v4374_v18, %v470_v21 }
  0x2a   : > { %v4889_v23 = vsel %vm472_vm2, %v4374_v18, %v471_v22 }
  0x2c   : > { %465 = vadd.xlane.f32.xlu1 %v464_v15 }
  0x2d   : > { %462 = vadd.xlane.f32.xlu0 %v461_v16 }
  0x8f   : > { %v457_v24 = vpop.xlane.xlu2 %456  ;;  %v451_v25 = vpop.xlane.xlu1 %450 }
  0x90   : > { %v476_v26 = vmul.f32 %v4889_v23, %v451_v25  ;;  %v445_v27 = vpop.xlane.xlu0 %444  ;;  %v478_v40 = vmul.f32 %v4889_v23, %v457_v24 }
  0x91   : > { %v474_v28 = vmul.f32 %v4889_v23, %v445_v27 }
  0x92   : > { %v4893_v29 = vsub.f32 %v436_v2, %v476_v26  ;;  %v4917_v47 = vsub.f32 %v438_v1, %v478_v40  ;;  %v4073_v1 = vld [vmem:[%s7548_s3 + $0x8] sm:$0xff] }
  0x93   : > { %v4895_v30 = vsub.f32 %v434_v3, %v474_v28  ;;  %688 = vmatpush.bf16.msra.mxu0 %v4073_v1 }
  0x94   : > { %v492_v31 = vmul.f32 %v4893_v29, %v4893_v29  ;;  %v494_v56 = vmul.f32 %v4917_v47, %v4917_v47 }
  0x95   : > { %v490_v32 = vmul.f32 %v4895_v30, %v4895_v30 }
  0x96   : > { %v504_v33 = vsel %vm7660_vm1, %v492_v31, 0.0  ;;  %v510_v59 = vsel %vm7660_vm1, %v494_v56, 0.0 }
  0x97   : > { %v460_v34 = vpop.xlane.xlu2 %459  ;;  %505 = vadd.xlane.f32.xlu1 %v504_v33  ;;  %v454_v35 = vpop.xlane.xlu1 %453  ;;  %v498_v36 = vsel %vm7660_vm1, %v490_v32, 0.0  ;;  %689 = vmatpush.bf16.msra.mxu0 %v4072_v6 }
  0x98   : > { %v479_v37 = vmul.f32 %v4889_v23, %v460_v34  ;;  %v477_v38 = vmul.f32 %v4889_v23, %v454_v35  ;;  %499 = vadd.xlane.f32.xlu2 %v498_v36  ;;  %v448_v39 = vpop.xlane.xlu0 %447 }
  0x99   : > { %v475_v41 = vmul.f32 %v4889_v23, %v448_v39 }
  0x9a   : > { %v4907_v42 = vsub.f32 %v439_v7, %v479_v37  ;;  %v4909_v43 = vsub.f32 %v437_v8, %v477_v38 }
  0x9b   : > { %v4911_v44 = vsub.f32 %v435_v9, %v475_v41 }
  0x9c   : > { %v495_v45 = vmul.f32 %v4907_v42, %v4907_v42  ;;  %v493_v46 = vmul.f32 %v4909_v43, %v4909_v43 }
  0x9d   : > { %v491_v48 = vmul.f32 %v4911_v44, %v4911_v44 }
  0x9e   : > { %v513_v49 = vsel %vm7660_vm1, %v495_v45, 0.0  ;;  %v507_v50 = vsel %vm7660_vm1, %v493_v46, 0.0  ;;  %v4973_v46 = vld [vmem:[%s7546_s1] ss:$0 sm:$0xff] }
  0x9f   : > { %514 = vadd.xlane.f32.xlu1 %v513_v49  ;;  %v501_v51 = vsel %vm7660_vm1, %v491_v48, 0.0  ;;  %v466_v52 = vpop.xlane.xlu1 %465 }
  0xa0   : > { %508 = vadd.xlane.f32.xlu2 %v507_v50  ;;  %502 = vadd.xlane.f32.xlu0 %v501_v51  ;;  %v463_v53 = vpop.xlane.xlu0 %462  ;;  %v481_v55 = vmul.f32 %v4889_v23, %v466_v52 }
  0xa1   : > { %v480_v54 = vmul.f32 %v4889_v23, %v463_v53 }
  0xa2   : > { %v4930_v58 = vsub.f32 %v441_v13, %v481_v55 }
  0xa3   : > { %v4928_v57 = vsub.f32 %v440_v14, %v480_v54 }
  0xa4   : > { %v497_v62 = vmul.f32 %v4930_v58, %v4930_v58 }
  0xa5   : > { %v496_v60 = vmul.f32 %v4928_v57, %v4928_v57 }
  0xa6   : > { %v519_v63 = vsel %vm7660_vm1, %v497_v62, 0.0 }
  0xa7   : > { %v516_v61 = vsel %vm7660_vm1, %v496_v60, 0.0 }
  0xa8   : > { %511 = vadd.xlane.f32.xlu0 %v510_v59  ;;  %517 = vadd.xlane.f32.xlu2 %v516_v61 }
  0xb0   : > { %520 = vadd.xlane.f32.xlu0 %v519_v63 }
 0x10a   : > { %v506_v2 = vpop.xlane.xlu1 %505 }
 0x10b   : > { %v500_v0 = vpop.xlane.xlu2 %499  ;;  %v524_v5 = vmul.f32 %v506_v2, %v4889_v23 }
 0x10c   : > { %v522_v3 = vmul.f32 %v500_v0, %v4889_v23 }
 0x10d   : > { %v4947_v7 = vadd.f32 1e-05, %v524_v5 }
 0x10e   : > { %v530_v4 = vadd.f32 1e-05, %v522_v3 }
 0x10f   : > { %vm564_vm11 = vweird.f32 %v4947_v7 }
 0x110   : > { %4375 = vrsqrt.f32 %v530_v4  ;;  %vm544_vm4 = vweird.f32 %v530_v4 }
 0x111   : > { %4377 = vrsqrt.f32 %v4947_v7 }
 0x112   : > { %v515_v19 = vpop.xlane.xlu1 %514 }
 0x113   : > { %v509_v8 = vpop.xlane.xlu2 %508  ;;  %v503_v9 = vpop.xlane.xlu0 %502  ;;  %v527_v26 = vmul.f32 %v515_v19, %v4889_v23 }
 0x114   : > { %v525_v10 = vmul.f32 %v509_v8, %v4889_v23  ;;  %v523_v11 = vmul.f32 %v503_v9, %v4889_v23 }
 0x115   : > { %v4964_v36 = vadd.f32 1e-05, %v527_v26 }
 0x116   : > { %v4376_v12 = vpop.eup %4375  ;;  %v533_v13 = vadd.f32 1e-05, %v525_v10  ;;  %v531_v14 = vadd.f32 1e-05, %v523_v11 }
 0x117   : > { %v539_v15 = vmul.f32 %v4376_v12, %v530_v4  ;;  %v4952_v20 = vpop.eup %4377  ;;  %vm545_vm3 = vweird.f32 %v4376_v12  ;;  %vm594_vm2 = vweird.f32 %v4964_v36 }
 0x118   : > { %4379 = vrsqrt.f32 %v533_v13  ;;  %v559_v28 = vmul.f32 %v4952_v20, %v4947_v7  ;;  %vm546_vm5 = vmor %vm544_vm4, %vm545_vm3  ;;  %vm554_vm7 = vweird.f32 %v531_v14  ;;  %vm574_vm9 = vweird.f32 %v533_v13 }
 0x119   : > { %v540_v16 = vmul.f32 %v4376_v12, %v539_v15  ;;  %4381 = vrsqrt.f32 %v531_v14  ;;  %vm565_vm12 = vweird.f32 %v4952_v20 }
 0x11a   : > { %v560_v37 = vmul.f32 %v4952_v20, %v559_v28  ;;  %vm566_vm14 = vmor %vm564_vm11, %vm565_vm12  ;;  %vm7661_vm12 = vcmask 523264  }
 0x11b   : > { %v541_v17 = vmul.f32 0.5, %v540_v16  ;;  %v512_v18 = vpop.xlane.xlu0 %511  ;;  %v518_v59 = vpop.xlane.xlu2 %517 }
 0x11c   : > { %v526_v22 = vmul.f32 %v512_v18, %v4889_v23  ;;  %v561_v48 = vmul.f32 0.5, %v560_v37  ;;  %v528_v1 = vmul.f32 %v518_v59, %v4889_v23 }
 0x11d   : > { %v542_v21 = vsub.f32 1.5, %v541_v17 }
 0x11e   : > { %v4955_v24 = vpop.eup %4379  ;;  %v4961_v33 = vadd.f32 1e-05, %v526_v22  ;;  %v562_v56 = vsub.f32 1.5, %v561_v48  ;;  %v536_v10 = vadd.f32 1e-05, %v528_v1 }
 0x11f   : > { %v4382_v25 = vpop.eup %4381  ;;  %v569_v27 = vmul.f32 %v4955_v24, %v533_v13  ;;  %v543_v31 = vmul.f32 %v4376_v12, %v542_v21  ;;  %vm575_vm10 = vweird.f32 %v4955_v24 }
 0x120   : > { %v549_v32 = vmul.f32 %v4382_v25, %v531_v14  ;;  %4383 = vrsqrt.f32 %v4961_v33  ;;  %vm555_vm6 = vweird.f32 %v4382_v25  ;;  %vm4989_vm13 = vmor %vm574_vm9, %vm575_vm10  ;;  %v563_v4 = vmul.f32 %v4952_v20, %v562_v56 }
 0x121   : > { %v570_v34 = vmul.f32 %v4955_v24, %v569_v27  ;;  %v547_v38 = vsel %vm546_vm5, %v4376_v12, %v543_v31  ;;  %4385 = vrsqrt.f32 %v4964_v36  ;;  %vm556_vm8 = vmor %vm554_vm7, %vm555_vm6  ;;  %vm584_vm15 = vweird.f32 %v4961_v33 }
 0x122   : > { %v550_v35 = vmul.f32 %v4382_v25, %v549_v32  ;;  %v618_v45 = vmul.f32 %v547_v38, %v4895_v30  ;;  %v4980_v30 = vld [vmem:[%s7547_s2] ss:$0 sm:$0xff] }
 0x123   : > { %v571_v40 = vmul.f32 0.5, %v570_v34  ;;  %v521_v52 = vpop.xlane.xlu0 %520 }
 0x124   : > { %v551_v39 = vmul.f32 0.5, %v550_v35  ;;  %v630_v55 = vmul.f32 %v4973_v46, %v618_v45  ;;  %v529_v61 = vmul.f32 %v521_v52, %v4889_v23  ;;  %v567_v23 = vsel %vm566_vm14, %v4952_v20, %v563_v4 }
 0x125   : > { %v572_v50 = vsub.f32 1.5, %v571_v40  ;;  %v620_v14 = vmul.f32 %v567_v23, %v4893_v29 }
 0x126   : > { %v552_v41 = vsub.f32 1.5, %v551_v39  ;;  %v4384_v53 = vpop.eup %4383  ;;  %v642_v2 = vadd.f32 %v4980_v30, %v630_v55  ;;  %v537_v6 = vadd.f32 1e-05, %v529_v61  ;;  %v711_v61 = vld [vmem:[#allocation3] sm:$0xff] }
 0x127   : > { %v4386_v60 = vpop.eup %4385  ;;  %v579_v63 = vmul.f32 %v4384_v53, %v4961_v33  ;;  %v632_v19 = vmul.f32 %v4973_v46, %v620_v14  ;;  %vm585_vm0 = vweird.f32 %v4384_v53  ;;  %713 = vst.msk [vmem:[#allocation2] sm:$0xff] %vm7661_vm12, %v711_v61  ;;  %v981_v14 = vld [vmem:[%s7551_s6 + $0x8] sm:$0xff] }
 0x128   : > { %v553_v49 = vmul.f32 %v4382_v25, %v552_v41  ;;  %v589_v5 = vmul.f32 %v4386_v60, %v4964_v36  ;;  %4387 = vrsqrt.f32 %v537_v6  ;;  %vm595_vm3 = vweird.f32 %v4386_v60  ;;  %vm586_vm4 = vmor %vm584_vm15, %vm585_vm0 }
 0x129   : > { %v580_v9 = vmul.f32 %v4384_v53, %v579_v63  ;;  %4389 = vrsqrt.f32 %v536_v10  ;;  %v644_v29 = vadd.f32 %v4980_v30, %v632_v19  ;;  %vm596_vm5 = vmor %vm594_vm2, %vm595_vm3  ;;  %vm614_vm6 = vweird.f32 %v537_v6  ;;  %v985_v63 = vld [vmem:[%s7551_s6 + $0x28] sm:$0xff] }
 0x12a   : > { %v557_v51 = vsel %vm556_vm8, %v4382_v25, %v553_v49  ;;  %v590_v11 = vmul.f32 %v4386_v60, %v589_v5  ;;  %vm604_vm8 = vweird.f32 %v536_v10 }
 0x12b   : > { %v619_v54 = vmul.f32 %v557_v51, %v4911_v44  ;;  %v573_v44 = vmul.f32 %v4955_v24, %v572_v50  ;;  %v581_v13 = vmul.f32 0.5, %v580_v9  ;;  %v983_v9 = vld [vmem:[%s7551_s6 + $0x18] sm:$0xff] }
 0x12c   : > { %v591_v15 = vmul.f32 0.5, %v590_v11  ;;  %v982_v11 = vld [vmem:[%s7551_s6 + $0x10] sm:$0xff] }
 0x12d   : > { %v631_v62 = vmul.f32 %v4973_v46, %v619_v54  ;;  %v577_v8 = vsel %vm4989_vm13, %v4955_v24, %v573_v44  ;;  %v582_v17 = vsub.f32 1.5, %v581_v13 }
 0x12e   : > { %v621_v12 = vmul.f32 %v577_v8, %v4909_v43  ;;  %v4388_v18 = vpop.eup %4387  ;;  %v592_v21 = vsub.f32 1.5, %v591_v15  ;;  %v5075_v15 = vld [vmem:[%s7550_s5] ss:$0 sm:$0xff] }
 0x12f   : > { %v643_v3 = vadd.f32 %v4980_v30, %v631_v62  ;;  %v4390_v20 = vpop.eup %4389  ;;  %v583_v43 = vmul.f32 %v4384_v53, %v582_v17  ;;  %v609_v24 = vmul.f32 %v4388_v18, %v537_v6  ;;  %vm615_vm7 = vweird.f32 %v4388_v18 }
 0x130   : > { %v633_v16 = vmul.f32 %v4973_v46, %v621_v12  ;;  %v593_v25 = vmul.f32 %v4386_v60, %v592_v21  ;;  %v599_v26 = vmul.f32 %v4390_v20, %v536_v10  ;;  %vm605_vm9 = vweird.f32 %v4390_v20  ;;  %vm616_vm10 = vmor %vm614_vm6, %vm615_vm7 }
 0x131   : > { %v650_v7 = vpack.c.bf16 %v643_v3, %v642_v2  ;;  %v587_v28 = vsel %vm586_vm4, %v4384_v53, %v583_v43  ;;  %v610_v31 = vmul.f32 %v4388_v18, %v609_v24  ;;  %vm606_vm11 = vmor %vm604_vm8, %vm605_vm9 }
 0x132   : > { %v645_v22 = vadd.f32 %v4980_v30, %v633_v16  ;;  %v597_v32 = vsel %vm596_vm5, %v4386_v60, %v593_v25  ;;  %v600_v33 = vmul.f32 %v4390_v20, %v599_v26  ;;  %v622_v34 = vmul.f32 %v587_v28, %v4917_v47 }
 0x133   : > { %4018 = vmatmul.msk.bf16.vlgmr.msra.gmra.mxu0 %vm7660_vm1, %v650_v7  ;;  %v611_v35 = vmul.f32 0.5, %v610_v31  ;;  %v623_v36 = vmul.f32 %v597_v32, %v4907_v42  ;;  %v984_v7 = vld [vmem:[%s7551_s6 + $0x20] sm:$0xff] }
 0x134   : > { %v651_v27 = vpack.c.bf16 %v645_v22, %v644_v29  ;;  %v601_v37 = vmul.f32 0.5, %v600_v33  ;;  %v634_v38 = vmul.f32 %v4973_v46, %v622_v34  ;;  %v980_v22 = vld [vmem:[%s7551_s6] sm:$0xff] }
 0x135   : > { %v612_v39 = vsub.f32 1.5, %v611_v35  ;;  %v635_v40 = vmul.f32 %v4973_v46, %v623_v36 }
 0x136   : > { %v602_v41 = vsub.f32 1.5, %v601_v37  ;;  %v646_v45 = vadd.f32 %v4980_v30, %v634_v38 }
 0x137   : > { %v613_v48 = vmul.f32 %v4388_v18, %v612_v39  ;;  %v647_v47 = vadd.f32 %v4980_v30, %v635_v40 }
 0x138   : > { %v603_v49 = vmul.f32 %v4390_v20, %v602_v41 }
 0x139   : > { %v652_v42 = vpack.c.bf16 %v647_v47, %v646_v45  ;;  %v617_v50 = vsel %vm616_vm10, %v4388_v18, %v613_v48 }
 0x13a   : > { %v607_v51 = vsel %vm606_vm11, %v4390_v20, %v603_v49  ;;  %v625_v52 = vmul.f32 %v617_v50, %v4930_v58  ;;  %v987_v58 = vld [vmem:[%s7551_s6 + $0x38] sm:$0xff] }
 0x13b   : > { %v624_v53 = vmul.f32 %v607_v51, %v4928_v57  ;;  %v723_v57 = vld [vmem:[%s7549_s4] sm:$0xf]  ;;  %1020 = vmatpush.msra.mxu1 %v987_v58  ;;  %4080 = vmatpush.msra.mxu3 %v987_v58 }
 0x13c   : > { %v637_v54 = vmul.f32 %v4973_v46, %v625_v52  ;;  %v5042_v44 = vperm.slane %v723_v57, 2  ;;  %v5047_v0 = vperm.slane %v723_v57, 1  ;;  %v5054_v6 = vperm.slane %v723_v57, 0 }
 0x13d   : > { %v636_v55 = vmul.f32 %v4973_v46, %v624_v53  ;;  %v986_v46 = vld [vmem:[%s7551_s6 + $0x30] sm:$0xff] }
 0x13e   : > { %v649_v56 = vadd.f32 %v4980_v30, %v637_v54  ;;  %1021 = vmatpush.msra.mxu1 %v986_v46  ;;  %4081 = vmatpush.msra.mxu3 %v986_v46 }
 0x13f   : > { %v648_v59 = vadd.f32 %v4980_v30, %v636_v55  ;;  %v5040_v30 = vperm.slane %v723_v57, 3 }
 0x140   : > { %1022 = vmatpush.msra.mxu1 %v985_v63  ;;  %4082 = vmatpush.msra.mxu3 %v985_v63 }
 0x141   : > { %v653_v60 = vpack.c.bf16 %v649_v56, %v648_v59 }
 0x142   : > { %1023 = vmatpush.msra.mxu1 %v984_v7  ;;  %4083 = vmatpush.msra.mxu3 %v984_v7 }
 0x143   : > { %4019 = vmatmul.msk.bf16.gmra.mxu0 %vm7660_vm1, %v651_v27 }
 0x144   : > { %1024 = vmatpush.msra.mxu1 %v983_v9  ;;  %4084 = vmatpush.msra.mxu3 %v983_v9 }
 0x146   : > { %1025 = vmatpush.msra.mxu1 %v982_v11  ;;  %4085 = vmatpush.msra.mxu3 %v982_v11 }
 0x148   : > { %1026 = vmatpush.msra.mxu1 %v981_v14  ;;  %4086 = vmatpush.msra.mxu3 %v981_v14 }
 0x14a   : > { %1027 = vmatpush.msra.mxu1 %v980_v22  ;;  %4087 = vmatpush.msra.mxu3 %v980_v22 }
 0x153   : > { %4020 = vmatmul.msk.bf16.gmra.mxu0 %vm7660_vm1, %v652_v42 }
 0x163   : > { %4021 = vmatmul.msk.bf16.gmra.mxu0 %vm7660_vm1, %v653_v60 }
 0x1b0   : > { %v5027_v62 = vpop.f32.mrf.mxu0 }
 0x1b1   : > { %7666 = vst [vmem:[#allocation9_spill] sm:$0xff] %v5027_v62  ;;  %v725_v4 = vmul.f32 %v5040_v30, %v5027_v62 }
 0x1b2   : > { %714 = vst.msk [vmem:[#allocation2 + $0x8] sm:$0xff] %vm7661_vm12, %v5027_v62 }
 0x1b8   : > { %v5049_v3 = vpop.f32.mrf.mxu0 }
 0x1b9   : > { %v733_v1 = vld [vmem:[#allocation2 + $0x7] sm:$0xff]  ;;  %7667 = vst [vmem:[#allocation10_spill] sm:$0xff] %v5049_v3  ;;  %v726_v21 = vmul.f32 %v5040_v30, %v5049_v3 }
 0x1ba   : > { %v758_v2 = vld [vmem:[#allocation2 + $0x6] sm:$0xff]  ;;  %v742_v5 = vmul.f32 %v5042_v44, %v733_v1  ;;  %715 = vst.msk [vmem:[#allocation2 + $0x10] sm:$0xff] %vm7661_vm12, %v5049_v3  ;;  %v7721_v3 = vmov 74  }
 0x1bb   : > { %v783_v8 = vld [vmem:[#allocation2 + $0x5] sm:$0xff]  ;;  %v767_v23 = vmul.f32 %v5047_v0, %v758_v2 }
 0x1bc   : > { %v750_v10 = vadd.f32 %v742_v5, %v725_v4  ;;  %v792_v13 = vmul.f32 %v5054_v6, %v783_v8 }
 0x1be   : > { %v775_v12 = vadd.f32 %v767_v23, %v750_v10 }
 0x1c0   : > { %v800_v16 = vadd.f32 %v792_v13, %v775_v12  ;;  %v5077_v19 = vpop.f32.mrf.mxu0 }
 0x1c1   : > { %v734_v17 = vld [vmem:[#allocation2 + $0xf] sm:$0xff]  ;;  %7668 = vst [vmem:[#allocation11_spill] sm:$0xff] %v5077_v19  ;;  %v727_v35 = vmul.f32 %v5040_v30, %v5077_v19 }
 0x1c2   : > { %v759_v18 = vld [vmem:[#allocation2 + $0xe] sm:$0xff]  ;;  %v743_v20 = vmul.f32 %v5042_v44, %v734_v17  ;;  %716 = vst.msk [vmem:[#allocation2 + $0x18] sm:$0xff] %vm7661_vm12, %v5077_v19  ;;  %v5088_v24 = vadd.f32 %v5075_v15, %v800_v16 }
 0x1c3   : > { %v784_v43 = vld [vmem:[#allocation2 + $0xd] sm:$0xff]  ;;  %v768_v25 = vmul.f32 %v5047_v0, %v759_v18 }
 0x1c4   : > { %v751_v29 = vadd.f32 %v743_v20, %v726_v21  ;;  %v4022_v26 = vmul.f32 -1.442695, %v5088_v24  ;;  %v793_v28 = vmul.f32 %v5054_v6, %v784_v43 }
 0x1c6   : > { %v776_v27 = vadd.f32 %v768_v25, %v751_v29  ;;  %4391 = vpow2.f32 %v4022_v26 }
 0x1c8   : > { %v801_v31 = vadd.f32 %v793_v28, %v776_v27  ;;  %v5093_v34 = vpop.f32.mrf.mxu0 }
 0x1c9   : > { %v735_v32 = vld [vmem:[#allocation2 + $0x17] sm:$0xff]  ;;  %7669 = vst [vmem:[#allocation12_spill] sm:$0xff] %v5093_v34  ;;  %v728_v53 = vmul.f32 %v5040_v30, %v5093_v34 }
 0x1ca   : > { %v760_v33 = vld [vmem:[#allocation2 + $0x16] sm:$0xff]  ;;  %v744_v36 = vmul.f32 %v5042_v44, %v735_v32  ;;  %717 = vst.msk [vmem:[#allocation2 + $0x20] sm:$0xff] %vm7661_vm12, %v5093_v34  ;;  %v5101_v38 = vadd.f32 %v5075_v15, %v801_v31  ;;  %v7720_v34 = vmov 72  }
 0x1cb   : > { %v785_v37 = vld [vmem:[#allocation2 + $0x15] sm:$0xff]  ;;  %v769_v40 = vmul.f32 %v5047_v0, %v760_v33 }
 0x1cc   : > { %v752_v39 = vadd.f32 %v744_v36, %v727_v35  ;;  %v4392_v41 = vpop.eup %4391  ;;  %v4023_v45 = vmul.f32 -1.442695, %v5101_v38  ;;  %v794_v47 = vmul.f32 %v5054_v6, %v785_v37 }
 0x1cd   : > { %v844_v49 = vadd.f32 1.0, %v4392_v41 }
 0x1ce   : > { %v777_v48 = vadd.f32 %v769_v40, %v752_v39  ;;  %4393 = vpow2.f32 %v4023_v45 }
 0x1cf   : > { %4395 = vrcp.f32 %v844_v49  ;;  %v863_v11 = vand.u32 2147483648, %v844_v49  ;;  %v861_v14 = vand.u32 2147483647, %v844_v49  ;;  %vm857_vm14 = vweird.f32 %v844_v49 }
 0x1d0   : > { %v802_v42 = vadd.f32 %v794_v47, %v777_v48  ;;  %v5106_v52 = vpop.f32.mrf.mxu0 }
 0x1d1   : > { %v736_v50 = vld [vmem:[#allocation2 + $0x1f] sm:$0xff]  ;;  %7670 = vst [vmem:[#allocation13_spill] sm:$0xff] %v5106_v52  ;;  %v729_v10 = vmul.f32 %v5040_v30, %v5106_v52  ;;  %v864_v26 = vor.u32 1.1754944e-38, %v863_v11  ;;  %vm862_vm0 = vcmp.eq.f32.partialorder %v861_v14, 8.507059e+37 }
 0x1d2   : > { %v761_v51 = vld [vmem:[#allocation2 + $0x1e] sm:$0xff]  ;;  %v745_v54 = vmul.f32 %v5042_v44, %v736_v50  ;;  %718 = vst.msk [vmem:[#allocation2 + $0x28] sm:$0xff] %vm7661_vm12, %v5106_v52  ;;  %v5114_v56 = vadd.f32 %v5075_v15, %v802_v42  ;;  %v7717_v52 = vmov 71  }
 0x1d3   : > { %v786_v55 = vld [vmem:[#allocation2 + $0x1d] sm:$0xff]  ;;  %v770_v60 = vmul.f32 %v5047_v0, %v761_v51 }
 0x1d4   : > { %v753_v59 = vadd.f32 %v745_v54, %v728_v53  ;;  %v4394_v61 = vpop.eup %4393  ;;  %v4024_v57 = vmul.f32 -1.442695, %v5114_v56  ;;  %v795_v63 = vmul.f32 %v5054_v6, %v786_v55 }
 0x1d5   : > { %v4396_v58 = vpop.eup %4395  ;;  %v5119_v1 = vadd.f32 1.0, %v4394_v61 }
 0x1d6   : > { %v778_v46 = vadd.f32 %v770_v60, %v753_v59  ;;  %v853_v2 = vmul.f32 %v4396_v58, %v844_v49  ;;  %4397 = vpow2.f32 %v4024_v57  ;;  %vm858_vm13 = vweird.f32 %v4396_v58 }
 0x1d7   : > { %4399 = vrcp.f32 %v5119_v1  ;;  %vm859_vm15 = vmor %vm857_vm14, %vm858_vm13  ;;  %v878_v48 = vand.u32 2147483648, %v5119_v1  ;;  %vm872_vm3 = vweird.f32 %v5119_v1 }
 0x1d8   : > { %v803_v4 = vadd.f32 %v795_v63, %v778_v46  ;;  %v5122_v8 = vpop.f32.mrf.mxu0  ;;  %v854_v9 = vsub.f32 1.0, %v853_v2 }
 0x1d9   : > { %v737_v5 = vld [vmem:[#allocation2 + $0x27] sm:$0xff]  ;;  %7671 = vst [vmem:[#allocation14_spill] sm:$0xff] %v5122_v8  ;;  %v730_v41 = vmul.f32 %v5040_v30, %v5122_v8  ;;  %v879_v57 = vor.u32 1.1754944e-38, %v878_v48 }
 0x1da   : > { %v762_v7 = vld [vmem:[#allocation2 + $0x26] sm:$0xff]  ;;  %v746_v23 = vmul.f32 %v5042_v44, %v737_v5  ;;  %719 = vst.msk [vmem:[#allocation2 + $0x30] sm:$0xff] %vm7661_vm12, %v5122_v8  ;;  %v855_v13 = vmul.f32 %v4396_v58, %v854_v9  ;;  %v5130_v16 = vadd.f32 %v5075_v15, %v803_v4 }
 0x1db   : > { %v787_v12 = vld [vmem:[#allocation2 + $0x25] sm:$0xff]  ;;  %v771_v18 = vmul.f32 %v5047_v0, %v762_v7 }
 0x1dc   : > { %v754_v17 = vadd.f32 %v746_v23, %v729_v10  ;;  %v4398_v21 = vpop.eup %4397  ;;  %v856_v20 = vadd.f32 %v4396_v58, %v855_v13  ;;  %v4025_v22 = vmul.f32 -1.442695, %v5130_v16  ;;  %v796_v25 = vmul.f32 %v5054_v6, %v787_v12 }
 0x1dd   : > { %v4400_v43 = vpop.eup %4399  ;;  %v5135_v27 = vadd.f32 1.0, %v4398_v21 }
 0x1de   : > { %v779_v29 = vadd.f32 %v771_v18, %v754_v17  ;;  %v860_v28 = vsel %vm859_vm15, %v4396_v58, %v856_v20  ;;  %v868_v31 = vmul.f32 %v4400_v43, %v5119_v1  ;;  %4401 = vpow2.f32 %v4025_v22 }
 0x1df   : > { %v865_v33 = vsel %vm862_vm0, %v864_v26, %v860_v28  ;;  %4403 = vrcp.f32 %v5135_v27  ;;  %vm873_vm2 = vweird.f32 %v4400_v43  ;;  %v893_v12 = vand.u32 2147483648, %v5135_v27 }
 0x1e0   : > { %v804_v32 = vadd.f32 %v796_v25, %v779_v29  ;;  %v5139_v37 = vpop.f32.mrf.mxu0  ;;  %v5142_v39 = vmul.f32 %v865_v33, %v5088_v24  ;;  %v869_v40 = vsub.f32 1.0, %v868_v31  ;;  %v876_v24 = vand.u32 2147483647, %v5119_v1  ;;  %vm874_vm4 = vmor %vm872_vm3, %vm873_vm2 }
 0x1e1   : > { %v738_v35 = vld [vmem:[#allocation2 + $0x2f] sm:$0xff]  ;;  %7672 = vst [vmem:[#allocation15_spill] sm:$0xff] %v5139_v37  ;;  %v731_v23 = vmul.f32 %v5040_v30, %v5139_v37  ;;  %v891_v14 = vand.u32 2147483647, %v5135_v27  ;;  %vm887_vm7 = vweird.f32 %v5135_v27  ;;  %v894_v28 = vor.u32 1.1754944e-38, %v893_v12 }
 0x1e2   : > { %v763_v36 = vld [vmem:[#allocation2 + $0x2e] sm:$0xff]  ;;  %7673 = vst [vmem:[#allocation16_spill] sm:$0xff] %v5142_v39  ;;  %v747_v45 = vmul.f32 %v5042_v44, %v738_v35  ;;  %4030 = vmatmul.msk.f32.vlgmr.msra.gmra.mxu1 %vm7661_vm12, %v5142_v39  ;;  %v870_v49 = vmul.f32 %v4400_v43, %v869_v40  ;;  %v5154_v42 = vadd.f32 %v5075_v15, %v804_v32  ;;  %vm877_vm5 = vcmp.eq.f32.partialorder %v876_v24, 8.507059e+37 }
 0x1e3   : > { %720 = vst.msk [vmem:[#allocation2 + $0x38] sm:$0xff] %vm7661_vm12, %v5139_v37  ;;  %v788_v47 = vld [vmem:[#allocation2 + $0x2d] sm:$0xff]  ;;  %v772_v51 = vmul.f32 %v5047_v0, %v763_v36  ;;  %vm892_vm9 = vcmp.eq.f32.partialorder %v891_v14, 8.507059e+37  ;;  %v7559_v12 = vmov 64  }
 0x1e4   : > { %v755_v50 = vadd.f32 %v747_v45, %v730_v41  ;;  %v4402_v53 = vpop.eup %4401  ;;  %v871_v54 = vadd.f32 %v4400_v43, %v870_v49  ;;  %v4026_v55 = vmul.f32 -1.442695, %v5154_v42  ;;  %v797_v61 = vmul.f32 %v5054_v6, %v788_v47  ;;  %4241 = vset.pattern.permute.xlu0 %v7559_v12  ;;  %4257 = vset.pattern.permute.xlu2 %v7559_v12 }
 0x1e5   : > { %v4404_v59 = vpop.eup %4403  ;;  %v5160_v58 = vadd.f32 1.0, %v4402_v53  ;;  %4273 = vset.pattern.permute.xlu1 %v7559_v12 }
 0x1e6   : > { %v780_v60 = vadd.f32 %v772_v51, %v755_v50  ;;  %v875_v46 = vsel %vm874_vm4, %v4400_v43, %v871_v54  ;;  %v883_v63 = vmul.f32 %v4404_v59, %v5135_v27  ;;  %4405 = vpow2.f32 %v4026_v55 }
 0x1e7   : > { %v880_v4 = vsel %vm877_vm5, %v879_v57, %v875_v46  ;;  %4407 = vrcp.f32 %v5160_v58  ;;  %vm888_vm6 = vweird.f32 %v4404_v59  ;;  %v908_v49 = vand.u32 2147483648, %v5160_v58 }
 0x1e8   : > { %v805_v2 = vadd.f32 %v797_v61, %v780_v60  ;;  %v5164_v7 = vpop.f32.mrf.mxu0  ;;  %v5167_v9 = vmul.f32 %v880_v4, %v5101_v38  ;;  %v884_v10 = vsub.f32 1.0, %v883_v63  ;;  %vm889_vm8 = vmor %vm887_vm7, %vm888_vm6  ;;  %v906_v51 = vand.u32 2147483647, %v5160_v58 }
 0x1e9   : > { %7674 = vst [vmem:[#allocation17_spill] sm:$0xff] %v5164_v7  ;;  %v732_v48 = vmul.f32 %v5040_v30, %v5164_v7  ;;  %vm902_vm11 = vweird.f32 %v5160_v58  ;;  %v909_v57 = vor.u32 1.1754944e-38, %v908_v49 }
 0x1ea   : > { %v739_v1 = vld [vmem:[#allocation2 + $0x37] sm:$0xff]  ;;  %7675 = vst [vmem:[#allocation18_spill] sm:$0xff] %v5167_v9  ;;  %4031 = vmatmul.msk.f32.gmra.mxu1 %vm7661_vm12, %v5167_v9  ;;  %v885_v38 = vmul.f32 %v4404_v59, %v884_v10  ;;  %v5181_v17 = vadd.f32 %v5075_v15, %v805_v2  ;;  %vm907_vm14 = vcmp.eq.f32.partialorder %v906_v51, 8.507059e+37 }
 0x1eb   : > { %v764_v5 = vld [vmem:[#allocation2 + $0x36] sm:$0xff]  ;;  %v748_v11 = vmul.f32 %v5042_v44, %v739_v1  ;;  %721 = vst.msk [vmem:[#allocation2 + $0x40] sm:$0xff] %vm7661_vm12, %v5164_v7 }
 0x1ec   : > { %v789_v13 = vld [vmem:[#allocation2 + $0x35] sm:$0xff]  ;;  %722 = vst.msk [vmem:[#allocation3] sm:$0xff] %vm7661_vm12, %v5164_v7  ;;  %v773_v21 = vmul.f32 %v5047_v0, %v764_v5  ;;  %v4406_v20 = vpop.eup %4405  ;;  %v886_v22 = vadd.f32 %v4404_v59, %v885_v38  ;;  %v4027_v43 = vmul.f32 -1.442695, %v5181_v17 }
 0x1ed   : > { %v756_v18 = vadd.f32 %v748_v11, %v731_v23  ;;  %v4408_v29 = vpop.eup %4407  ;;  %v798_v26 = vmul.f32 %v5054_v6, %v789_v13  ;;  %v5187_v31 = vadd.f32 1.0, %v4406_v20 }
 0x1ee   : > { %v890_v32 = vsel %vm889_vm8, %v4404_v59, %v886_v22  ;;  %v898_v33 = vmul.f32 %v4408_v29, %v5160_v58  ;;  %4409 = vpow2.f32 %v4027_v43  ;;  %vm903_vm10 = vweird.f32 %v4408_v29 }
 0x1ef   : > { %v781_v25 = vadd.f32 %v773_v21, %v756_v18  ;;  %v895_v36 = vsel %vm892_vm9, %v894_v28, %v890_v32  ;;  %4411 = vrcp.f32 %v5187_v31  ;;  %vm904_vm13 = vmor %vm902_vm11, %vm903_vm10  ;;  %v923_v5 = vand.u32 2147483648, %v5187_v31 }
 0x1f0   : > { %v5192_v41 = vmul.f32 %v895_v36, %v5114_v56  ;;  %v899_v45 = vsub.f32 1.0, %v898_v33  ;;  %v921_v23 = vand.u32 2147483647, %v5187_v31  ;;  %vm917_vm0 = vweird.f32 %v5187_v31 }
 0x1f1   : > { %v806_v35 = vadd.f32 %v798_v26, %v781_v25  ;;  %v924_v38 = vor.u32 1.1754944e-38, %v923_v5  ;;  %v7563_v5 = vmov 66  }
 0x1f2   : > { %v740_v27 = vld [vmem:[#allocation2 + $0x3f] sm:$0xff]  ;;  %7676 = vst [vmem:[#allocation19_spill] sm:$0xff] %v5192_v41  ;;  %4032 = vmatmul.msk.f32.gmra.mxu1 %vm7661_vm12, %v5192_v41  ;;  %v900_v50 = vmul.f32 %v4408_v29, %v899_v45  ;;  %vm922_vm3 = vcmp.eq.f32.partialorder %v921_v23, 8.507059e+37  ;;  %v7581_v23 = vmov 69  }
 0x1f3   : > { %v765_v40 = vld [vmem:[#allocation2 + $0x3e] sm:$0xff]  ;;  %v749_v47 = vmul.f32 %v5042_v44, %v740_v27  ;;  %v5202_v53 = vadd.f32 %v5075_v15, %v806_v35 }
 0x1f4   : > { %v790_v24 = vld [vmem:[#allocation2 + $0x3d] sm:$0xff]  ;;  %v774_v54 = vmul.f32 %v5047_v0, %v765_v40  ;;  %v4410_v55 = vpop.eup %4409  ;;  %v901_v30 = vadd.f32 %v4408_v29, %v900_v50 }
 0x1f5   : > { %v757_v56 = vadd.f32 %v749_v47, %v732_v48  ;;  %v4028_v44 = vmul.f32 -1.442695, %v5202_v53  ;;  %v4412_v59 = vpop.eup %4411  ;;  %v799_v61 = vmul.f32 %v5054_v6, %v790_v24  ;;  %v849_v46 = vadd.f32 1.0, %v4410_v55 }
 0x1f6   : > { %v905_v63 = vsel %vm904_vm13, %v4408_v29, %v901_v30  ;;  %v913_v2 = vmul.f32 %v4412_v59, %v5187_v31  ;;  %vm918_vm15 = vweird.f32 %v4412_v59 }
 0x1f7   : > { %v782_v60 = vadd.f32 %v774_v54, %v757_v56  ;;  %4413 = vpow2.f32 %v4028_v44  ;;  %v910_v0 = vsel %vm907_vm14, %v909_v57, %v905_v63  ;;  %vm919_vm2 = vmor %vm917_vm0, %vm918_vm15  ;;  %v938_v29 = vand.u32 2147483648, %v849_v46 }
 0x1f8   : > { %4415 = vrcp.f32 %v849_v46  ;;  %v5210_v1 = vmul.f32 %v910_v0, %v5130_v16  ;;  %v914_v58 = vsub.f32 1.0, %v913_v2  ;;  %v936_v26 = vand.u32 2147483647, %v849_v46 }
 0x1f9   : > { %v807_v4 = vadd.f32 %v799_v61, %v782_v60  ;;  %vm932_vm5 = vweird.f32 %v849_v46  ;;  %v939_v35 = vor.u32 1.1754944e-38, %v938_v29  ;;  %v7557_v0 = vmov 65   ;;  %v5331_v29 = vld [vmem:[%s7552_s7] ss:$0 sm:$0xff] }
 0x1fa   : > { %7677 = vst [vmem:[#allocation20_spill] sm:$0xff] %v5210_v1  ;;  %4033 = vmatmul.msk.f32.gmra.mxu1 %vm7661_vm12, %v5210_v1  ;;  %v915_v6 = vmul.f32 %v4412_v59, %v914_v58  ;;  %vm937_vm7 = vcmp.eq.f32.partialorder %v936_v26, 8.507059e+37  ;;  %v7567_v26 = vmov 77  }
 0x1fb   : > { %v5214_v10 = vadd.f32 %v5075_v15, %v807_v4 }
 0x1fc   : > { %v916_v13 = vadd.f32 %v4412_v59, %v915_v6  ;;  %v7575_v6 = vmov 68  }
 0x1fd   : > { %v4029_v11 = vmul.f32 -1.442695, %v5214_v10  ;;  %v4414_v16 = vpop.eup %4413 }
 0x1fe   : > { %v4416_v15 = vpop.eup %4415  ;;  %v850_v14 = vadd.f32 1.0, %v4414_v16  ;;  %v920_v18 = vsel %vm919_vm2, %v4412_v59, %v916_v13  ;;  %v7585_v16 = vmov 71   ;;  %v7595_v13 = vmov 72  }
 0x1ff   : > { %4417 = vpow2.f32 %v4029_v11  ;;  %v928_v21 = vmul.f32 %v4416_v15, %v849_v46  ;;  %v925_v20 = vsel %vm922_vm3, %v924_v38, %v920_v18  ;;  %vm933_vm4 = vweird.f32 %v4416_v15 }
 0x200   : > { %4419 = vrcp.f32 %v850_v14  ;;  %v5225_v22 = vmul.f32 %v925_v20, %v5154_v42  ;;  %vm934_vm6 = vmor %vm932_vm5, %vm933_vm4  ;;  %v953_v48 = vand.u32 2147483648, %v850_v14  ;;  %v951_v49 = vand.u32 2147483647, %v850_v14 }
 0x201   : > { %v929_v43 = vsub.f32 1.0, %v928_v21  ;;  %vm947_vm9 = vweird.f32 %v850_v14  ;;  %v7589_v11 = vmov 70   ;;  %vm2555_vm2 = vcmask 130048  }
 0x202   : > { %7678 = vst [vmem:[#allocation21_spill] sm:$0xff] %v5225_v22  ;;  %4034 = vmatmul.msk.f32.gmra.mxu1 %vm7661_vm12, %v5225_v22  ;;  %v954_v51 = vor.u32 1.1754944e-38, %v953_v48  ;;  %vm952_vm11 = vcmp.eq.f32.partialorder %v951_v49, 8.507059e+37  ;;  %v7577_v38 = vmov 74   ;;  %v7573_v18 = vmov 75  }
 0x203   : > { %v930_v25 = vmul.f32 %v4416_v15, %v929_v43  ;;  %v7571_v20 = vmov 76   ;;  %v7561_v49 = vmov 79  }
 0x205   : > { %v4418_v28 = vpop.eup %4417  ;;  %v931_v31 = vadd.f32 %v4416_v15, %v930_v25 }
 0x206   : > { %v851_v32 = vadd.f32 1.0, %v4418_v28  ;;  %v4420_v33 = vpop.eup %4419 }
 0x207   : > { %v935_v36 = vsel %vm934_vm6, %v4416_v15, %v931_v31  ;;  %v943_v27 = vmul.f32 %v4420_v33, %v850_v14  ;;  %vm948_vm8 = vweird.f32 %v4420_v33  ;;  %v7579_v15 = vmov 73  }
 0x208   : > { %4421 = vrcp.f32 %v851_v32  ;;  %v940_v42 = vsel %vm937_vm7, %v939_v35, %v935_v36  ;;  %vm949_vm10 = vmor %vm947_vm9, %vm948_vm8  ;;  %v968_v44 = vand.u32 2147483648, %v851_v32  ;;  %v966_v60 = vand.u32 2147483647, %v851_v32 }
 0x209   : > { %v5230_v40 = vmul.f32 %v940_v42, %v5181_v17  ;;  %v944_v45 = vsub.f32 1.0, %v943_v27  ;;  %vm962_vm14 = vweird.f32 %v851_v32  ;;  %v7565_v27 = vmov 78  }
 0x20a   : > { %v969_v57 = vor.u32 1.1754944e-38, %v968_v44  ;;  %vm967_vm0 = vcmp.eq.f32.partialorder %v966_v60, 8.507059e+37 }
 0x20b   : > { %7679 = vst [vmem:[#allocation22_spill] sm:$0xff] %v5230_v40  ;;  %4035 = vmatmul.msk.f32.gmra.mxu1 %vm7661_vm12, %v5230_v40  ;;  %v945_v47 = vmul.f32 %v4420_v33, %v944_v45 }
 0x20d   : > { %v946_v50 = vadd.f32 %v4420_v33, %v945_v47 }
 0x20e   : > { %v4422_v24 = vpop.eup %4421 }
 0x20f   : > { %v958_v56 = vmul.f32 %v4422_v24, %v851_v32  ;;  %v950_v54 = vsel %vm949_vm10, %v4420_v33, %v946_v50  ;;  %vm963_vm13 = vweird.f32 %v4422_v24 }
 0x210   : > { %v955_v55 = vsel %vm952_vm11, %v954_v51, %v950_v54  ;;  %vm964_vm15 = vmor %vm962_vm14, %vm963_vm13 }
 0x211   : > { %v959_v30 = vsub.f32 1.0, %v958_v56  ;;  %v5235_v17 = vmul.f32 %v955_v55, %v5202_v53 }
 0x213   : > { %7680 = vst [vmem:[#allocation23_spill] sm:$0xff] %v5235_v17  ;;  %v960_v59 = vmul.f32 %v4422_v24, %v959_v30  ;;  %4036 = vmatmul.msk.f32.vlgmr.msra.gmra.mxu3 %vm7661_vm12, %v5235_v17 }
 0x215   : > { %v961_v61 = vadd.f32 %v4422_v24, %v960_v59 }
 0x217   : > { %v965_v46 = vsel %vm964_vm15, %v4422_v24, %v961_v61 }
 0x218   : > { %v970_v63 = vsel %vm967_vm0, %v969_v57, %v965_v46 }
 0x219   : > { %v5240_v2 = vmul.f32 %v970_v63, %v5214_v10  ;;  %v7569_v10 = vmov 67  }
 0x21b   : > { %7681 = vst [vmem:[#allocation24_spill] sm:$0xff] %v5240_v2  ;;  %4037 = vmatmul.msk.f32.gmra.mxu3 %vm7661_vm12, %v5240_v2 }
 0x25f   : > { %v5244_v53 = vpop.f32.mrf.mxu1 }
 0x260   : > { %2531 = vrot.lane.b32.xlu2 %v5244_v53, %s4749_s17  ;;  %1501 = vperm.xlu0 %4241, %v5244_v53   ;;  %v1057_v28 = vadd.f32 %v5331_v29, %v5244_v53 }
 0x262   : > { %v1073_v32 = vmin.f32 %v1057_v28, 20.0  ;;  %vm1065_vm4 = vcmp.gt.f32.partialorder %v1057_v28, 20.0 }
 0x264   : > { %v1081_v36 = vmul.f32 1.442695, %v1073_v32 }
 0x266   : > { %4423 = vpow2.f32 %v1081_v36 }
 0x267   : > { %v5249_v4 = vpop.f32.mrf.mxu1 }
 0x268   : > { %4242 = vset.pattern.permute.xlu0 %v7557_v0  ;;  %2533 = vrot.lane.b32.xlu1 %v5249_v4, %s4749_s17 }
 0x269   : > { %1506 = vperm.xlu2 %4257, %v5249_v4   ;;  %1548 = vperm.xlu0 %4242, %v5244_v53  }
 0x26c   : > { %v4424_v24 = vpop.eup %4423 }
 0x26d   : > { %v1097_v51 = vadd.f32 1.0, %v4424_v24  ;;  %v1100_v44 = vmul.f32 -0.5, %v4424_v24  ;;  %v1103_v57 = vand.u32 2147483647, %v4424_v24 }
 0x26f   : > { %v5256_v58 = vpop.f32.mrf.mxu1  ;;  %4425 = vlog2.f32 %v1097_v51  ;;  %v1101_v61 = vadd.f32 1.0, %v1100_v44  ;;  %vm1104_vm3 = vcmp.lt.f32.partialorder %v1103_v57, 0.0004427343 }
 0x270   : > { %1511 = vperm.xlu1 %4273, %v5256_v58  }
 0x271   : > { %4258 = vset.pattern.permute.xlu2 %v7557_v0  ;;  %4243 = vset.pattern.permute.xlu0 %v7563_v5 }
 0x272   : > { %1552 = vperm.xlu2 %4258, %v5249_v4   ;;  %1588 = vperm.xlu0 %4243, %v5244_v53  }
 0x275   : > { %v4426_v59 = vpop.eup %4425 }
 0x277   : > { %v5356_v45 = vpop.f32.mrf.mxu1 }
 0x278   : > { %4274 = vset.pattern.permute.xlu1 %v7557_v0 }
 0x279   : > { %1556 = vperm.xlu1 %4274, %v5256_v58  }
 0x27a   : > { %4259 = vset.pattern.permute.xlu2 %v7563_v5  ;;  %4244 = vset.pattern.permute.xlu0 %v7569_v10 }
 0x27b   : > { %1592 = vperm.xlu2 %4259, %v5249_v4   ;;  %1628 = vperm.xlu0 %4244, %v5244_v53  }
 0x27f   : > { %v5372_v54 = vpop.f32.mrf.mxu1 }
 0x281   : > { %4275 = vset.pattern.permute.xlu1 %v7563_v5 }
 0x282   : > { %1596 = vperm.xlu1 %4275, %v5256_v58  }
 0x283   : > { %4260 = vset.pattern.permute.xlu2 %v7569_v10  ;;  %4245 = vset.pattern.permute.xlu0 %v7575_v6 }
 0x284   : > { %1632 = vperm.xlu2 %4260, %v5249_v4   ;;  %1668 = vperm.xlu0 %4245, %v5244_v53  }
 0x288   : > { %v5387_v46 = vpop.f32.mrf.mxu1 }
 0x289   : > { %7693 = vst [vmem:[#allocation36_spill] sm:$0xff] %v5387_v46 }
 0x28a   : > { %4276 = vset.pattern.permute.xlu1 %v7569_v10 }
 0x28b   : > { %1636 = vperm.xlu1 %4276, %v5256_v58  }
 0x28c   : > { %4261 = vset.pattern.permute.xlu2 %v7575_v6  ;;  %4246 = vset.pattern.permute.xlu0 %v7581_v23 }
 0x28d   : > { %1672 = vperm.xlu2 %4261, %v5249_v4   ;;  %1708 = vperm.xlu0 %4246, %v5244_v53  }
 0x293   : > { %4277 = vset.pattern.permute.xlu1 %v7575_v6 }
 0x294   : > { %1676 = vperm.xlu1 %4277, %v5256_v58  }
 0x295   : > { %4262 = vset.pattern.permute.xlu2 %v7581_v23  ;;  %4247 = vset.pattern.permute.xlu0 %v7589_v11 }
 0x296   : > { %1712 = vperm.xlu2 %4262, %v5249_v4   ;;  %1748 = vperm.xlu0 %4247, %v5244_v53  }
 0x29c   : > { %4278 = vset.pattern.permute.xlu1 %v7581_v23 }
 0x29d   : > { %1716 = vperm.xlu1 %4278, %v5256_v58  }
 0x29e   : > { %4263 = vset.pattern.permute.xlu2 %v7589_v11  ;;  %4248 = vset.pattern.permute.xlu0 %v7585_v16 }
 0x29f   : > { %1752 = vperm.xlu2 %4263, %v5249_v4   ;;  %1788 = vperm.xlu0 %4248, %v5244_v53  }
 0x2a5   : > { %4279 = vset.pattern.permute.xlu1 %v7589_v11 }
 0x2a6   : > { %1756 = vperm.xlu1 %4279, %v5256_v58  }
 0x2a7   : > { %4264 = vset.pattern.permute.xlu2 %v7585_v16  ;;  %4249 = vset.pattern.permute.xlu0 %v7595_v13 }
 0x2a8   : > { %1792 = vperm.xlu2 %4264, %v5249_v4   ;;  %1828 = vperm.xlu0 %4249, %v5244_v53  }
 0x2ae   : > { %4280 = vset.pattern.permute.xlu1 %v7585_v16 }
 0x2af   : > { %1796 = vperm.xlu1 %4280, %v5256_v58  }
 0x2b0   : > { %4265 = vset.pattern.permute.xlu2 %v7595_v13  ;;  %4250 = vset.pattern.permute.xlu0 %v7579_v15 }
 0x2b1   : > { %1832 = vperm.xlu2 %4265, %v5249_v4   ;;  %1868 = vperm.xlu0 %4250, %v5244_v53  }
 0x2b7   : > { %4281 = vset.pattern.permute.xlu1 %v7595_v13 }
 0x2b8   : > { %1836 = vperm.xlu1 %4281, %v5256_v58  }
 0x2b9   : > { %4266 = vset.pattern.permute.xlu2 %v7579_v15  ;;  %4251 = vset.pattern.permute.xlu0 %v7577_v38 }
 0x2ba   : > { %1872 = vperm.xlu2 %4266, %v5249_v4   ;;  %v2532_v14 = vpop.permute.xlu2 %2531  ;;  %1908 = vperm.xlu0 %4251, %v5244_v53  }
 0x2bb   : > { %2556 = vst.msk [vmem:[#allocation7] sm:$0xff] %vm2555_vm2, %v2532_v14  ;;  %v1102_v14 = vmul.f32 %v4424_v24, %v1101_v61 }
 0x2c0   : > { %4282 = vset.pattern.permute.xlu1 %v7579_v15 }
 0x2c1   : > { %1876 = vperm.xlu1 %4282, %v5256_v58  }
 0x2c2   : > { %4267 = vset.pattern.permute.xlu2 %v7577_v38  ;;  %4252 = vset.pattern.permute.xlu0 %v7573_v18 }
 0x2c3   : > { %1912 = vperm.xlu2 %4267, %v5249_v4   ;;  %v5317_v21 = vpop.permute.xlu2 %1506  ;;  %1948 = vperm.xlu0 %4252, %v5244_v53  }
 0x2c4   : > { %7682 = vst [vmem:[#allocation25_spill] sm:$0xff] %v5317_v21 }
 0x2c9   : > { %4283 = vset.pattern.permute.xlu1 %v7577_v38 }
 0x2ca   : > { %1916 = vperm.xlu1 %4283, %v5256_v58  }
 0x2cb   : > { %4268 = vset.pattern.permute.xlu2 %v7573_v18  ;;  %4253 = vset.pattern.permute.xlu0 %v7571_v20 }
 0x2cc   : > { %1952 = vperm.xlu2 %4268, %v5249_v4   ;;  %v5325_v43 = vpop.permute.xlu2 %1552  ;;  %1988 = vperm.xlu0 %4253, %v5244_v53  }
 0x2cd   : > { %7683 = vst [vmem:[#allocation26_spill] sm:$0xff] %v5325_v43 }
 0x2d2   : > { %4284 = vset.pattern.permute.xlu1 %v7573_v18  ;;  %v5334_v25 = vpop.permute.xlu0 %1501 }
 0x2d3   : > { %7684 = vst [vmem:[#allocation27_spill] sm:$0xff] %v5334_v25  ;;  %1956 = vperm.xlu1 %4284, %v5256_v58  }
 0x2d4   : > { %4269 = vset.pattern.permute.xlu2 %v7571_v20  ;;  %4254 = vset.pattern.permute.xlu0 %v7567_v26 }
 0x2d5   : > { %1992 = vperm.xlu2 %4269, %v5249_v4   ;;  %v5342_v31 = vpop.permute.xlu2 %1592  ;;  %2028 = vperm.xlu0 %4254, %v5244_v53  }
 0x2d6   : > { %7685 = vst [vmem:[#allocation28_spill] sm:$0xff] %v5342_v31 }
 0x2da   : > { %v2534_v33 = vpop.permute.xlu1 %2533 }
 0x2db   : > { %2557 = vst.msk [vmem:[#allocation7 + $0x8] sm:$0xff] %vm2555_vm2, %v2534_v33  ;;  %4285 = vset.pattern.permute.xlu1 %v7571_v20  ;;  %v5347_v35 = vpop.permute.xlu0 %1548 }
 0x2dc   : > { %1996 = vperm.xlu1 %4285, %v5256_v58  }
 0x2dd   : > { %4270 = vset.pattern.permute.xlu2 %v7567_v26  ;;  %4255 = vset.pattern.permute.xlu0 %v7565_v27 }
 0x2de   : > { %2032 = vperm.xlu2 %4270, %v5249_v4   ;;  %v5353_v42 = vpop.permute.xlu2 %1632  ;;  %2068 = vperm.xlu0 %4255, %v5244_v53  }
 0x2e2   : > { %v5358_v48 = vpop.permute.xlu1 %1511 }
 0x2e3   : > { %7686 = vst [vmem:[#allocation29_spill] sm:$0xff] %v5358_v48 }
 0x2e4   : > { %4286 = vset.pattern.permute.xlu1 %v7567_v26  ;;  %v5361_v47 = vpop.permute.xlu0 %1588 }
 0x2e5   : > { %7687 = vst [vmem:[#allocation30_spill] sm:$0xff] %v5361_v47  ;;  %2036 = vperm.xlu1 %4286, %v5256_v58  }
 0x2e6   : > { %4271 = vset.pattern.permute.xlu2 %v7565_v27  ;;  %4256 = vset.pattern.permute.xlu0 %v7561_v49 }
 0x2e7   : > { %2072 = vperm.xlu2 %4271, %v5249_v4   ;;  %v5367_v50 = vpop.permute.xlu2 %1672  ;;  %2108 = vperm.xlu0 %4256, %v5244_v53   ;;  %v1099_v53 = vmul.f32 0.6931472, %v4426_v59 }
 0x2e8   : > { %7688 = vst [vmem:[#allocation31_spill] sm:$0xff] %v5367_v50 }
 0x2e9   : > { %v1105_v33 = vsel %vm1104_vm3, %v1102_v14, %v1099_v53 }
 0x2ea   : > { %v5400_v51 = vsel %vm1065_vm4, %v1057_v28, %v1105_v33 }
 0x2eb   : > { %v5370_v56 = vpop.permute.xlu1 %1556 }
 0x2ec   : > { %7689 = vst [vmem:[#allocation32_spill] sm:$0xff] %v5370_v56 }
 0x2ed   : > { %4287 = vset.pattern.permute.xlu1 %v7565_v27  ;;  %v5375_v55 = vpop.permute.xlu0 %1628 }
 0x2ee   : > { %7690 = vst [vmem:[#allocation33_spill] sm:$0xff] %v5375_v55  ;;  %2076 = vperm.xlu1 %4287, %v5256_v58  }
 0x2ef   : > { %4272 = vset.pattern.permute.xlu2 %v7561_v49  ;;  %2535 = vrot.lane.b32.xlu0 %v5256_v58, %s4749_s17 }
 0x2f0   : > { %2112 = vperm.xlu2 %4272, %v5249_v4   ;;  %v5382_v30 = vpop.permute.xlu2 %1712  ;;  %4321 = vset.pattern.permute.xlu0 %v7559_v12 }
 0x2f1   : > { %7691 = vst [vmem:[#allocation34_spill] sm:$0xff] %v5382_v30 }
 0x2f4   : > { %v5385_v60 = vpop.permute.xlu1 %1596 }
 0x2f5   : > { %7692 = vst [vmem:[#allocation35_spill] sm:$0xff] %v5385_v60 }
 0x2f6   : > { %4288 = vset.pattern.permute.xlu1 %v7561_v49  ;;  %v5390_v63 = vpop.permute.xlu0 %1668 }
 0x2f7   : > { %7694 = vst [vmem:[#allocation37_spill] sm:$0xff] %v5390_v63  ;;  %2116 = vperm.xlu1 %4288, %v5256_v58   ;;  %1526 = vperm.xlu0 %4321, %v5387_v46  }
 0x2f8   : > { %4289 = vset.pattern.permute.xlu2 %v7559_v12 }
 0x2f9   : > { %v5395_v32 = vpop.permute.xlu2 %1752  ;;  %1516 = vperm.xlu2 %4289, %v5356_v45  }
 0x2fa   : > { %7695 = vst [vmem:[#allocation38_spill] sm:$0xff] %v5395_v32  ;;  %v5552_v32 = vadd.f32 %v5331_v29, %v5249_v4 }
 0x2fc   : > { %vm1066_vm10 = vcmp.gt.f32.partialorder %v5552_v32, 20.0 }
 0x2fd   : > { %v5398_v36 = vpop.permute.xlu1 %1636 }
 0x2fe   : > { %7696 = vst [vmem:[#allocation39_spill] sm:$0xff] %v5398_v36 }
 0x2ff   : > { %1185 = vrot.lane.b32.xlu1 %v5400_v51, %s4765_s25  ;;  %4322 = vset.pattern.permute.xlu0 %v7557_v0  ;;  %v5405_v44 = vpop.permute.xlu0 %1708 }
 0x300   : > { %7697 = vst [vmem:[#allocation40_spill] sm:$0xff] %v5405_v44  ;;  %1568 = vperm.xlu0 %4322, %v5387_v46   ;;  %4305 = vset.pattern.permute.xlu1 %v7559_v12 }
 0x301   : > { %4290 = vset.pattern.permute.xlu2 %v7557_v0 }
 0x302   : > { %v5410_v24 = vpop.permute.xlu2 %1792  ;;  %1560 = vperm.xlu2 %4290, %v5356_v45  }
 0x303   : > { %7698 = vst [vmem:[#allocation41_spill] sm:$0xff] %v5410_v24 }
 0x306   : > { %v5413_v28 = vpop.permute.xlu1 %1676 }
 0x307   : > { %7699 = vst [vmem:[#allocation42_spill] sm:$0xff] %v5413_v28  ;;  %1521 = vperm.xlu1 %4305, %v5372_v54  }
 0x308   : > { %4323 = vset.pattern.permute.xlu0 %v7563_v5  ;;  %v5417_v59 = vpop.permute.xlu0 %1748 }
 0x309   : > { %7700 = vst [vmem:[#allocation43_spill] sm:$0xff] %v5417_v59  ;;  %1608 = vperm.xlu0 %4323, %v5387_v46  }
 0x30a   : > { %4291 = vset.pattern.permute.xlu2 %v7563_v5 }
 0x30b   : > { %v5421_v61 = vpop.permute.xlu2 %1832  ;;  %1600 = vperm.xlu2 %4291, %v5356_v45  }
 0x30c   : > { %7701 = vst [vmem:[#allocation44_spill] sm:$0xff] %v5421_v61 }
 0x30f   : > { %v5424_v57 = vpop.permute.xlu1 %1716  ;;  %4306 = vset.pattern.permute.xlu1 %v7557_v0 }
 0x310   : > { %1564 = vperm.xlu1 %4306, %v5372_v54  }
 0x311   : > { %4324 = vset.pattern.permute.xlu0 %v7569_v10  ;;  %v5429_v53 = vpop.permute.xlu0 %1788 }
 0x312   : > { %1648 = vperm.xlu0 %4324, %v5387_v46  }
 0x313   : > { %4292 = vset.pattern.permute.xlu2 %v7569_v10 }
 0x314   : > { %v5433_v14 = vpop.permute.xlu2 %1872  ;;  %1640 = vperm.xlu2 %4292, %v5356_v45  }
 0x318   : > { %v5436_v33 = vpop.permute.xlu1 %1756  ;;  %4307 = vset.pattern.permute.xlu1 %v7563_v5 }
 0x319   : > { %7702 = vst [vmem:[#allocation45_spill] sm:$0xff] %v5436_v33  ;;  %1604 = vperm.xlu1 %4307, %v5372_v54  }
 0x31a   : > { %4325 = vset.pattern.permute.xlu0 %v7575_v6  ;;  %v5441_v0 = vpop.permute.xlu0 %1828 }
 0x31b   : > { %7703 = vst [vmem:[#allocation46_spill] sm:$0xff] %v5441_v0  ;;  %1688 = vperm.xlu0 %4325, %v5387_v46  }
 0x31c   : > { %4293 = vset.pattern.permute.xlu2 %v7575_v6 }
 0x31d   : > { %v5445_v12 = vpop.permute.xlu2 %1912  ;;  %1680 = vperm.xlu2 %4293, %v5356_v45  }
 0x31e   : > { %7704 = vst [vmem:[#allocation47_spill] sm:$0xff] %v5445_v12  ;;  %v5530_v12 = vadd.f32 %v5331_v29, %v5256_v58 }
 0x320   : > { %vm1067_vm6 = vcmp.gt.f32.partialorder %v5530_v12, 20.0 }
 0x321   : > { %v5448_v49 = vpop.permute.xlu1 %1796  ;;  %4308 = vset.pattern.permute.xlu1 %v7569_v10 }
 0x322   : > { %7705 = vst [vmem:[#allocation48_spill] sm:$0xff] %v5448_v49  ;;  %1644 = vperm.xlu1 %4308, %v5372_v54  }
 0x323   : > { %4326 = vset.pattern.permute.xlu0 %v7581_v23  ;;  %v5453_v5 = vpop.permute.xlu0 %1868 }
 0x324   : > { %7706 = vst [vmem:[#allocation49_spill] sm:$0xff] %v5453_v5  ;;  %1728 = vperm.xlu0 %4326, %v5387_v46  }
 0x325   : > { %4294 = vset.pattern.permute.xlu2 %v7581_v23 }
 0x326   : > { %v5457_v27 = vpop.permute.xlu2 %1952  ;;  %1720 = vperm.xlu2 %4294, %v5356_v45  }
 0x327   : > { %7707 = vst [vmem:[#allocation50_spill] sm:$0xff] %v5457_v27 }
 0x32a   : > { %v5460_v26 = vpop.permute.xlu1 %1836  ;;  %4309 = vset.pattern.permute.xlu1 %v7575_v6 }
 0x32b   : > { %7708 = vst [vmem:[#allocation51_spill] sm:$0xff] %v5460_v26  ;;  %1684 = vperm.xlu1 %4309, %v5372_v54   ;;  %v5538_v26 = vadd.f32 %v5331_v29, %v5387_v46 }
 0x32c   : > { %4327 = vset.pattern.permute.xlu0 %v7589_v11  ;;  %v5465_v10 = vpop.permute.xlu0 %1908 }
 0x32d   : > { %7709 = vst [vmem:[#allocation52_spill] sm:$0xff] %v5465_v10  ;;  %1768 = vperm.xlu0 %4327, %v5387_v46   ;;  %v1078_v0 = vmin.f32 %v5538_v26, 20.0  ;;  %v5559_v10 = vadd.f32 %v5331_v29, %v5356_v45  ;;  %vm1070_vm9 = vcmp.gt.f32.partialorder %v5538_v26, 20.0 }
 0x32e   : > { %4295 = vset.pattern.permute.xlu2 %v7589_v11 }
 0x32f   : > { %v5469_v20 = vpop.permute.xlu2 %1992  ;;  %1760 = vperm.xlu2 %4295, %v5356_v45   ;;  %v1076_v4 = vmin.f32 %v5559_v10, 20.0  ;;  %vm1068_vm13 = vcmp.gt.f32.partialorder %v5559_v10, 20.0 }
 0x330   : > { %7710 = vst [vmem:[#allocation53_spill] sm:$0xff] %v5469_v20  ;;  %v7728_v20 = vmov 76  }
 0x331   : > { %v1087_v2 = vmul.f32 1.442695, %v1076_v4 }
 0x333   : > { %v5472_v18 = vpop.permute.xlu1 %1876  ;;  %4310 = vset.pattern.permute.xlu1 %v7581_v23 }
 0x334   : > { %7711 = vst [vmem:[#allocation54_spill] sm:$0xff] %v5472_v18  ;;  %1724 = vperm.xlu1 %4310, %v5372_v54  }
 0x335   : > { %4328 = vset.pattern.permute.xlu0 %v7585_v16  ;;  %v5477_v6 = vpop.permute.xlu0 %1948 }
 0x336   : > { %7712 = vst [vmem:[#allocation55_spill] sm:$0xff] %v5477_v6  ;;  %1808 = vperm.xlu0 %4328, %v5387_v46  }
 0x337   : > { %4296 = vset.pattern.permute.xlu2 %v7585_v16 }
 0x338   : > { %v5481_v38 = vpop.permute.xlu2 %2032  ;;  %1800 = vperm.xlu2 %4296, %v5356_v45  }
 0x339   : > { %7713 = vst [vmem:[#allocation56_spill] sm:$0xff] %v5481_v38 }
 0x33c   : > { %v5484_v15 = vpop.permute.xlu1 %1916  ;;  %4311 = vset.pattern.permute.xlu1 %v7589_v11  ;;  %v7718_v11 = vmov 73  }
 0x33d   : > { %7714 = vst [vmem:[#allocation57_spill] sm:$0xff] %v5484_v15  ;;  %1764 = vperm.xlu1 %4311, %v5372_v54  }
 0x33e   : > { %4329 = vset.pattern.permute.xlu0 %v7595_v13  ;;  %v5489_v23 = vpop.permute.xlu0 %1988 }
 0x33f   : > { %7715 = vst [vmem:[#allocation58_spill] sm:$0xff] %v5489_v23  ;;  %1848 = vperm.xlu0 %4329, %v5387_v46  }
 0x340   : > { %4297 = vset.pattern.permute.xlu2 %v7595_v13 }
 0x341   : > { %v5493_v8 = vpop.permute.xlu2 %2072  ;;  %1840 = vperm.xlu2 %4297, %v5356_v45  }
 0x342   : > { %7716 = vst [vmem:[#allocation59_spill] sm:$0xff] %v5493_v8 }
 0x345   : > { %v5496_v16 = vpop.permute.xlu1 %1956  ;;  %4312 = vset.pattern.permute.xlu1 %v7717_v52 }
 0x346   : > { %1804 = vperm.xlu1 %4312, %v5372_v54  }
 0x347   : > { %4330 = vset.pattern.permute.xlu0 %v7718_v11  ;;  %v5501_v37 = vpop.permute.xlu0 %2028 }
 0x348   : > { %1888 = vperm.xlu0 %4330, %v5387_v46  }
 0x349   : > { %4298 = vset.pattern.permute.xlu2 %v7718_v11 }
 0x34a   : > { %v5505_v7 = vpop.permute.xlu2 %2112  ;;  %1880 = vperm.xlu2 %4298, %v5356_v45  }
 0x34e   : > { %v5508_v13 = vpop.permute.xlu1 %1996  ;;  %4313 = vset.pattern.permute.xlu1 %v7720_v34 }
 0x34f   : > { %7719 = vst [vmem:[#allocation60_spill] sm:$0xff] %v5508_v13  ;;  %1844 = vperm.xlu1 %4313, %v5372_v54   ;;  %v7725_v13 = vmov 75  }
 0x350   : > { %4331 = vset.pattern.permute.xlu0 %v7721_v3  ;;  %v5513_v19 = vpop.permute.xlu0 %2068 }
 0x351   : > { %7722 = vst [vmem:[#allocation61_spill] sm:$0xff] %v5513_v19  ;;  %1928 = vperm.xlu0 %4331, %v5387_v46   ;;  %v1075_v19 = vmin.f32 %v5530_v12, 20.0 }
 0x352   : > { %4299 = vset.pattern.permute.xlu2 %v7721_v3 }
 0x353   : > { %1920 = vperm.xlu2 %4299, %v5356_v45   ;;  %v5518_v62 = vpop.permute.xlu2 %1516  ;;  %v1085_v47 = vmul.f32 1.442695, %v1075_v19  ;;  %v1074_v19 = vmin.f32 %v5552_v32, 20.0 }
 0x354   : > { %7723 = vst [vmem:[#allocation62_spill] sm:$0xff] %v5518_v62 }
 0x355   : > { %4427 = vpow2.f32 %v1085_v47  ;;  %v1217_v47 = vld [vmem:[%s7553_s8] sm:$0xff] }
 0x356   : > { %v5584_v49 = vperm.slane %v1217_v47, 1  ;;  %v5586_v18 = vperm.slane %v1217_v47, 2  ;;  %v5588_v56 = vperm.slane %v1217_v47, 3  ;;  %v5593_v27 = vperm.slane %v1217_v47, 5 }
 0x357   : > { %v5520_v33 = vpop.permute.xlu1 %2036  ;;  %4314 = vset.pattern.permute.xlu1 %v7718_v11  ;;  %v5595_v4 = vperm.slane %v1217_v47, 6  ;;  %v5598_v30 = vperm.slane %v1217_v47, 7 }
 0x358   : > { %7724 = vst [vmem:[#allocation63_spill] sm:$0xff] %v5520_v33  ;;  %1884 = vperm.xlu1 %4314, %v5372_v54  }
 0x359   : > { %4332 = vset.pattern.permute.xlu0 %v7725_v13  ;;  %v5525_v48 = vpop.permute.xlu0 %2108 }
 0x35a   : > { %7726 = vst [vmem:[#allocation64_spill] sm:$0xff] %v5525_v48  ;;  %1968 = vperm.xlu0 %4332, %v5387_v46  }
 0x35b   : > { %4300 = vset.pattern.permute.xlu2 %v7725_v13 }
 0x35c   : > { %1960 = vperm.xlu2 %4300, %v5356_v45   ;;  %v5534_v50 = vpop.permute.xlu2 %1560 }
 0x360   : > { %v5541_v60 = vpop.permute.xlu1 %2076  ;;  %4315 = vset.pattern.permute.xlu1 %v7721_v3 }
 0x361   : > { %7727 = vst [vmem:[#allocation65_spill] sm:$0xff] %v5541_v60  ;;  %1924 = vperm.xlu1 %4315, %v5372_v54   ;;  %v2536_v58 = vpop.permute.xlu0 %2535  ;;  %v1091_v60 = vmul.f32 1.442695, %v1078_v0  ;;  %v7732_v0 = vmov 77  }
 0x362   : > { %2558 = vst.msk [vmem:[#allocation7 + $0x10] sm:$0xff] %vm2555_vm2, %v2536_v58  ;;  %4333 = vset.pattern.permute.xlu0 %v7728_v20 }
 0x363   : > { %2008 = vperm.xlu0 %4333, %v5387_v46   ;;  %4429 = vpow2.f32 %v1091_v60  ;;  %v1083_v60 = vmul.f32 1.442695, %v1074_v19  ;;  %v5591_v19 = vperm.slane %v1217_v47, 4 }
 0x364   : > { %4301 = vset.pattern.permute.xlu2 %v7728_v20 }
 0x365   : > { %2000 = vperm.xlu2 %4301, %v5356_v45   ;;  %v5555_v21 = vpop.permute.xlu2 %1600  ;;  %4431 = vpow2.f32 %v1083_v60 }
 0x366   : > { %7729 = vst [vmem:[#allocation66_spill] sm:$0xff] %v5555_v21  ;;  %v5574_v21 = vpop.eup %4427  ;;  %4433 = vpow2.f32 %v1087_v2  ;;  %v5612_v2 = vadd.f32 %v5331_v29, %v5372_v54 }
 0x367   : > { %v1115_v36 = vadd.f32 1.0, %v5574_v21 }
 0x368   : > { %vm1069_vm15 = vcmp.gt.f32.partialorder %v5612_v2, 20.0 }
 0x369   : > { %v5562_v58 = vpop.permute.xlu1 %2116  ;;  %4316 = vset.pattern.permute.xlu1 %v7725_v13  ;;  %v5565_v63 = vpop.permute.xlu0 %1526  ;;  %4435 = vlog2.f32 %v1115_v36 }
 0x36a   : > { %7730 = vst [vmem:[#allocation67_spill] sm:$0xff] %v5562_v58  ;;  %1964 = vperm.xlu1 %4316, %v5372_v54   ;;  %v5580_v33 = vpop.eup %4429  ;;  %v5582_v58 = vperm.slane %v1217_v47, 0 }
 0x36b   : > { %7731 = vst [vmem:[#allocation68_spill] sm:$0xff] %v5565_v63  ;;  %4334 = vset.pattern.permute.xlu0 %v7732_v0  ;;  %v1142_v38 = vadd.f32 1.0, %v5580_v33  ;;  %v5621_v8 = vpop.eup %4431 }
 0x36c   : > { %2048 = vperm.xlu0 %4334, %v5387_v46   ;;  %v5626_v17 = vpop.eup %4433 }
 0x36d   : > { %4302 = vset.pattern.permute.xlu2 %v7732_v0  ;;  %4437 = vlog2.f32 %v1142_v38 }
 0x36e   : > { %2040 = vperm.xlu2 %4302, %v5356_v45   ;;  %v5578_v63 = vpop.permute.xlu2 %1640 }
 0x36f   : > { %7733 = vst [vmem:[#allocation69_spill] sm:$0xff] %v5578_v63 }
 0x371   : > { %v1186_v63 = vpop.permute.xlu1 %1185 }
 0x372   : > { %v1209_v24 = vsel %vm7661_vm12, %v5400_v51, %v1186_v63  ;;  %4317 = vset.pattern.permute.xlu1 %v7728_v20  ;;  %v5603_v48 = vpop.permute.xlu0 %1568 }
 0x373   : > { %7734 = vst [vmem:[#allocation70_spill] sm:$0xff] %v5603_v48  ;;  %v1235_v62 = vmul.f32 %v5582_v58, %v1209_v24  ;;  %v1236_v43 = vmul.f32 %v5584_v49, %v1209_v24  ;;  %v1237_v60 = vmul.f32 %v5586_v18, %v1209_v24  ;;  %v1238_v5 = vmul.f32 %v5588_v56, %v1209_v24 }
 0x374   : > { %2004 = vperm.xlu1 %4317, %v5372_v54   ;;  %v1239_v63 = vmul.f32 %v5591_v19, %v1209_v24  ;;  %v1240_v47 = vmul.f32 %v5593_v27, %v1209_v24  ;;  %v7735_v48 = vmov 78   ;;  %v1241_v15 = vmul.f32 %v5595_v4, %v1209_v24 }
 0x375   : > { %4335 = vset.pattern.permute.xlu0 %v7735_v48  ;;  %v1299_v6 = vmul.f32 1.442695, %v1235_v62  ;;  %v1301_v55 = vmul.f32 1.442695, %v1236_v43  ;;  %v1303_v28 = vmul.f32 1.442695, %v1237_v60  ;;  %v1242_v36 = vmul.f32 %v5598_v30, %v1209_v24  ;;  %v4436_v60 = vpop.eup %4435 }
 0x376   : > { %2088 = vperm.xlu0 %4335, %v5387_v46   ;;  %v1305_v44 = vmul.f32 1.442695, %v1238_v5  ;;  %4303 = vset.pattern.permute.xlu2 %v7735_v48  ;;  %v1307_v61 = vmul.f32 1.442695, %v1239_v63  ;;  %v1118_v62 = vmul.f32 -0.5, %v5574_v21  ;;  %v1077_v43 = vmin.f32 %v5612_v2, 20.0  ;;  %v4438_v23 = vpop.eup %4437 }
 0x377   : > { %4439 = vpow2.f32 %v1299_v6  ;;  %2080 = vperm.xlu2 %4303, %v5356_v45   ;;  %v5624_v31 = vpop.permute.xlu2 %1680  ;;  %v1309_v38 = vmul.f32 1.442695, %v1240_v47  ;;  %v1311_v5 = vmul.f32 1.442695, %v1241_v15  ;;  %v1313_v6 = vmul.f32 1.442695, %v1242_v36 }
 0x378   : > { %7736 = vst [vmem:[#allocation71_spill] sm:$0xff] %v5624_v31  ;;  %4441 = vpow2.f32 %v1301_v55  ;;  %v1106_v63 = vadd.f32 1.0, %v5621_v8  ;;  %v1119_v59 = vadd.f32 1.0, %v1118_v62  ;;  %v1089_v25 = vmul.f32 1.442695, %v1077_v43 }
 0x379   : > { %4443 = vpow2.f32 %v1303_v28  ;;  %v5630_v24 = vpop.permute.xlu1 %1521  ;;  %v1121_v15 = vand.u32 2147483647, %v5574_v21  ;;  %v7739_v28 = vmov 79   ;;  %v1117_v47 = vmul.f32 0.6931472, %v4436_v60 }
 0x37a   : > { %7737 = vst [vmem:[#allocation72_spill] sm:$0xff] %v5630_v24  ;;  %4445 = vpow2.f32 %v1305_v44  ;;  %v1120_v62 = vmul.f32 %v5574_v21, %v1119_v59  ;;  %v1145_v43 = vmul.f32 -0.5, %v5580_v33 }
 0x37b   : > { %4447 = vpow2.f32 %v1307_v61  ;;  %v5634_v31 = vpop.permute.xlu0 %1608  ;;  %vm5646_vm5 = vcmp.lt.f32.partialorder %v1121_v15, 0.0004427343 }
 0x37c   : > { %4318 = vset.pattern.permute.xlu1 %v7732_v0  ;;  %7738 = vst [vmem:[#allocation73_spill] sm:$0xff] %v5634_v31  ;;  %4449 = vpow2.f32 %v1309_v38  ;;  %v1123_v21 = vsel %vm5646_vm5, %v1120_v62, %v1117_v47  ;;  %v1146_v15 = vadd.f32 1.0, %v1145_v43  ;;  %v1148_v47 = vand.u32 2147483647, %v5580_v33 }
 0x37d   : > { %2044 = vperm.xlu1 %4318, %v5372_v54   ;;  %v4440_v55 = vpop.eup %4439  ;;  %4451 = vpow2.f32 %v1311_v5  ;;  %v5661_v60 = vsel %vm1067_vm6, %v5530_v12, %v1123_v21  ;;  %v1112_v43 = vand.u32 2147483647, %v5621_v8 }
 0x37e   : > { %4336 = vset.pattern.permute.xlu0 %v7739_v28  ;;  %v4442_v44 = vpop.eup %4441  ;;  %4453 = vpow2.f32 %v1313_v6  ;;  %1427 = vst [vmem:[#allocation5] sm:$0xff] %v4440_v55  ;;  %v1124_v55 = vadd.f32 1.0, %v5626_v17  ;;  %v1147_v31 = vmul.f32 %v5580_v33, %v1146_v15  ;;  %vm1149_vm7 = vcmp.lt.f32.partialorder %v1148_v47, 0.0004427343 }
 0x37f   : > { %2128 = vperm.xlu0 %4336, %v5387_v46   ;;  %v4444_v61 = vpop.eup %4443  ;;  %4455 = vlog2.f32 %v1106_v63  ;;  %1428 = vst [vmem:[#allocation5 + $0x8] sm:$0xff] %v4442_v44  ;;  %4304 = vset.pattern.permute.xlu2 %v7739_v28  ;;  %v1109_v63 = vmul.f32 -0.5, %v5621_v8  ;;  %vm1113_vm8 = vcmp.lt.f32.partialorder %v1112_v43, 0.0004427343 }
 0x380   : > { %v4446_v36 = vpop.eup %4445  ;;  %4457 = vpow2.f32 %v1089_v25  ;;  %1429 = vst [vmem:[#allocation5 + $0x10] sm:$0xff] %v4444_v61  ;;  %2120 = vperm.xlu2 %4304, %v5356_v45   ;;  %v5644_v38 = vpop.permute.xlu2 %1720 }
 0x381   : > { %v4448_v5 = vpop.eup %4447  ;;  %1430 = vst [vmem:[#allocation5 + $0x18] sm:$0xff] %v4446_v36  ;;  %4459 = vlog2.f32 %v1124_v55 }
 0x382   : > { %v4450_v6 = vpop.eup %4449  ;;  %1431 = vst [vmem:[#allocation5 + $0x20] sm:$0xff] %v4448_v5  ;;  %v5653_v25 = vpop.permute.xlu1 %1564  ;;  %v1110_v5 = vadd.f32 1.0, %v1109_v63  ;;  %v1127_v63 = vmul.f32 -0.5, %v5626_v17 }
 0x383   : > { %v4452_v59 = vpop.eup %4451  ;;  %1432 = vst [vmem:[#allocation5 + $0x28] sm:$0xff] %v4450_v6  ;;  %v1144_v6 = vmul.f32 0.6931472, %v4438_v23 }
 0x384   : > { %v4454_v44 = vpop.eup %4453  ;;  %1433 = vst [vmem:[#allocation5 + $0x30] sm:$0xff] %v4452_v59  ;;  %v5658_v61 = vpop.permute.xlu0 %1648  ;;  %v1111_v23 = vmul.f32 %v5621_v8, %v1110_v5  ;;  %v1128_v8 = vadd.f32 1.0, %v1127_v63 }
 0x385   : > { %4319 = vset.pattern.permute.xlu1 %v7735_v48  ;;  %7742 = vst [vmem:[#allocation74_spill] sm:$0xff] %v5658_v61  ;;  %v4456_v36 = vpop.eup %4455  ;;  %v1150_v24 = vsel %vm1149_vm7, %v1147_v31, %v1144_v6 }
 0x386   : > { %1434 = vst [vmem:[#allocation5 + $0x38] sm:$0xff] %v4454_v44  ;;  %2084 = vperm.xlu1 %4319, %v5372_v54   ;;  %v4458_v62 = vpop.eup %4457  ;;  %v1108_v59 = vmul.f32 0.6931472, %v4456_v36  ;;  %v7743_v44 = vmov 64   ;;  %v1130_v36 = vand.u32 2147483647, %v5626_v17  ;;  %v1129_v5 = vmul.f32 %v5626_v17, %v1128_v8  ;;  %v5718_v8 = vpop.f32.mrf.mxu3 }
 0x387   : > { %1189 = vrot.lane.b32.xlu0 %v5661_v60, %s4765_s25  ;;  %v1133_v12 = vadd.f32 1.0, %v4458_v62  ;;  %v4460_v33 = vpop.eup %4459  ;;  %v1139_v63 = vand.u32 2147483647, %v4458_v62 }
 0x388   : > { %2537 = vrot.lane.b32.xlu2 %v5356_v45, %s4749_s17  ;;  %v1114_v55 = vsel %vm1113_vm8, %v1111_v23, %v1108_v59  ;;  %v5680_v45 = vsel %vm1070_vm9, %v5538_v26, %v1150_v24  ;;  %v1126_v47 = vmul.f32 0.6931472, %v4460_v33  ;;  %v1136_v26 = vmul.f32 -0.5, %v4458_v62 }
 0x389   : > { %v5671_v21 = vpop.permute.xlu2 %1760  ;;  %4337 = vset.pattern.permute.xlu2 %v7743_v44  ;;  %4461 = vlog2.f32 %v1133_v12  ;;  %v5690_v31 = vsel %vm1066_vm10, %v5552_v32, %v1114_v55  ;;  %v5697_v24 = vmul.f32 %v5400_v51, %v5142_v39  ;;  %vm1131_vm11 = vcmp.lt.f32.partialorder %v1130_v36, 0.0004427343 }
 0x38a   : > { %v1132_v59 = vsel %vm1131_vm11, %v1129_v5, %v1126_v47  ;;  %v1137_v32 = vadd.f32 1.0, %v1136_v26  ;;  %vm1140_vm14 = vcmp.lt.f32.partialorder %v1139_v63, 0.0004427343  ;;  %v7748_v5 = vmov 65  }
 0x38b   : > { %v5676_v46 = vpop.permute.xlu1 %1604  ;;  %v1579_v12 = vmul.f32 %v5347_v35, %v5697_v24  ;;  %v5713_v51 = vsel %vm1068_vm13, %v5559_v10, %v1132_v59  ;;  %v5752_v59 = vmul.f32 %v5690_v31, %v5167_v9  ;;  %v7752_v63 = vmov 66  }
 0x38c   : > { %v1138_v33 = vmul.f32 %v4458_v62, %v1137_v32  ;;  %v7757_v39 = vmov 69  }
 0x38d   : > { %v5683_v15 = vpop.permute.xlu0 %1688 }
 0x38e   : > { %4320 = vset.pattern.permute.xlu1 %v7739_v28 }
 0x38f   : > { %2124 = vperm.xlu1 %4320, %v5372_v54   ;;  %1195 = vrot.lane.b32.xlu0 %v5680_v45, %s4765_s25  ;;  %v4462_v43 = vpop.eup %4461 }
 0x390   : > { %1187 = vrot.lane.b32.xlu2 %v5690_v31, %s4765_s25  ;;  %v1135_v55 = vmul.f32 0.6931472, %v4462_v43 }
 0x392   : > { %v5700_v6 = vpop.permute.xlu2 %1800  ;;  %v1141_v35 = vsel %vm1140_vm14, %v1138_v33, %v1135_v55  ;;  %v1900_v33 = vmul.f32 %v5433_v14, %v5752_v59 }
 0x393   : > { %v5726_v10 = vsel %vm1069_vm15, %v5612_v2, %v1141_v35 }
 0x394   : > { %v5704_v23 = vpop.permute.xlu1 %1644 }
 0x396   : > { %v5710_v17 = vpop.permute.xlu0 %1728 }
 0x397   : > { %2539 = vrot.lane.b32.xlu1 %v5372_v54, %s4749_s17  ;;  %2155 = vrot.lane.b32.xlu0 %v1579_v12, %s4765_s25  ;;  %v1819_v54 = vmul.f32 %v5429_v53, %v5697_v24  ;;  %v5740_v53 = vpop.f32.mrf.mxu3 }
 0x398   : > { %4353 = vset.pattern.permute.xlu1 %v7743_v44  ;;  %1191 = vrot.lane.b32.xlu2 %v5713_v51, %s4765_s25  ;;  %v2059_v44 = vmul.f32 %v5501_v37, %v5697_v24  ;;  %v1660_v37 = vmul.f32 %v5353_v42, %v5752_v59 }
 0x39b   : > { %v5720_v36 = vpop.permute.xlu2 %1840 }
 0x39c   : > { %7744 = vst [vmem:[#allocation75_spill] sm:$0xff] %v5720_v36 }
 0x39d   : > { %v5728_v47 = vpop.permute.xlu1 %1684 }
 0x39e   : > { %7745 = vst [vmem:[#allocation76_spill] sm:$0xff] %v5728_v47  ;;  %v7760_v47 = vmov 70  }
 0x39f   : > { %1193 = vrot.lane.b32.xlu1 %v5726_v10, %s4765_s25  ;;  %2251 = vrot.lane.b32.xlu0 %v1819_v54, %s4765_s25  ;;  %v5733_v62 = vpop.permute.xlu0 %1768  ;;  %v7754_v54 = vmov 67  }
 0x3a0   : > { %7746 = vst [vmem:[#allocation77_spill] sm:$0xff] %v5733_v62  ;;  %1531 = vperm.xlu2 %4337, %v5718_v8  }
 0x3a4   : > { %v5738_v26 = vpop.permute.xlu2 %1880 }
 0x3a6   : > { %v5742_v2 = vpop.permute.xlu1 %1724 }
 0x3a7   : > { %7747 = vst [vmem:[#allocation78_spill] sm:$0xff] %v5742_v2  ;;  %1536 = vperm.xlu1 %4353, %v5740_v53   ;;  %2347 = vrot.lane.b32.xlu0 %v2059_v44, %s4765_s25 }
 0x3a8   : > { %4338 = vset.pattern.permute.xlu2 %v7748_v5  ;;  %v5747_v43 = vpop.permute.xlu0 %1808 }
 0x3a9   : > { %7749 = vst [vmem:[#allocation79_spill] sm:$0xff] %v5747_v43  ;;  %1572 = vperm.xlu2 %4338, %v5718_v8  }
 0x3ad   : > { %v5756_v32 = vpop.permute.xlu2 %1920 }
 0x3ae   : > { %7750 = vst [vmem:[#allocation80_spill] sm:$0xff] %v5756_v32 }
 0x3af   : > { %4354 = vset.pattern.permute.xlu1 %v7748_v5  ;;  %2189 = vrot.lane.b32.xlu0 %v1660_v37, %s4765_s25  ;;  %v5760_v12 = vpop.permute.xlu1 %1764  ;;  %v2140_v5 = vmul.f32 %v5505_v7, %v5752_v59 }
 0x3b0   : > { %7751 = vst [vmem:[#allocation81_spill] sm:$0xff] %v5760_v12  ;;  %1576 = vperm.xlu1 %4354, %v5740_v53  }
 0x3b1   : > { %4339 = vset.pattern.permute.xlu2 %v7752_v63  ;;  %v5764_v55 = vpop.permute.xlu0 %1848 }
 0x3b2   : > { %7753 = vst [vmem:[#allocation82_spill] sm:$0xff] %v5764_v55  ;;  %1612 = vperm.xlu2 %4339, %v5718_v8  }
 0x3b6   : > { %v5769_v42 = vpop.permute.xlu2 %1960 }
 0x3b7   : > { %2285 = vrot.lane.b32.xlu0 %v1900_v33, %s4765_s25  ;;  %v7756_v33 = vmov 68  }
 0x3b8   : > { %4355 = vset.pattern.permute.xlu1 %v7752_v63  ;;  %v5773_v35 = vpop.permute.xlu1 %1804  ;;  %v5791_v63 = vmul.f32 %v5661_v60, %v5192_v41 }
 0x3b9   : > { %1616 = vperm.xlu1 %4355, %v5740_v53  }
 0x3ba   : > { %4340 = vset.pattern.permute.xlu2 %v7754_v54  ;;  %v5777_v44 = vpop.permute.xlu0 %1888  ;;  %v1741_v7 = vmul.f32 %v5424_v57, %v5791_v63  ;;  %v1981_v41 = vmul.f32 %v5496_v16, %v5791_v63 }
 0x3bb   : > { %7755 = vst [vmem:[#allocation83_spill] sm:$0xff] %v5777_v44  ;;  %1652 = vperm.xlu2 %4340, %v5718_v8  }
 0x3bf   : > { %2381 = vrot.lane.b32.xlu0 %v2140_v5, %s4765_s25  ;;  %v5783_v14 = vpop.permute.xlu2 %2000 }
 0x3c1   : > { %4356 = vset.pattern.permute.xlu1 %v7754_v54  ;;  %v5786_v37 = vpop.permute.xlu1 %1844 }
 0x3c2   : > { %1656 = vperm.xlu1 %4356, %v5740_v53  }
 0x3c3   : > { %4341 = vset.pattern.permute.xlu2 %v7756_v33  ;;  %v5794_v9 = vpop.permute.xlu0 %1928 }
 0x3c4   : > { %1692 = vperm.xlu2 %4341, %v5718_v8  }
 0x3c7   : > { %2223 = vrot.lane.b32.xlu0 %v1741_v7, %s4765_s25 }
 0x3c8   : > { %v2041_v54 = vpop.permute.xlu2 %2040 }
 0x3ca   : > { %4357 = vset.pattern.permute.xlu1 %v7756_v33  ;;  %v5801_v5 = vpop.permute.xlu1 %1884  ;;  %v5815_v33 = vmul.f32 %v5713_v51, %v5210_v1 }
 0x3cb   : > { %1696 = vperm.xlu1 %4357, %v5740_v53  }
 0x3cc   : > { %4342 = vset.pattern.permute.xlu2 %v7757_v39  ;;  %v5807_v62 = vpop.permute.xlu0 %1968  ;;  %v1582_v16 = vmul.f32 %v5534_v50, %v5815_v33  ;;  %v1822_v50 = vmul.f32 %v5700_v6, %v5815_v33 }
 0x3cd   : > { %1732 = vperm.xlu2 %4342, %v5718_v8  }
 0x3cf   : > { %2319 = vrot.lane.b32.xlu0 %v1981_v41, %s4765_s25  ;;  %v5828_v41 = vadd.f32 %v5331_v29, %v5718_v8 }
 0x3d1   : > { %v5811_v57 = vpop.permute.xlu2 %2080  ;;  %vm1071_vm3 = vcmp.gt.f32.partialorder %v5828_v41, 20.0 }
 0x3d2   : > { %7758 = vst [vmem:[#allocation84_spill] sm:$0xff] %v5811_v57 }
 0x3d3   : > { %4358 = vset.pattern.permute.xlu1 %v7757_v39  ;;  %v5818_v7 = vpop.permute.xlu1 %1924  ;;  %v1079_v39 = vmin.f32 %v5828_v41, 20.0 }
 0x3d4   : > { %7759 = vst [vmem:[#allocation85_spill] sm:$0xff] %v5818_v7  ;;  %1736 = vperm.xlu1 %4358, %v5740_v53  }
 0x3d5   : > { %4343 = vset.pattern.permute.xlu2 %v7760_v47  ;;  %v5824_v55 = vpop.permute.xlu0 %2008 }
 0x3d6   : > { %7761 = vst [vmem:[#allocation86_spill] sm:$0xff] %v5824_v55  ;;  %1772 = vperm.xlu2 %4343, %v5718_v8   ;;  %v1093_v55 = vmul.f32 1.442695, %v1079_v39 }
 0x3d7   : > { %2161 = vrot.lane.b32.xlu0 %v1582_v16, %s4765_s25 }
 0x3d8   : > { %4463 = vpow2.f32 %v1093_v55  ;;  %v5861_v55 = vmul.f32 %v5726_v10, %v5225_v22 }
 0x3da   : > { %v5833_v1 = vpop.permute.xlu2 %2120 }
 0x3dc   : > { %4359 = vset.pattern.permute.xlu1 %v7760_v47  ;;  %v5838_v7 = vpop.permute.xlu1 %1964  ;;  %v2062_v47 = vmul.f32 %v2041_v54, %v5815_v33 }
 0x3dd   : > { %7762 = vst [vmem:[#allocation87_spill] sm:$0xff] %v5838_v7  ;;  %1776 = vperm.xlu1 %4359, %v5740_v53  }
 0x3de   : > { %4344 = vset.pattern.permute.xlu2 %v7717_v52  ;;  %v5843_v29 = vpop.permute.xlu0 %2048 }
 0x3df   : > { %2257 = vrot.lane.b32.xlu0 %v1822_v50, %s4765_s25  ;;  %7763 = vst [vmem:[#allocation88_spill] sm:$0xff] %v5843_v29  ;;  %1812 = vperm.xlu2 %4344, %v5718_v8   ;;  %v5856_v50 = vpop.eup %4463 }
 0x3e2   : > { %v2538_v16 = vpop.permute.xlu2 %2537 }
 0x3e3   : > { %2559 = vst.msk [vmem:[#allocation7 + $0x18] sm:$0xff] %vm2555_vm2, %v2538_v16  ;;  %v1663_v16 = vmul.f32 %v5704_v23, %v5861_v55 }
 0x3e5   : > { %4360 = vset.pattern.permute.xlu1 %v7717_v52  ;;  %v1151_v52 = vadd.f32 1.0, %v5856_v50 }
 0x3e6   : > { %v5849_v6 = vpop.permute.xlu1 %2004  ;;  %1816 = vperm.xlu1 %4360, %v5740_v53  }
 0x3e7   : > { %7764 = vst [vmem:[#allocation89_spill] sm:$0xff] %v5849_v6  ;;  %2353 = vrot.lane.b32.xlu0 %v2062_v47, %s4765_s25  ;;  %4345 = vset.pattern.permute.xlu2 %v7720_v34  ;;  %4465 = vlog2.f32 %v1151_v52 }
 0x3e8   : > { %v5854_v39 = vpop.permute.xlu0 %2088  ;;  %1852 = vperm.xlu2 %4345, %v5718_v8  }
 0x3e9   : > { %7765 = vst [vmem:[#allocation90_spill] sm:$0xff] %v5854_v39 }
 0x3ea   : > { %v1188_v54 = vpop.permute.xlu2 %1187 }
 0x3eb   : > { %v1210_v47 = vsel %vm7661_vm12, %v5690_v31, %v1188_v54 }
 0x3ec   : > { %v1243_v57 = vmul.f32 %v5582_v58, %v1210_v47  ;;  %v1244_v39 = vmul.f32 %v5584_v49, %v1210_v47  ;;  %v1245_v36 = vmul.f32 %v5586_v18, %v1210_v47  ;;  %v1246_v6 = vmul.f32 %v5588_v56, %v1210_v47 }
 0x3ed   : > { %v1247_v22 = vmul.f32 %v5591_v19, %v1210_v47  ;;  %v1248_v12 = vmul.f32 %v5593_v27, %v1210_v47  ;;  %v1249_v32 = vmul.f32 %v5595_v4, %v1210_v47  ;;  %v1250_v54 = vmul.f32 %v5598_v30, %v1210_v47 }
 0x3ee   : > { %4361 = vset.pattern.permute.xlu1 %v7720_v34  ;;  %v1315_v23 = vmul.f32 1.442695, %v1243_v57  ;;  %v1317_v29 = vmul.f32 1.442695, %v1244_v39  ;;  %v1319_v43 = vmul.f32 1.442695, %v1245_v36 }
 0x3ef   : > { %v5876_v31 = vpop.permute.xlu1 %2044  ;;  %1856 = vperm.xlu1 %4361, %v5740_v53   ;;  %2195 = vrot.lane.b32.xlu0 %v1663_v16, %s4765_s25  ;;  %v1321_v44 = vmul.f32 1.442695, %v1246_v6  ;;  %v1323_v61 = vmul.f32 1.442695, %v1247_v22  ;;  %v1325_v57 = vmul.f32 1.442695, %v1248_v12  ;;  %v1903_v16 = vmul.f32 %v5801_v5, %v5861_v55 }
 0x3f0   : > { %7766 = vst [vmem:[#allocation91_spill] sm:$0xff] %v5876_v31  ;;  %4467 = vpow2.f32 %v1315_v23  ;;  %4346 = vset.pattern.permute.xlu2 %v7718_v11  ;;  %v1327_v36 = vmul.f32 1.442695, %v1249_v32  ;;  %v1329_v52 = vmul.f32 1.442695, %v1250_v54 }
 0x3f1   : > { %v5882_v34 = vpop.permute.xlu0 %2128  ;;  %4469 = vpow2.f32 %v1317_v29  ;;  %1892 = vperm.xlu2 %4346, %v5718_v8   ;;  %v5892_v29 = vpop.eup %4465 }
 0x3f2   : > { %7767 = vst [vmem:[#allocation92_spill] sm:$0xff] %v5882_v34  ;;  %4471 = vpow2.f32 %v1319_v43  ;;  %v1192_v39 = vpop.permute.xlu2 %1191 }
 0x3f3   : > { %4473 = vpow2.f32 %v1321_v44  ;;  %v1212_v6 = vsel %vm7661_vm12, %v5713_v51, %v1192_v39 }
 0x3f4   : > { %4475 = vpow2.f32 %v1323_v61  ;;  %v1259_v22 = vmul.f32 %v5582_v58, %v1212_v6  ;;  %v1260_v47 = vmul.f32 %v5584_v49, %v1212_v6  ;;  %v1261_v12 = vmul.f32 %v5586_v18, %v1212_v6 }
 0x3f5   : > { %4477 = vpow2.f32 %v1325_v57  ;;  %v1262_v43 = vmul.f32 %v5588_v56, %v1212_v6  ;;  %v1263_v32 = vmul.f32 %v5591_v19, %v1212_v6  ;;  %v1264_v44 = vmul.f32 %v5593_v27, %v1212_v6 }
 0x3f6   : > { %v4468_v5 = vpop.eup %4467  ;;  %4479 = vpow2.f32 %v1327_v36  ;;  %v1265_v51 = vmul.f32 %v5595_v4, %v1212_v6  ;;  %v1347_v61 = vmul.f32 1.442695, %v1259_v22  ;;  %v1266_v54 = vmul.f32 %v5598_v30, %v1212_v6 }
 0x3f7   : > { %4362 = vset.pattern.permute.xlu1 %v7718_v11  ;;  %2291 = vrot.lane.b32.xlu0 %v1903_v16, %s4765_s25  ;;  %v4470_v23 = vpop.eup %4469  ;;  %4481 = vpow2.f32 %v1329_v52  ;;  %1435 = vst [vmem:[#allocation5 + $0x40] sm:$0xff] %v4468_v5  ;;  %v1349_v57 = vmul.f32 1.442695, %v1260_v47  ;;  %v1351_v39 = vmul.f32 1.442695, %v1261_v12 }
 0x3f8   : > { %v5901_v34 = vpop.permute.xlu1 %2084  ;;  %1896 = vperm.xlu1 %4362, %v5740_v53   ;;  %v4472_v7 = vpop.eup %4471  ;;  %1436 = vst [vmem:[#allocation5 + $0x48] sm:$0xff] %v4470_v23  ;;  %4483 = vpow2.f32 %v1347_v61  ;;  %v1353_v36 = vmul.f32 1.442695, %v1262_v43  ;;  %v1355_v22 = vmul.f32 1.442695, %v1263_v32 }
 0x3f9   : > { %v1190_v31 = vpop.permute.xlu0 %1189  ;;  %v4474_v11 = vpop.eup %4473  ;;  %1437 = vst [vmem:[#allocation5 + $0x50] sm:$0xff] %v4472_v7  ;;  %4485 = vpow2.f32 %v1349_v57  ;;  %v1357_v16 = vmul.f32 1.442695, %v1264_v44  ;;  %4347 = vset.pattern.permute.xlu2 %v7721_v3  ;;  %v1359_v47 = vmul.f32 1.442695, %v1265_v51 }
 0x3fa   : > { %v1211_v52 = vsel %vm7661_vm12, %v5661_v60, %v1190_v31  ;;  %v4476_v6 = vpop.eup %4475  ;;  %1438 = vst [vmem:[#allocation5 + $0x58] sm:$0xff] %v4474_v11  ;;  %4487 = vpow2.f32 %v1351_v39  ;;  %1932 = vperm.xlu2 %4347, %v5718_v8   ;;  %v5910_v43 = vpop.permute.xlu2 %1531  ;;  %v1361_v32 = vmul.f32 1.442695, %v1266_v54 }
 0x3fb   : > { %v1251_v12 = vmul.f32 %v5582_v58, %v1211_v52  ;;  %v1252_v5 = vmul.f32 %v5584_v49, %v1211_v52  ;;  %7768 = vst [vmem:[#allocation93_spill] sm:$0xff] %v5910_v43  ;;  %v4478_v7 = vpop.eup %4477  ;;  %4489 = vpow2.f32 %v1353_v36  ;;  %v1253_v44 = vmul.f32 %v5586_v18, %v1211_v52 }
 0x3fc   : > { %1439 = vst [vmem:[#allocation5 + $0x60] sm:$0xff] %v4476_v6  ;;  %v1254_v60 = vmul.f32 %v5588_v56, %v1211_v52  ;;  %v4480_v31 = vpop.eup %4479  ;;  %4491 = vpow2.f32 %v1355_v22  ;;  %v1255_v51 = vmul.f32 %v5591_v19, %v1211_v52  ;;  %v1256_v61 = vmul.f32 %v5593_v27, %v1211_v52 }
 0x3fd   : > { %1440 = vst [vmem:[#allocation5 + $0x68] sm:$0xff] %v4478_v7  ;;  %v4482_v23 = vpop.eup %4481  ;;  %4493 = vpow2.f32 %v1357_v16  ;;  %v1257_v57 = vmul.f32 %v5595_v4, %v1211_v52  ;;  %v1331_v39 = vmul.f32 1.442695, %v1251_v12  ;;  %v1333_v11 = vmul.f32 1.442695, %v1252_v5 }
 0x3fe   : > { %1441 = vst [vmem:[#allocation5 + $0x70] sm:$0xff] %v4480_v31  ;;  %v4484_v36 = vpop.eup %4483  ;;  %4495 = vpow2.f32 %v1359_v47  ;;  %v1335_v54 = vmul.f32 1.442695, %v1253_v44  ;;  %v1258_v22 = vmul.f32 %v5598_v30, %v1211_v52  ;;  %v1337_v7 = vmul.f32 1.442695, %v1254_v60 }
 0x3ff   : > { %1442 = vst [vmem:[#allocation5 + $0x78] sm:$0xff] %v4482_v23  ;;  %v4486_v6 = vpop.eup %4485  ;;  %4497 = vpow2.f32 %v1361_v32  ;;  %v1339_v16 = vmul.f32 1.442695, %v1255_v51  ;;  %v1341_v31 = vmul.f32 1.442695, %v1256_v61 }
 0x400   : > { %1451 = vst [vmem:[#allocation5 + $0xc0] sm:$0xff] %v4484_v36  ;;  %4363 = vset.pattern.permute.xlu1 %v7721_v3  ;;  %v4488_v2 = vpop.eup %4487  ;;  %4499 = vpow2.f32 %v1331_v39  ;;  %v1343_v47 = vmul.f32 1.442695, %v1257_v57 }
 0x401   : > { %1452 = vst [vmem:[#allocation5 + $0xc8] sm:$0xff] %v4486_v6  ;;  %v2125_v43 = vpop.permute.xlu1 %2124  ;;  %1936 = vperm.xlu1 %4363, %v5740_v53   ;;  %v1196_v12 = vpop.permute.xlu0 %1195  ;;  %4501 = vpow2.f32 %v1333_v11 }
 0x402   : > { %v4490_v5 = vpop.eup %4489  ;;  %1453 = vst [vmem:[#allocation5 + $0xd0] sm:$0xff] %v4488_v2  ;;  %v2143_v32 = vmul.f32 %v2125_v43, %v5861_v55  ;;  %v1214_v52 = vsel %vm7661_vm12, %v5680_v45, %v1196_v12  ;;  %4503 = vpow2.f32 %v1335_v54  ;;  %4348 = vset.pattern.permute.xlu2 %v7725_v13  ;;  %v1345_v2 = vmul.f32 1.442695, %v1258_v22  ;;  %v4583_v54 = vld [vmem:[%s7552_s7] ss:$0 sm:$0xff] }
 0x403   : > { %v4492_v44 = vpop.eup %4491  ;;  %1454 = vst [vmem:[#allocation5 + $0xd8] sm:$0xff] %v4490_v5  ;;  %v1275_v3 = vmul.f32 %v5582_v58, %v1214_v52  ;;  %v1276_v60 = vmul.f32 %v5584_v49, %v1214_v52  ;;  %v1277_v51 = vmul.f32 %v5586_v18, %v1214_v52  ;;  %4505 = vpow2.f32 %v1337_v7  ;;  %1972 = vperm.xlu2 %4348, %v5718_v8   ;;  %v5929_v23 = vpop.permute.xlu2 %1572 }
 0x404   : > { %v4494_v61 = vpop.eup %4493  ;;  %1455 = vst [vmem:[#allocation5 + $0xe0] sm:$0xff] %v4492_v44  ;;  %v1278_v43 = vmul.f32 %v5588_v56, %v1214_v52  ;;  %4507 = vpow2.f32 %v1339_v16  ;;  %v1279_v39 = vmul.f32 %v5591_v19, %v1214_v52  ;;  %2387 = vrot.lane.b32.xlu0 %v2143_v32, %s4765_s25  ;;  %v5937_v6 = vadd.f32 %v4583_v54, %v5740_v53 }
 0x405   : > { %v4496_v57 = vpop.eup %4495  ;;  %1456 = vst [vmem:[#allocation5 + $0xe8] sm:$0xff] %v4494_v61  ;;  %v1379_v11 = vmul.f32 1.442695, %v1275_v3  ;;  %4509 = vpow2.f32 %v1341_v31  ;;  %v1280_v22 = vmul.f32 %v5593_v27, %v1214_v52  ;;  %v1381_v7 = vmul.f32 1.442695, %v1276_v60 }
 0x406   : > { %v4498_v36 = vpop.eup %4497  ;;  %1457 = vst [vmem:[#allocation5 + $0xf0] sm:$0xff] %v4496_v57  ;;  %4511 = vpow2.f32 %v1343_v47  ;;  %v1281_v16 = vmul.f32 %v5595_v4, %v1214_v52  ;;  %v1383_v5 = vmul.f32 1.442695, %v1277_v51  ;;  %v1154_v44 = vmul.f32 -0.5, %v5856_v50 }
 0x407   : > { %v4500_v12 = vpop.eup %4499  ;;  %1458 = vst [vmem:[#allocation5 + $0xf8] sm:$0xff] %v4498_v36  ;;  %4513 = vpow2.f32 %v1345_v2  ;;  %v1282_v3 = vmul.f32 %v5598_v30, %v1214_v52  ;;  %v1385_v61 = vmul.f32 1.442695, %v1278_v43  ;;  %v5945_v31 = vmul.f32 %v5680_v45, %v5230_v40 }
 0x408   : > { %v4502_v32 = vpop.eup %4501  ;;  %1443 = vst [vmem:[#allocation5 + $0x80] sm:$0xff] %v4500_v12  ;;  %4515 = vpow2.f32 %v1379_v11  ;;  %v1387_v60 = vmul.f32 1.442695, %v1279_v39  ;;  %v1080_v2 = vmin.f32 %v5937_v6, 20.0  ;;  %v1389_v52 = vmul.f32 1.442695, %v1280_v22 }
 0x409   : > { %v4504_v54 = vpop.eup %4503  ;;  %1444 = vst [vmem:[#allocation5 + $0x88] sm:$0xff] %v4502_v32  ;;  %v5947_v47 = vpop.permute.xlu1 %2539  ;;  %4364 = vset.pattern.permute.xlu1 %v7725_v13  ;;  %4517 = vpow2.f32 %v1381_v7  ;;  %v1744_v45 = vmul.f32 %v5710_v17, %v5945_v31  ;;  %v1391_v39 = vmul.f32 1.442695, %v1281_v16  ;;  %v1155_v36 = vadd.f32 1.0, %v1154_v44 }
 0x40a   : > { %v5950_v51 = vpop.permute.xlu0 %2155  ;;  %v4506_v57 = vpop.eup %4505  ;;  %1445 = vst [vmem:[#allocation5 + $0x90] sm:$0xff] %v4504_v54  ;;  %1976 = vperm.xlu1 %4364, %v5740_v53   ;;  %4519 = vpow2.f32 %v1383_v5  ;;  %v1393_v13 = vmul.f32 1.442695, %v1282_v3  ;;  %v1157_v7 = vand.u32 2147483647, %v5856_v50  ;;  %vm1072_vm5 = vcmp.gt.f32.partialorder %v5937_v6, 20.0 }
 0x40b   : > { %v4508_v43 = vpop.eup %4507  ;;  %1446 = vst [vmem:[#allocation5 + $0x98] sm:$0xff] %v4506_v57  ;;  %4521 = vpow2.f32 %v1385_v61  ;;  %4349 = vset.pattern.permute.xlu2 %v7728_v20  ;;  %v1153_v16 = vmul.f32 0.6931472, %v5892_v29  ;;  %v1095_v5 = vmul.f32 1.442695, %v1080_v2  ;;  %v1156_v3 = vmul.f32 %v5856_v50, %v1155_v36 }
 0x40c   : > { %v4510_v11 = vpop.eup %4509  ;;  %1447 = vst [vmem:[#allocation5 + $0xa0] sm:$0xff] %v4508_v43  ;;  %4523 = vpow2.f32 %v1387_v60  ;;  %2012 = vperm.xlu2 %4349, %v5718_v8   ;;  %v5959_v22 = vpop.permute.xlu2 %1612  ;;  %2229 = vrot.lane.b32.xlu0 %v1744_v45, %s4765_s25  ;;  %vm5964_vm0 = vcmp.lt.f32.partialorder %v1157_v7, 0.0004427343  ;;  %v1984_v7 = vmul.f32 %v5807_v62, %v5945_v31 }
 0x40d   : > { %v4512_v12 = vpop.eup %4511  ;;  %1448 = vst [vmem:[#allocation5 + $0xa8] sm:$0xff] %v4510_v11  ;;  %4525 = vpow2.f32 %v1389_v52  ;;  %v1159_v2 = vsel %vm5964_vm0, %v1156_v3, %v1153_v16  ;;  %v7772_v16 = vld [vmem:[#allocation43_spill] sm:$0xff] }
 0x40e   : > { %v4514_v17 = vpop.eup %4513  ;;  %1449 = vst [vmem:[#allocation5 + $0xb0] sm:$0xff] %v4512_v12  ;;  %4527 = vpow2.f32 %v1391_v39 }
 0x40f   : > { %v4516_v32 = vpop.eup %4515  ;;  %1450 = vst [vmem:[#allocation5 + $0xb8] sm:$0xff] %v4514_v17  ;;  %4529 = vpow2.f32 %v1393_v13  ;;  %v7771_v13 = vld [vmem:[#allocation27_spill] sm:$0xff] }
 0x410   : > { %v4518_v44 = vpop.eup %4517  ;;  %1467 = vst [vmem:[#allocation5 + $0x140] sm:$0xff] %v4516_v32  ;;  %4531 = vpow2.f32 %v1095_v5  ;;  %v1539_v12 = vmul.f32 %v7771_v13, %v5697_v24  ;;  %v1779_v5 = vmul.f32 %v7772_v16, %v5697_v24 }
 0x411   : > { %v4520_v61 = vpop.eup %4519  ;;  %1468 = vst [vmem:[#allocation5 + $0x148] sm:$0xff] %v4518_v44  ;;  %v1194_v60 = vpop.permute.xlu1 %1193 }
 0x412   : > { %v2252_v57 = vpop.permute.xlu0 %2251  ;;  %v4522_v29 = vpop.eup %4521  ;;  %1469 = vst [vmem:[#allocation5 + $0x150] sm:$0xff] %v4520_v61  ;;  %v1213_v50 = vsel %vm7661_vm12, %v5726_v10, %v1194_v60  ;;  %4365 = vset.pattern.permute.xlu1 %v7728_v20  ;;  %v2403_v62 = vsel %vm7661_vm12, %v1539_v12, %v5950_v51  ;;  %v7774_v12 = vld [vmem:[#allocation23_spill] sm:$0xff] }
 0x413   : > { %v4524_v52 = vpop.eup %4523  ;;  %1470 = vst [vmem:[#allocation5 + $0x158] sm:$0xff] %v4522_v29  ;;  %v1267_v43 = vmul.f32 %v5582_v58, %v1213_v50  ;;  %v1268_v45 = vmul.f32 %v5584_v49, %v1213_v50  ;;  %v1269_v39 = vmul.f32 %v5586_v18, %v1213_v50  ;;  %v1270_v11 = vmul.f32 %v5588_v56, %v1213_v50 }
 0x414   : > { %v4526_v36 = vpop.eup %4525  ;;  %1471 = vst [vmem:[#allocation5 + $0x160] sm:$0xff] %v4524_v52  ;;  %v1271_v20 = vmul.f32 %v5591_v19, %v1213_v50  ;;  %v1272_v10 = vmul.f32 %v5593_v27, %v1213_v50  ;;  %v1273_v32 = vmul.f32 %v5595_v4, %v1213_v50  ;;  %2016 = vperm.xlu1 %4365, %v5740_v53  }
 0x415   : > { %v4528_v17 = vpop.eup %4527  ;;  %1472 = vst [vmem:[#allocation5 + $0x168] sm:$0xff] %v4526_v36  ;;  %v1363_v44 = vmul.f32 1.442695, %v1267_v43  ;;  %v1365_v3 = vmul.f32 1.442695, %v1268_v45  ;;  %4350 = vset.pattern.permute.xlu2 %v7732_v0  ;;  %v1274_v54 = vmul.f32 %v5598_v30, %v1213_v50  ;;  %2325 = vrot.lane.b32.xlu0 %v1984_v7, %s4765_s25  ;;  %v5994_v52 = vpop.permute.xlu2 %1652  ;;  %v5999_v43 = vsel %vm1071_vm3, %v5828_v41, %v1159_v2  ;;  %v7773_v50 = vld [vmem:[#allocation58_spill] sm:$0xff] }
 0x416   : > { %v4530_v61 = vpop.eup %4529  ;;  %1473 = vst [vmem:[#allocation5 + $0x170] sm:$0xff] %v4528_v17  ;;  %v1367_v60 = vmul.f32 1.442695, %v1269_v39  ;;  %v1369_v29 = vmul.f32 1.442695, %v1270_v11  ;;  %2052 = vperm.xlu2 %4350, %v5718_v8   ;;  %v2427_v51 = vsel %vm7661_vm12, %v1779_v5, %v2252_v57  ;;  %v2019_v39 = vmul.f32 %v7773_v50, %v5697_v24 }
 0x417   : > { %1474 = vst [vmem:[#allocation5 + $0x178] sm:$0xff] %v4530_v61  ;;  %4533 = vpow2.f32 %v1363_v44  ;;  %v1371_v45 = vmul.f32 1.442695, %v1271_v20  ;;  %v6002_v36 = vpop.eup %4531  ;;  %v1373_v11 = vmul.f32 1.442695, %v1272_v10  ;;  %v6012_v7 = vmul.f32 %v5999_v43, %v7774_v12 }
 0x418   : > { %2560 = vst.msk [vmem:[#allocation7 + $0x20] sm:$0xff] %vm2555_vm2, %v5947_v47  ;;  %4535 = vpow2.f32 %v1365_v3  ;;  %v1375_v13 = vmul.f32 1.442695, %v1273_v32  ;;  %v1377_v57 = vmul.f32 1.442695, %v1274_v54 }
 0x419   : > { %2467 = vst [vmem:[#allocation6] sm:$0xff] %v2403_v62  ;;  %4537 = vpow2.f32 %v1367_v60  ;;  %v6008_v41 = vpop.permute.xlu1 %1536  ;;  %v1585_v47 = vmul.f32 %v5929_v23, %v6012_v7  ;;  %v1160_v60 = vadd.f32 1.0, %v6002_v36 }
 0x41a   : > { %v2348_v2 = vpop.permute.xlu0 %2347  ;;  %4539 = vpow2.f32 %v1369_v29  ;;  %2470 = vst [vmem:[#allocation6 + $0x18] sm:$0xff] %v2427_v51  ;;  %v7776_v51 = vld [vmem:[#allocation44_spill] sm:$0xff] }
 0x41b   : > { %v2451_v20 = vsel %vm7661_vm12, %v2019_v39, %v2348_v2  ;;  %4541 = vpow2.f32 %v1371_v45  ;;  %v1860_v50 = vmul.f32 %v7776_v51, %v5752_v59 }
 0x41c   : > { %2473 = vst [vmem:[#allocation6 + $0x30] sm:$0xff] %v2451_v20  ;;  %4543 = vpow2.f32 %v1373_v11  ;;  %4366 = vset.pattern.permute.xlu1 %v7732_v0  ;;  %v7775_v0 = vld [vmem:[#allocation28_spill] sm:$0xff]  ;;  %v1166_v20 = vand.u32 2147483647, %v6002_v36 }
 0x41d   : > { %v4534_v10 = vpop.eup %4533  ;;  %4545 = vpow2.f32 %v1375_v13  ;;  %2056 = vperm.xlu1 %4366, %v5740_v53   ;;  %2167 = vrot.lane.b32.xlu0 %v1585_v47, %s4765_s25  ;;  %v1620_v44 = vmul.f32 %v7775_v0, %v5752_v59  ;;  %v1163_v13 = vmul.f32 -0.5, %v6002_v36 }
 0x41e   : > { %v4536_v17 = vpop.eup %4535  ;;  %4547 = vpow2.f32 %v1377_v57  ;;  %1459 = vst [vmem:[#allocation5 + $0x100] sm:$0xff] %v4534_v10  ;;  %4351 = vset.pattern.permute.xlu2 %v7735_v48  ;;  %v6021_v5 = vpop.permute.xlu2 %1692  ;;  %v7777_v10 = vld [vmem:[#allocation59_spill] sm:$0xff]  ;;  %vm1167_vm4 = vcmp.lt.f32.partialorder %v1166_v20, 0.0004427343 }
 0x41f   : > { %v4538_v16 = vpop.eup %4537  ;;  %1460 = vst [vmem:[#allocation5 + $0x108] sm:$0xff] %v4536_v17  ;;  %2092 = vperm.xlu2 %4351, %v5718_v8   ;;  %4549 = vlog2.f32 %v1160_v60  ;;  %v1164_v57 = vadd.f32 1.0, %v1163_v13  ;;  %v2100_v17 = vmul.f32 %v7777_v10, %v5752_v59  ;;  %v7779_v60 = vld [vmem:[#allocation42_spill] sm:$0xff] }
 0x420   : > { %v4540_v32 = vpop.eup %4539  ;;  %1461 = vst [vmem:[#allocation5 + $0x110] sm:$0xff] %v4538_v16 }
 0x421   : > { %v4542_v23 = vpop.eup %4541  ;;  %1462 = vst [vmem:[#allocation5 + $0x118] sm:$0xff] %v4540_v32 }
 0x422   : > { %v2190_v3 = vpop.permute.xlu0 %2189  ;;  %v4544_v61 = vpop.eup %4543  ;;  %1463 = vst [vmem:[#allocation5 + $0x120] sm:$0xff] %v4542_v23  ;;  %v1165_v23 = vmul.f32 %v6002_v36, %v1164_v57  ;;  %v7782_v57 = vld [vmem:[#allocation57_spill] sm:$0xff] }
 0x423   : > { %v6026_v62 = vpop.permute.xlu1 %1576  ;;  %v4546_v54 = vpop.eup %4545  ;;  %1464 = vst [vmem:[#allocation5 + $0x128] sm:$0xff] %v4544_v61  ;;  %v2412_v29 = vsel %vm7661_vm12, %v1620_v44, %v2190_v3  ;;  %v7778_v61 = vld [vmem:[#allocation40_spill] sm:$0xff]  ;;  %v1941_v20 = vmul.f32 %v7782_v57, %v5791_v63 }
 0x424   : > { %v4548_v45 = vpop.eup %4547  ;;  %1465 = vst [vmem:[#allocation5 + $0x130] sm:$0xff] %v4546_v54  ;;  %v1739_v54 = vmul.f32 %v7778_v61, %v5697_v24 }
 0x425   : > { %1466 = vst [vmem:[#allocation5 + $0x138] sm:$0xff] %v4548_v45  ;;  %4367 = vset.pattern.permute.xlu1 %v7735_v48  ;;  %v4550_v48 = vpop.eup %4549 }
 0x426   : > { %2476 = vst [vmem:[#allocation6 + $0x48] sm:$0xff] %v2412_v29  ;;  %2096 = vperm.xlu1 %4367, %v5740_v53   ;;  %v1162_v47 = vmul.f32 0.6931472, %v4550_v48  ;;  %v1701_v29 = vmul.f32 %v7779_v60, %v5791_v63 }
 0x427   : > { %4352 = vset.pattern.permute.xlu2 %v7739_v28  ;;  %v6035_v39 = vpop.permute.xlu2 %1732 }
 0x428   : > { %2132 = vperm.xlu2 %4352, %v5718_v8   ;;  %v1168_v44 = vsel %vm1167_vm4, %v1165_v23, %v1162_v47 }
 0x429   : > { %v6057_v3 = vsel %vm1072_vm5, %v5937_v6, %v1168_v44  ;;  %v7784_v44 = vld [vmem:[#allocation26_spill] sm:$0xff] }
 0x42a   : > { %v2286_v11 = vpop.permute.xlu0 %2285  ;;  %v1580_v61 = vmul.f32 %v7784_v44, %v5752_v59 }
 0x42b   : > { %v2436_v2 = vsel %vm7661_vm12, %v1860_v50, %v2286_v11  ;;  %v6040_v12 = vpop.permute.xlu1 %1616  ;;  %v7780_v11 = vld [vmem:[#allocation33_spill] sm:$0xff] }
 0x42c   : > { %2479 = vst [vmem:[#allocation6 + $0x60] sm:$0xff] %v2436_v2  ;;  %v1659_v13 = vmul.f32 %v7780_v11, %v5697_v24  ;;  %v7781_v2 = vld [vmem:[#allocation55_spill] sm:$0xff]  ;;  %v7787_v11 = vld [vmem:[#allocation41_spill] sm:$0xff] }
 0x42d   : > { %v1979_v48 = vmul.f32 %v7781_v2, %v5697_v24 }
 0x42e   : > { %4368 = vset.pattern.permute.xlu1 %v7739_v28 }
 0x42f   : > { %2136 = vperm.xlu1 %4368, %v5740_v53  }
 0x430   : > { %1197 = vrot.lane.b32.xlu2 %v5999_v43, %s4765_s25  ;;  %v6049_v16 = vpop.permute.xlu2 %1772 }
 0x432   : > { %v2382_v32 = vpop.permute.xlu0 %2381 }
 0x433   : > { %v2460_v0 = vsel %vm7661_vm12, %v2100_v17, %v2382_v32  ;;  %v7783_v32 = vld [vmem:[#allocation49_spill] sm:$0xff] }
 0x434   : > { %2482 = vst [vmem:[#allocation6 + $0x78] sm:$0xff] %v2460_v0  ;;  %v6053_v28 = vpop.permute.xlu1 %1656  ;;  %v1899_v23 = vmul.f32 %v7783_v32, %v5697_v24 }
 0x437   : > { %1199 = vrot.lane.b32.xlu1 %v6057_v3, %s4765_s25 }
 0x438   : > { %2219 = vrot.lane.b32.xlu2 %v1739_v54, %s4765_s25  ;;  %v7785_v54 = vld [vmem:[#allocation62_spill] sm:$0xff] }
 0x439   : > { %v1813_v45 = vpop.permute.xlu2 %1812  ;;  %v1542_v60 = vmul.f32 %v7785_v54, %v5815_v33 }
 0x43a   : > { %v2224_v36 = vpop.permute.xlu0 %2223  ;;  %v1825_v50 = vmul.f32 %v1813_v45, %v6012_v7 }
 0x43b   : > { %v2421_v51 = vsel %vm7661_vm12, %v1701_v29, %v2224_v36 }
 0x43c   : > { %2485 = vst [vmem:[#allocation6 + $0x90] sm:$0xff] %v2421_v51  ;;  %2263 = vrot.lane.b32.xlu0 %v1825_v50, %s4765_s25  ;;  %v7786_v51 = vld [vmem:[#allocation64_spill] sm:$0xff] }
 0x43d   : > { %v6069_v6 = vpop.permute.xlu1 %1696  ;;  %v2139_v50 = vmul.f32 %v7786_v51, %v5697_v24 }
 0x43f   : > { %2187 = vrot.lane.b32.xlu1 %v1659_v13, %s4765_s25  ;;  %v1820_v13 = vmul.f32 %v7787_v11, %v5752_v59 }
 0x440   : > { %2315 = vrot.lane.b32.xlu2 %v1979_v48, %s4765_s25  ;;  %v1782_v48 = vmul.f32 %v5671_v21, %v5815_v33 }
 0x442   : > { %v2320_v47 = vpop.permute.xlu0 %2319  ;;  %v6080_v17 = vpop.permute.xlu2 %1852 }
 0x443   : > { %v2445_v10 = vsel %vm7661_vm12, %v1941_v20, %v2320_v47 }
 0x444   : > { %2488 = vst [vmem:[#allocation6 + $0xa8] sm:$0xff] %v2445_v10  ;;  %v7788_v10 = vld [vmem:[#allocation34_spill] sm:$0xff] }
 0x445   : > { %v1740_v32 = vmul.f32 %v7788_v10, %v5752_v59 }
 0x446   : > { %v6084_v0 = vpop.permute.xlu1 %1736 }
 0x447   : > { %2283 = vrot.lane.b32.xlu1 %v1899_v23, %s4765_s25  ;;  %v7789_v23 = vld [vmem:[#allocation56_spill] sm:$0xff] }
 0x448   : > { %2157 = vrot.lane.b32.xlu2 %v1580_v61, %s4765_s25  ;;  %v2060_v44 = vmul.f32 %v7789_v23, %v5752_v59  ;;  %v2022_v61 = vmul.f32 %v5783_v14, %v5815_v33  ;;  %v1623_v14 = vmul.f32 %v5676_v46, %v5861_v55  ;;  %v1863_v46 = vmul.f32 %v5786_v37, %v5861_v55 }
 0x44a   : > { %v2162_v29 = vpop.permute.xlu0 %2161 }
 0x44b   : > { %v2406_v36 = vsel %vm7661_vm12, %v1542_v60, %v2162_v29  ;;  %v6093_v45 = vpop.permute.xlu2 %1892  ;;  %v7790_v29 = vld [vmem:[#allocation50_spill] sm:$0xff] }
 0x44c   : > { %2491 = vst [vmem:[#allocation6 + $0xc0] sm:$0xff] %v2406_v36  ;;  %v1980_v36 = vmul.f32 %v7790_v29, %v5752_v59  ;;  %v7794_v29 = vld [vmem:[#allocation48_spill] sm:$0xff] }
 0x44f   : > { %v6099_v2 = vpop.permute.xlu1 %1776  ;;  %2379 = vrot.lane.b32.xlu1 %v2139_v50, %s4765_s25  ;;  %v7791_v50 = vld [vmem:[#allocation39_spill] sm:$0xff] }
 0x450   : > { %2253 = vrot.lane.b32.xlu2 %v1820_v13, %s4765_s25  ;;  %v1661_v11 = vmul.f32 %v7791_v50, %v5791_v63  ;;  %v7795_v50 = vld [vmem:[#allocation67_spill] sm:$0xff] }
 0x452   : > { %v2258_v57 = vpop.permute.xlu0 %2257 }
 0x453   : > { %v2430_v20 = vsel %vm7661_vm12, %v1782_v48, %v2258_v57 }
 0x454   : > { %2494 = vst [vmem:[#allocation6 + $0xd8] sm:$0xff] %v2430_v20  ;;  %v6106_v47 = vpop.permute.xlu2 %1932  ;;  %v7792_v20 = vld [vmem:[#allocation32_spill] sm:$0xff] }
 0x455   : > { %v1581_v10 = vmul.f32 %v7792_v20, %v5791_v63 }
 0x457   : > { %2221 = vrot.lane.b32.xlu1 %v1740_v32, %s4765_s25  ;;  %v7793_v32 = vld [vmem:[#allocation54_spill] sm:$0xff] }
 0x458   : > { %v6115_v21 = vpop.permute.xlu1 %1816  ;;  %2349 = vrot.lane.b32.xlu2 %v2060_v44, %s4765_s25  ;;  %v1901_v23 = vmul.f32 %v7793_v32, %v5791_v63  ;;  %v7797_v32 = vld [vmem:[#allocation24_spill] sm:$0xff] }
 0x45a   : > { %v2354_v54 = vpop.permute.xlu0 %2353 }
 0x45b   : > { %v2454_v60 = vsel %vm7661_vm12, %v2022_v61, %v2354_v54 }
 0x45c   : > { %2497 = vst [vmem:[#allocation6 + $0xf0] sm:$0xff] %v2454_v60 }
 0x45d   : > { %v6121_v51 = vpop.permute.xlu2 %1972 }
 0x45f   : > { %2317 = vrot.lane.b32.xlu1 %v1980_v36, %s4765_s25  ;;  %v1821_v36 = vmul.f32 %v7794_v29, %v5791_v63 }
 0x460   : > { %2191 = vrot.lane.b32.xlu2 %v1661_v11, %s4765_s25  ;;  %v2141_v11 = vmul.f32 %v7795_v50, %v5791_v63  ;;  %v7798_v50 = vld [vmem:[#allocation69_spill] sm:$0xff] }
 0x461   : > { %v6129_v13 = vpop.permute.xlu1 %1856 }
 0x462   : > { %v2196_v48 = vpop.permute.xlu0 %2195 }
 0x463   : > { %v2415_v57 = vsel %vm7661_vm12, %v1623_v14, %v2196_v48 }
 0x464   : > { %2500 = vst [vmem:[#allocation6 + $0x108] sm:$0xff] %v2415_v57  ;;  %v7796_v57 = vld [vmem:[#allocation63_spill] sm:$0xff] }
 0x465   : > { %v2061_v20 = vmul.f32 %v7796_v57, %v5791_v63 }
 0x466   : > { %v6136_v44 = vpop.permute.xlu2 %2012 }
 0x467   : > { %2159 = vrot.lane.b32.xlu1 %v1581_v10, %s4765_s25  ;;  %v2103_v10 = vmul.f32 %v5901_v34, %v5861_v55 }
 0x468   : > { %2287 = vrot.lane.b32.xlu2 %v1901_v23, %s4765_s25  ;;  %v6159_v23 = vmul.f32 %v6057_v3, %v7797_v32 }
 0x46a   : > { %v2292_v61 = vpop.permute.xlu0 %2291  ;;  %v1897_v60 = vpop.permute.xlu1 %1896  ;;  %v1666_v29 = vmul.f32 %v6053_v28, %v6159_v23 }
 0x46b   : > { %v2439_v54 = vsel %vm7661_vm12, %v1863_v46, %v2292_v61  ;;  %v1742_v46 = vmul.f32 %v5644_v38, %v5815_v33  ;;  %v1662_v38 = vmul.f32 %v7798_v50, %v5815_v33  ;;  %v1906_v57 = vmul.f32 %v1897_v60, %v6159_v23 }
 0x46c   : > { %2503 = vst [vmem:[#allocation6 + $0x120] sm:$0xff] %v2439_v54  ;;  %v1823_v50 = vmul.f32 %v5773_v35, %v5861_v55 }
 0x46f   : > { %2255 = vrot.lane.b32.xlu1 %v1821_v36, %s4765_s25 }
 0x470   : > { %v2053_v14 = vpop.permute.xlu2 %2052  ;;  %2383 = vrot.lane.b32.xlu2 %v2141_v11, %s4765_s25  ;;  %v1704_v11 = vmul.f32 %v5683_v15, %v5945_v31  ;;  %v1902_v15 = vmul.f32 %v5738_v26, %v5815_v33 }
 0x471   : > { %v2065_v37 = vmul.f32 %v2053_v14, %v6012_v7  ;;  %v1982_v14 = vmul.f32 %v5769_v42, %v5815_v33  ;;  %v1583_v42 = vmul.f32 %v5653_v25, %v5861_v55 }
 0x473   : > { %2359 = vrot.lane.b32.xlu0 %v2065_v37, %s4765_s25  ;;  %v6151_v48 = vpop.permute.xlu1 %1936 }
 0x476   : > { %v2388_v61 = vpop.permute.xlu0 %2387 }
 0x477   : > { %2351 = vrot.lane.b32.xlu1 %v2061_v20, %s4765_s25  ;;  %v2463_v54 = vsel %vm7661_vm12, %v2103_v10, %v2388_v61  ;;  %v1944_v10 = vmul.f32 %v5794_v9, %v5945_v31 }
 0x478   : > { %2506 = vst [vmem:[#allocation6 + $0x138] sm:$0xff] %v2463_v54  ;;  %2225 = vrot.lane.b32.xlu2 %v1742_v46, %s4765_s25 }
 0x479   : > { %v6168_v36 = vpop.permute.xlu2 %2092 }
 0x47b   : > { %2201 = vrot.lane.b32.xlu0 %v1666_v29, %s4765_s25 }
 0x47c   : > { %v6171_v34 = vpop.permute.xlu1 %1976 }
 0x47e   : > { %v2230_v37 = vpop.permute.xlu0 %2229 }
 0x47f   : > { %2193 = vrot.lane.b32.xlu1 %v1662_v38, %s4765_s25  ;;  %v2424_v28 = vsel %vm7661_vm12, %v1704_v11, %v2230_v37  ;;  %v2142_v38 = vmul.f32 %v5833_v1, %v5815_v33 }
 0x480   : > { %2509 = vst [vmem:[#allocation6 + $0x150] sm:$0xff] %v2424_v28  ;;  %2321 = vrot.lane.b32.xlu2 %v1982_v14, %s4765_s25 }
 0x482   : > { %v6183_v20 = vpop.permute.xlu2 %2132 }
 0x483   : > { %2297 = vrot.lane.b32.xlu0 %v1906_v57, %s4765_s25 }
 0x486   : > { %v6192_v32 = vpop.permute.xlu1 %2016 }
 0x487   : > { %2289 = vrot.lane.b32.xlu1 %v1902_v15, %s4765_s25  ;;  %v2326_v60 = vpop.permute.xlu0 %2325  ;;  %v7799_v15 = vld [vmem:[#allocation93_spill] sm:$0xff] }
 0x488   : > { %v2448_v46 = vsel %vm7661_vm12, %v1944_v10, %v2326_v60  ;;  %2163 = vrot.lane.b32.xlu2 %v1583_v42, %s4765_s25  ;;  %v1545_v42 = vmul.f32 %v7799_v15, %v6012_v7 }
 0x489   : > { %2512 = vst [vmem:[#allocation6 + $0x168] sm:$0xff] %v2448_v46 }
 0x48a   : > { %v1198_v61 = vpop.permute.xlu2 %1197 }
 0x48b   : > { %v1215_v26 = vsel %vm7661_vm12, %v5999_v43, %v1198_v61  ;;  %v7800_v61 = vld [vmem:[#allocation37_spill] sm:$0xff] }
 0x48c   : > { %v1283_v54 = vmul.f32 %v5582_v58, %v1215_v26  ;;  %v1284_v25 = vmul.f32 %v5584_v49, %v1215_v26  ;;  %v1285_v9 = vmul.f32 %v5586_v18, %v1215_v26  ;;  %v1286_v29 = vmul.f32 %v5588_v56, %v1215_v26 }
 0x48d   : > { %v1287_v11 = vmul.f32 %v5591_v19, %v1215_v26  ;;  %v1288_v14 = vmul.f32 %v5593_v27, %v1215_v26  ;;  %v1289_v43 = vmul.f32 %v5595_v4, %v1215_v26  ;;  %v1290_v10 = vmul.f32 %v5598_v30, %v1215_v26 }
 0x48e   : > { %v1395_v37 = vmul.f32 1.442695, %v1283_v54  ;;  %v1397_v28 = vmul.f32 1.442695, %v1284_v25  ;;  %v1399_v57 = vmul.f32 1.442695, %v1285_v9  ;;  %v1699_v54 = vmul.f32 %v7800_v61, %v5697_v24 }
 0x48f   : > { %v1401_v60 = vmul.f32 1.442695, %v1286_v29  ;;  %v6213_v46 = vpop.permute.xlu1 %2056  ;;  %2385 = vrot.lane.b32.xlu1 %v2142_v38, %s4765_s25  ;;  %v2168_v1 = vpop.permute.xlu0 %2167  ;;  %v1403_v35 = vmul.f32 1.442695, %v1287_v11  ;;  %v1405_v25 = vmul.f32 1.442695, %v1288_v14 }
 0x490   : > { %4551 = vpow2.f32 %v1395_v37  ;;  %2259 = vrot.lane.b32.xlu2 %v1823_v50, %s4765_s25  ;;  %v2409_v9 = vsel %vm7661_vm12, %v1545_v42, %v2168_v1  ;;  %v1407_v15 = vmul.f32 1.442695, %v1289_v43  ;;  %v1409_v29 = vmul.f32 1.442695, %v1290_v10  ;;  %v7801_v11 = vld [vmem:[#allocation78_spill] sm:$0xff]  ;;  %v7803_v1 = vld [vmem:[#allocation52_spill] sm:$0xff] }
 0x491   : > { %4553 = vpow2.f32 %v1397_v28  ;;  %2515 = vst [vmem:[#allocation6 + $0x180] sm:$0xff] %v2409_v9  ;;  %v1743_v50 = vmul.f32 %v7801_v11, %v5861_v55  ;;  %v7802_v28 = vld [vmem:[#allocation91_spill] sm:$0xff] }
 0x492   : > { %4555 = vpow2.f32 %v1399_v57  ;;  %v2220_v26 = vpop.permute.xlu2 %2219  ;;  %v2063_v14 = vmul.f32 %v7802_v28, %v5861_v55 }
 0x493   : > { %4557 = vpow2.f32 %v1401_v60  ;;  %v2419_v38 = vsel %vm7661_vm12, %v1699_v54, %v2220_v26  ;;  %v7804_v26 = vld [vmem:[#allocation87_spill] sm:$0xff] }
 0x494   : > { %4559 = vpow2.f32 %v1403_v35  ;;  %2469 = vst [vmem:[#allocation6 + $0x10] sm:$0xff] %v2419_v38  ;;  %v1939_v35 = vmul.f32 %v7803_v1, %v5697_v24  ;;  %v7805_v38 = vld [vmem:[#allocation74_spill] sm:$0xff]  ;;  %v7808_v1 = vld [vmem:[#allocation83_spill] sm:$0xff] }
 0x495   : > { %4561 = vpow2.f32 %v1405_v25  ;;  %v1664_v11 = vmul.f32 %v7805_v38, %v5945_v31 }
 0x496   : > { %v4552_v37 = vpop.eup %4551  ;;  %4563 = vpow2.f32 %v1407_v15 }
 0x497   : > { %v4554_v42 = vpop.eup %4553  ;;  %4565 = vpow2.f32 %v1409_v29  ;;  %1475 = vst [vmem:[#allocation5 + $0x180] sm:$0xff] %v4552_v37  ;;  %2227 = vrot.lane.b32.xlu1 %v1743_v50, %s4765_s25  ;;  %v1983_v29 = vmul.f32 %v7804_v26, %v5861_v55  ;;  %v7806_v50 = vld [vmem:[#allocation25_spill] sm:$0xff] }
 0x498   : > { %v4556_v43 = vpop.eup %4555  ;;  %1476 = vst [vmem:[#allocation5 + $0x188] sm:$0xff] %v4554_v42  ;;  %v6226_v57 = vpop.permute.xlu1 %2096  ;;  %2355 = vrot.lane.b32.xlu2 %v2063_v14, %s4765_s25  ;;  %v1540_v37 = vmul.f32 %v7806_v50, %v5752_v59 }
 0x499   : > { %v4558_v10 = vpop.eup %4557  ;;  %1477 = vst [vmem:[#allocation5 + $0x190] sm:$0xff] %v4556_v43 }
 0x49a   : > { %v4560_v60 = vpop.eup %4559  ;;  %1478 = vst [vmem:[#allocation5 + $0x198] sm:$0xff] %v4558_v10  ;;  %v2316_v61 = vpop.permute.xlu2 %2315  ;;  %v7807_v10 = vld [vmem:[#allocation70_spill] sm:$0xff] }
 0x49b   : > { %v4562_v54 = vpop.eup %4561  ;;  %1479 = vst [vmem:[#allocation5 + $0x1a0] sm:$0xff] %v4560_v60  ;;  %v2443_v9 = vsel %vm7661_vm12, %v1939_v35, %v2316_v61  ;;  %v1584_v60 = vmul.f32 %v7807_v10, %v5945_v31  ;;  %v1904_v35 = vmul.f32 %v7808_v1, %v5945_v31 }
 0x49c   : > { %v4564_v25 = vpop.eup %4563  ;;  %1480 = vst [vmem:[#allocation5 + $0x1a8] sm:$0xff] %v4562_v54  ;;  %v7809_v54 = vld [vmem:[#allocation38_spill] sm:$0xff] }
 0x49d   : > { %v4566_v15 = vpop.eup %4565  ;;  %1481 = vst [vmem:[#allocation5 + $0x1b0] sm:$0xff] %v4564_v25  ;;  %v1780_v25 = vmul.f32 %v7809_v54, %v5752_v59 }
 0x49e   : > { %1482 = vst [vmem:[#allocation5 + $0x1b8] sm:$0xff] %v4566_v15 }
 0x49f   : > { %2472 = vst [vmem:[#allocation6 + $0x28] sm:$0xff] %v2443_v9  ;;  %2323 = vrot.lane.b32.xlu1 %v1983_v29, %s4765_s25  ;;  %v7810_v9 = vld [vmem:[#allocation79_spill] sm:$0xff] }
 0x4a0   : > { %2197 = vrot.lane.b32.xlu2 %v1664_v11, %s4765_s25  ;;  %v1824_v15 = vmul.f32 %v7810_v9, %v5945_v31 }
 0x4a1   : > { %v2137_v28 = vpop.permute.xlu1 %2136 }
 0x4a2   : > { %v2146_v14 = vmul.f32 %v2137_v28, %v6159_v23  ;;  %v2158_v42 = vpop.permute.xlu2 %2157  ;;  %v1785_v28 = vmul.f32 %v6049_v16, %v6012_v7 }
 0x4a3   : > { %v2404_v43 = vsel %vm7661_vm12, %v1540_v37, %v2158_v42 }
 0x4a4   : > { %2475 = vst [vmem:[#allocation6 + $0x40] sm:$0xff] %v2404_v43  ;;  %2393 = vrot.lane.b32.xlu0 %v2146_v14, %s4765_s25 }
 0x4a7   : > { %2165 = vrot.lane.b32.xlu1 %v1584_v60, %s4765_s25 }
 0x4a8   : > { %2293 = vrot.lane.b32.xlu2 %v1904_v35, %s4765_s25 }
 0x4a9   : > { %v1200_v61 = vpop.permute.xlu1 %1199 }
 0x4aa   : > { %v1216_v26 = vsel %vm7661_vm12, %v6057_v3, %v1200_v61  ;;  %v2254_v29 = vpop.permute.xlu2 %2253  ;;  %v7811_v3 = vld [vmem:[#allocation36_spill] sm:$0xff] }
 0x4ab   : > { %v1291_v38 = vmul.f32 %v5582_v58, %v1216_v26  ;;  %v1292_v11 = vmul.f32 %v5584_v49, %v1216_v26  ;;  %v1293_v50 = vmul.f32 %v5586_v18, %v1216_v26  ;;  %v1294_v37 = vmul.f32 %v5588_v56, %v1216_v26  ;;  %v7812_v18 = vld [vmem:[#allocation92_spill] sm:$0xff] }
 0x4ac   : > { %v1295_v14 = vmul.f32 %v5591_v19, %v1216_v26  ;;  %v1296_v42 = vmul.f32 %v5593_v27, %v1216_v26  ;;  %v1297_v43 = vmul.f32 %v5595_v4, %v1216_v26  ;;  %2541 = vrot.lane.b32.xlu0 %v7811_v3, %s4749_s17  ;;  %v2428_v49 = vsel %vm7661_vm12, %v1780_v25, %v2254_v29  ;;  %v7813_v4 = vld [vmem:[#allocation30_spill] sm:$0xff]  ;;  %v7814_v25 = vld [vmem:[#allocation53_spill] sm:$0xff] }
 0x4ad   : > { %v1411_v10 = vmul.f32 1.442695, %v1291_v38  ;;  %v1413_v58 = vmul.f32 1.442695, %v1292_v11  ;;  %v1415_v60 = vmul.f32 1.442695, %v1293_v50  ;;  %v2144_v56 = vmul.f32 %v7812_v18, %v5945_v31 }
 0x4ae   : > { %v1298_v1 = vmul.f32 %v5598_v30, %v1216_v26  ;;  %v1417_v16 = vmul.f32 1.442695, %v1294_v37  ;;  %v2264_v35 = vpop.permute.xlu0 %2263  ;;  %v1419_v19 = vmul.f32 1.442695, %v1295_v14  ;;  %2478 = vst [vmem:[#allocation6 + $0x58] sm:$0xff] %v2428_v49  ;;  %v1619_v61 = vmul.f32 %v7813_v4, %v5697_v24  ;;  %v7815_v37 = vld [vmem:[#allocation88_spill] sm:$0xff] }
 0x4af   : > { %4567 = vpow2.f32 %v1411_v10  ;;  %2261 = vrot.lane.b32.xlu1 %v1824_v15, %s4765_s25  ;;  %v2433_v27 = vsel %vm7661_vm12, %v1785_v28, %v2264_v35  ;;  %v1421_v54 = vmul.f32 1.442695, %v1296_v42  ;;  %v2020_v30 = vmul.f32 %v7814_v25, %v5752_v59 }
 0x4b0   : > { %4569 = vpow2.f32 %v1413_v58  ;;  %2518 = vst [vmem:[#allocation6 + $0x198] sm:$0xff] %v2433_v27  ;;  %2389 = vrot.lane.b32.xlu2 %v2144_v56, %s4765_s25  ;;  %v1423_v9 = vmul.f32 1.442695, %v1297_v43  ;;  %v1425_v29 = vmul.f32 1.442695, %v1298_v1  ;;  %v2064_v28 = vmul.f32 %v7815_v37, %v5945_v31  ;;  %v7816_v58 = vld [vmem:[#allocation46_spill] sm:$0xff] }
 0x4b1   : > { %4571 = vpow2.f32 %v1415_v60  ;;  %v2188_v26 = vpop.permute.xlu1 %2187  ;;  %v1745_v42 = vmul.f32 %v6035_v39, %v6012_v7  ;;  %v1859_v60 = vmul.f32 %v7816_v58, %v5697_v24  ;;  %v7817_v56 = vld [vmem:[#allocation35_spill] sm:$0xff]  ;;  %v1665_v4 = vmul.f32 %v5994_v52, %v6012_v7 }
 0x4b2   : > { %4573 = vpow2.f32 %v1417_v16  ;;  %v2411_v15 = vsel %vm7661_vm12, %v1619_v61, %v2188_v26  ;;  %v2350_v38 = vpop.permute.xlu2 %2349  ;;  %v1621_v39 = vmul.f32 %v7817_v56, %v5791_v63  ;;  %v1985_v61 = vmul.f32 %v6121_v51, %v6012_v7  ;;  %v7823_v58 = vld [vmem:[#allocation71_spill] sm:$0xff] }
 0x4b3   : > { %4575 = vpow2.f32 %v1419_v19  ;;  %2468 = vst [vmem:[#allocation6 + $0x8] sm:$0xff] %v2411_v15  ;;  %v2452_v11 = vsel %vm7661_vm12, %v2020_v30, %v2350_v38  ;;  %v7819_v30 = vld [vmem:[#allocation51_spill] sm:$0xff]  ;;  %v1905_v51 = vmul.f32 %v6093_v45, %v6012_v7  ;;  %v1586_v38 = vmul.f32 %v6026_v62, %v6159_v23 }
 0x4b4   : > { %4577 = vpow2.f32 %v1421_v54  ;;  %2481 = vst [vmem:[#allocation6 + $0x70] sm:$0xff] %v2452_v11  ;;  %v7818_v54 = vld [vmem:[#allocation61_spill] sm:$0xff]  ;;  %v2145_v62 = vmul.f32 %v6183_v20, %v6012_v7 }
 0x4b5   : > { %v4568_v50 = vpop.eup %4567  ;;  %4579 = vpow2.f32 %v1423_v9  ;;  %v2099_v25 = vmul.f32 %v7818_v54, %v5697_v24  ;;  %v1861_v9 = vmul.f32 %v7819_v30, %v5791_v63  ;;  %v7820_v24 = vld [vmem:[#allocation31_spill] sm:$0xff] }
 0x4b6   : > { %v4570_v14 = vpop.eup %4569  ;;  %4581 = vpow2.f32 %v1425_v29  ;;  %1483 = vst [vmem:[#allocation5 + $0x1c0] sm:$0xff] %v4568_v50  ;;  %v1700_v11 = vmul.f32 %v7820_v24, %v5752_v59  ;;  %v7821_v50 = vld [vmem:[#allocation65_spill] sm:$0xff] }
 0x4b7   : > { %v4572_v43 = vpop.eup %4571  ;;  %1484 = vst [vmem:[#allocation5 + $0x1c8] sm:$0xff] %v4570_v14  ;;  %2357 = vrot.lane.b32.xlu1 %v2064_v28, %s4765_s25  ;;  %v2101_v37 = vmul.f32 %v7821_v50, %v5791_v63  ;;  %v7829_v24 = vld [vmem:[#allocation81_spill] sm:$0xff] }
 0x4b8   : > { %v4574_v3 = vpop.eup %4573  ;;  %1485 = vst [vmem:[#allocation5 + $0x1d0] sm:$0xff] %v4572_v43  ;;  %2231 = vrot.lane.b32.xlu2 %v1745_v42, %s4765_s25  ;;  %v1826_v43 = vmul.f32 %v6115_v21, %v6159_v23  ;;  %v1746_v21 = vmul.f32 %v6084_v0, %v6159_v23 }
 0x4b9   : > { %v4576_v10 = vpop.eup %4575  ;;  %1486 = vst [vmem:[#allocation5 + $0x1d8] sm:$0xff] %v4574_v3  ;;  %v2284_v49 = vpop.permute.xlu1 %2283  ;;  %v7822_v3 = vld [vmem:[#allocation47_spill] sm:$0xff] }
 0x4ba   : > { %v4578_v18 = vpop.eup %4577  ;;  %1487 = vst [vmem:[#allocation5 + $0x1e0] sm:$0xff] %v4576_v10  ;;  %v2192_v1 = vpop.permute.xlu2 %2191  ;;  %v2435_v35 = vsel %vm7661_vm12, %v1859_v60, %v2284_v49  ;;  %v1940_v10 = vmul.f32 %v7822_v3, %v5752_v59  ;;  %v1702_v60 = vmul.f32 %v7823_v58, %v5815_v33  ;;  %v7824_v59 = vld [vmem:[#allocation29_spill] sm:$0xff] }
 0x4bb   : > { %v4580_v16 = vpop.eup %4579  ;;  %1488 = vst [vmem:[#allocation5 + $0x1e8] sm:$0xff] %v4578_v18  ;;  %v2413_v27 = vsel %vm7661_vm12, %v1621_v39, %v2192_v1  ;;  %v2066_v39 = vmul.f32 %v6213_v46, %v6159_v23  ;;  %v1541_v1 = vmul.f32 %v7824_v59, %v5791_v63  ;;  %v1986_v46 = vmul.f32 %v6171_v34, %v6159_v23 }
 0x4bc   : > { %v4582_v19 = vpop.eup %4581  ;;  %1489 = vst [vmem:[#allocation5 + $0x1f0] sm:$0xff] %v4580_v16  ;;  %v7825_v16 = vld [vmem:[#allocation80_spill] sm:$0xff] }
 0x4bd   : > { %1490 = vst [vmem:[#allocation5 + $0x1f8] sm:$0xff] %v4582_v19 }
 0x4be   : > { %2471 = vst [vmem:[#allocation6 + $0x20] sm:$0xff] %v2435_v35  ;;  %v1942_v35 = vmul.f32 %v7825_v16, %v5815_v33 }
 0x4bf   : > { %2484 = vst [vmem:[#allocation6 + $0x88] sm:$0xff] %v2413_v27  ;;  %2199 = vrot.lane.b32.xlu1 %v1665_v4, %s4765_s25 }
 0x4c0   : > { %2327 = vrot.lane.b32.xlu2 %v1985_v61, %s4765_s25  ;;  %v7826_v61 = vld [vmem:[#allocation45_spill] sm:$0xff] }
 0x4c1   : > { %v2380_v26 = vpop.permute.xlu1 %2379  ;;  %v1781_v54 = vmul.f32 %v7826_v61, %v5791_v63 }
 0x4c2   : > { %v2459_v29 = vsel %vm7661_vm12, %v2099_v25, %v2380_v26  ;;  %v2288_v52 = vpop.permute.xlu2 %2287  ;;  %v7827_v25 = vld [vmem:[#allocation72_spill] sm:$0xff] }
 0x4c3   : > { %2474 = vst [vmem:[#allocation6 + $0x38] sm:$0xff] %v2459_v29  ;;  %v2437_v15 = vsel %vm7661_vm12, %v1861_v9, %v2288_v52  ;;  %v1543_v30 = vmul.f32 %v7827_v25, %v5861_v55  ;;  %v2025_v52 = vmul.f32 %v6136_v44, %v6012_v7  ;;  %v7836_v25 = vld [vmem:[#allocation76_spill] sm:$0xff] }
 0x4c4   : > { %2487 = vst [vmem:[#allocation6 + $0xa0] sm:$0xff] %v2437_v15 }
 0x4c7   : > { %2295 = vrot.lane.b32.xlu1 %v1905_v51, %s4765_s25 }
 0x4c8   : > { %2169 = vrot.lane.b32.xlu2 %v1586_v38, %s4765_s25 }
 0x4c9   : > { %v2222_v28 = vpop.permute.xlu1 %2221 }
 0x4ca   : > { %v2420_v14 = vsel %vm7661_vm12, %v1700_v11, %v2222_v28  ;;  %v2384_v42 = vpop.permute.xlu2 %2383  ;;  %v1783_v11 = vmul.f32 %v7829_v24, %v5861_v55  ;;  %v1626_v28 = vmul.f32 %v6040_v12, %v6159_v23  ;;  %v1866_v12 = vmul.f32 %v6129_v13, %v6159_v23 }
 0x4cb   : > { %2477 = vst [vmem:[#allocation6 + $0x50] sm:$0xff] %v2420_v14  ;;  %v2461_v45 = vsel %vm7661_vm12, %v2101_v37, %v2384_v42 }
 0x4cc   : > { %2490 = vst [vmem:[#allocation6 + $0xb8] sm:$0xff] %v2461_v45 }
 0x4cf   : > { %2391 = vrot.lane.b32.xlu1 %v2145_v62, %s4765_s25  ;;  %v7831_v62 = vld [vmem:[#allocation89_spill] sm:$0xff] }
 0x4d0   : > { %2265 = vrot.lane.b32.xlu2 %v1826_v43, %s4765_s25  ;;  %v2023_v43 = vmul.f32 %v7831_v62, %v5861_v55 }
 0x4d1   : > { %v2318_v49 = vpop.permute.xlu1 %2317 }
 0x4d2   : > { %v2444_v18 = vsel %vm7661_vm12, %v1940_v10, %v2318_v49  ;;  %v2226_v56 = vpop.permute.xlu2 %2225 }
 0x4d3   : > { %2480 = vst [vmem:[#allocation6 + $0x68] sm:$0xff] %v2444_v18  ;;  %v2422_v20 = vsel %vm7661_vm12, %v1702_v60, %v2226_v56  ;;  %v7832_v56 = vld [vmem:[#allocation75_spill] sm:$0xff] }
 0x4d4   : > { %2493 = vst [vmem:[#allocation6 + $0xd0] sm:$0xff] %v2422_v20  ;;  %v1862_v20 = vmul.f32 %v7832_v56, %v5815_v33 }
 0x4d7   : > { %2233 = vrot.lane.b32.xlu1 %v1746_v21, %s4765_s25  ;;  %v7833_v21 = vld [vmem:[#allocation73_spill] sm:$0xff] }
 0x4d8   : > { %2361 = vrot.lane.b32.xlu2 %v2066_v39, %s4765_s25  ;;  %v1624_v39 = vmul.f32 %v7833_v21, %v5945_v31 }
 0x4d9   : > { %v2160_v19 = vpop.permute.xlu1 %2159 }
 0x4da   : > { %v2405_v27 = vsel %vm7661_vm12, %v1541_v1, %v2160_v19  ;;  %v2322_v4 = vpop.permute.xlu2 %2321 }
 0x4db   : > { %2483 = vst [vmem:[#allocation6 + $0x80] sm:$0xff] %v2405_v27  ;;  %v2446_v0 = vsel %vm7661_vm12, %v1942_v35, %v2322_v4  ;;  %v7834_v35 = vld [vmem:[#allocation84_spill] sm:$0xff]  ;;  %v7835_v27 = vld [vmem:[#allocation82_spill] sm:$0xff] }
 0x4dc   : > { %2496 = vst [vmem:[#allocation6 + $0xe8] sm:$0xff] %v2446_v0  ;;  %v2102_v19 = vmul.f32 %v7834_v35, %v5815_v33  ;;  %v1864_v4 = vmul.f32 %v7835_v27, %v5945_v31 }
 0x4df   : > { %2329 = vrot.lane.b32.xlu1 %v1986_v46, %s4765_s25 }
 0x4e0   : > { %2543 = vrot.lane.b32.xlu2 %v5718_v8, %s4749_s17  ;;  %v7828_v8 = vld [vmem:[#allocation60_spill] sm:$0xff] }
 0x4e1   : > { %v2256_v9 = vpop.permute.xlu1 %2255  ;;  %v2021_v38 = vmul.f32 %v7828_v8, %v5791_v63  ;;  %v7830_v63 = vld [vmem:[#allocation66_spill] sm:$0xff]  ;;  %v1705_v8 = vmul.f32 %v6021_v5, %v6012_v7  ;;  %v1945_v5 = vmul.f32 %v6106_v47, %v6012_v7 }
 0x4e2   : > { %v2429_v26 = vsel %vm7661_vm12, %v1781_v54, %v2256_v9  ;;  %v2164_v29 = vpop.permute.xlu2 %2163  ;;  %v1622_v45 = vmul.f32 %v7830_v63, %v5815_v33  ;;  %v7837_v9 = vld [vmem:[#allocation90_spill] sm:$0xff] }
 0x4e3   : > { %2486 = vst [vmem:[#allocation6 + $0x98] sm:$0xff] %v2429_v26  ;;  %v2407_v34 = vsel %vm7661_vm12, %v1543_v30, %v2164_v29  ;;  %v1703_v30 = vmul.f32 %v7836_v25, %v5861_v55  ;;  %v2104_v26 = vmul.f32 %v7837_v9, %v5945_v31  ;;  %v2105_v9 = vmul.f32 %v6168_v36, %v6012_v7 }
 0x4e4   : > { %2499 = vst [vmem:[#allocation6 + $0x100] sm:$0xff] %v2407_v34 }
 0x4e5   : > { %v2360_v15 = vpop.permute.xlu0 %2359 }
 0x4e6   : > { %v2457_v51 = vsel %vm7661_vm12, %v2025_v52, %v2360_v15  ;;  %v7838_v15 = vld [vmem:[#allocation85_spill] sm:$0xff] }
 0x4e7   : > { %2521 = vst [vmem:[#allocation6 + $0x1b0] sm:$0xff] %v2457_v51  ;;  %2545 = vrot.lane.b32.xlu1 %v5740_v53, %s4749_s17  ;;  %v1943_v51 = vmul.f32 %v7838_v15, %v5861_v55 }
 0x4e9   : > { %v2352_v50 = vpop.permute.xlu1 %2351 }
 0x4ea   : > { %v2453_v44 = vsel %vm7661_vm12, %v2021_v38, %v2352_v50  ;;  %v2260_v37 = vpop.permute.xlu2 %2259 }
 0x4eb   : > { %2489 = vst [vmem:[#allocation6 + $0xb0] sm:$0xff] %v2453_v44  ;;  %v2431_v14 = vsel %vm7661_vm12, %v1783_v11, %v2260_v37  ;;  %v2106_v44 = vmul.f32 %v6226_v57, %v6159_v23  ;;  %v7840_v57 = vld [vmem:[#allocation77_spill] sm:$0xff] }
 0x4ec   : > { %2502 = vst [vmem:[#allocation6 + $0x118] sm:$0xff] %v2431_v14  ;;  %v7839_v14 = vld [vmem:[#allocation68_spill] sm:$0xff] }
 0x4ed   : > { %v2202_v42 = vpop.permute.xlu0 %2201  ;;  %v1544_v55 = vmul.f32 %v7839_v14, %v5945_v31 }
 0x4ee   : > { %v2418_v53 = vsel %vm7661_vm12, %v1626_v28, %v2202_v42 }
 0x4ef   : > { %2524 = vst [vmem:[#allocation6 + $0x1c8] sm:$0xff] %v2418_v53 }
 0x4f1   : > { %v2194_v3 = vpop.permute.xlu1 %2193 }
 0x4f2   : > { %v2414_v10 = vsel %vm7661_vm12, %v1622_v45, %v2194_v3  ;;  %v2356_v58 = vpop.permute.xlu2 %2355  ;;  %v1546_v3 = vmul.f32 %v6008_v41, %v6159_v23 }
 0x4f3   : > { %2492 = vst [vmem:[#allocation6 + $0xc8] sm:$0xff] %v2414_v10  ;;  %v2455_v60 = vsel %vm7661_vm12, %v2023_v43, %v2356_v58  ;;  %v1784_v43 = vmul.f32 %v7840_v57, %v5945_v31 }
 0x4f4   : > { %2505 = vst [vmem:[#allocation6 + $0x130] sm:$0xff] %v2455_v60  ;;  %v7841_v60 = vld [vmem:[#allocation86_spill] sm:$0xff] }
 0x4f5   : > { %v2298_v49 = vpop.permute.xlu0 %2297 }
 0x4f6   : > { %v2442_v18 = vsel %vm7661_vm12, %v1866_v12, %v2298_v49  ;;  %v2024_v49 = vmul.f32 %v7841_v60, %v5945_v31 }
 0x4f7   : > { %2527 = vst [vmem:[#allocation6 + $0x1e0] sm:$0xff] %v2442_v18  ;;  %v1786_v18 = vmul.f32 %v6099_v2, %v6159_v23 }
 0x4f9   : > { %v2290_v59 = vpop.permute.xlu1 %2289 }
 0x4fa   : > { %v2438_v1 = vsel %vm7661_vm12, %v1862_v20, %v2290_v59  ;;  %v2198_v16 = vpop.permute.xlu2 %2197  ;;  %v2026_v59 = vmul.f32 %v6192_v32, %v6159_v23 }
 0x4fb   : > { %2495 = vst [vmem:[#allocation6 + $0xe0] sm:$0xff] %v2438_v1  ;;  %v2416_v13 = vsel %vm7661_vm12, %v1624_v39, %v2198_v16  ;;  %v1625_v39 = vmul.f32 %v5959_v22, %v6012_v7 }
 0x4fc   : > { %2508 = vst [vmem:[#allocation6 + $0x148] sm:$0xff] %v2416_v13  ;;  %v1865_v13 = vmul.f32 %v6080_v17, %v6012_v7 }
 0x501   : > { %v2386_v0 = vpop.permute.xlu1 %2385 }
 0x502   : > { %v2462_v46 = vsel %vm7661_vm12, %v2102_v19, %v2386_v0  ;;  %v2294_v61 = vpop.permute.xlu2 %2293 }
 0x503   : > { %2498 = vst [vmem:[#allocation6 + $0xf8] sm:$0xff] %v2462_v46  ;;  %v2440_v54 = vsel %vm7661_vm12, %v1864_v4, %v2294_v61  ;;  %v2564_v4 = vld [vmem:[#allocation4] sm:$0xff] }
 0x504   : > { %2511 = vst [vmem:[#allocation6 + $0x160] sm:$0xff] %v2440_v54  ;;  %v2566_v22 = vperm.slane %v2564_v4, 0   ;;  %v2567_v0 = vperm.slane %v2564_v4, 1   ;;  %v2568_v32 = vperm.slane %v2564_v4, 2   ;;  %v2569_v46 = vperm.slane %v2564_v4, 3  }
 0x505   : > { %v2570_v61 = vperm.slane %v2564_v4, 4   ;;  %v2571_v54 = vperm.slane %v2564_v4, 5   ;;  %v2572_v25 = vperm.slane %v2564_v4, 6  }
 0x509   : > { %v2228_v29 = vpop.permute.xlu1 %2227 }
 0x50a   : > { %v2423_v33 = vsel %vm7661_vm12, %v1703_v30, %v2228_v29  ;;  %v2390_v52 = vpop.permute.xlu2 %2389  ;;  %v2573_v30 = vperm.slane %v2564_v4, 7   ;;  %v1706_v29 = vmul.f32 %v6069_v6, %v6159_v23 }
 0x50b   : > { %2501 = vst [vmem:[#allocation6 + $0x110] sm:$0xff] %v2423_v33  ;;  %v2464_v34 = vsel %vm7661_vm12, %v2104_v26, %v2390_v52 }
 0x50c   : > { %2514 = vst [vmem:[#allocation6 + $0x178] sm:$0xff] %v2464_v34  ;;  %v1946_v34 = vmul.f32 %v6151_v48, %v6159_v23 }
 0x511   : > { %v2324_v38 = vpop.permute.xlu1 %2323 }
 0x512   : > { %v2447_v24 = vsel %vm7661_vm12, %v1943_v51, %v2324_v38  ;;  %v2232_v11 = vpop.permute.xlu2 %2231 }
 0x513   : > { %2504 = vst [vmem:[#allocation6 + $0x128] sm:$0xff] %v2447_v24  ;;  %v2425_v50 = vsel %vm7661_vm12, %v1705_v8, %v2232_v11 }
 0x514   : > { %2517 = vst [vmem:[#allocation6 + $0x190] sm:$0xff] %v2425_v50 }
 0x516   : > { %v2394_v37 = vpop.permute.xlu0 %2393 }
 0x517   : > { %v2466_v28 = vsel %vm7661_vm12, %v2106_v44, %v2394_v37 }
 0x518   : > { %2530 = vst [vmem:[#allocation6 + $0x1f8] sm:$0xff] %v2466_v28 }
 0x519   : > { %v2166_v42 = vpop.permute.xlu1 %2165 }
 0x51a   : > { %v2408_v53 = vsel %vm7661_vm12, %v1544_v55, %v2166_v42  ;;  %v2328_v63 = vpop.permute.xlu2 %2327 }
 0x51b   : > { %2507 = vst [vmem:[#allocation6 + $0x140] sm:$0xff] %v2408_v53  ;;  %v2449_v45 = vsel %vm7661_vm12, %v1945_v5, %v2328_v63 }
 0x51c   : > { %2520 = vst [vmem:[#allocation6 + $0x1a8] sm:$0xff] %v2449_v45 }
 0x51e   : > { %v2542_v62 = vpop.permute.xlu0 %2541 }
 0x51f   : > { %2561 = vst.msk [vmem:[#allocation7 + $0x28] sm:$0xff] %vm2555_vm2, %v2542_v62 }
 0x521   : > { %v2262_v10 = vpop.permute.xlu1 %2261 }
 0x522   : > { %v2432_v47 = vsel %vm7661_vm12, %v1784_v43, %v2262_v10  ;;  %v2170_v58 = vpop.permute.xlu2 %2169 }
 0x523   : > { %2510 = vst [vmem:[#allocation6 + $0x158] sm:$0xff] %v2432_v47  ;;  %v2410_v12 = vsel %vm7661_vm12, %v1546_v3, %v2170_v58 }
 0x524   : > { %2523 = vst [vmem:[#allocation6 + $0x1c0] sm:$0xff] %v2410_v12 }
 0x529   : > { %v2358_v56 = vpop.permute.xlu1 %2357 }
 0x52a   : > { %v2456_v20 = vsel %vm7661_vm12, %v2024_v49, %v2358_v56  ;;  %v2266_v21 = vpop.permute.xlu2 %2265 }
 0x52b   : > { %2513 = vst [vmem:[#allocation6 + $0x170] sm:$0xff] %v2456_v20  ;;  %v2434_v41 = vsel %vm7661_vm12, %v1786_v18, %v2266_v21 }
 0x52c   : > { %2526 = vst [vmem:[#allocation6 + $0x1d8] sm:$0xff] %v2434_v41 }
 0x531   : > { %v2200_v1 = vpop.permute.xlu1 %2199 }
 0x532   : > { %v2417_v31 = vsel %vm7661_vm12, %v1625_v39, %v2200_v1  ;;  %v2362_v16 = vpop.permute.xlu2 %2361 }
 0x533   : > { %2516 = vst [vmem:[#allocation6 + $0x188] sm:$0xff] %v2417_v31  ;;  %v2458_v2 = vsel %vm7661_vm12, %v2026_v59, %v2362_v16 }
 0x534   : > { %2529 = vst [vmem:[#allocation6 + $0x1f0] sm:$0xff] %v2458_v2 }
 0x539   : > { %v2296_v35 = vpop.permute.xlu1 %2295 }
 0x53a   : > { %v2441_v19 = vsel %vm7661_vm12, %v1865_v13, %v2296_v35  ;;  %v2544_v27 = vpop.permute.xlu2 %2543 }
 0x53b   : > { %2519 = vst [vmem:[#allocation6 + $0x1a0] sm:$0xff] %v2441_v19 }
 0x53c   : > { %2562 = vst.msk [vmem:[#allocation7 + $0x30] sm:$0xff] %vm2555_vm2, %v2544_v27 }
 0x541   : > { %v2392_v17 = vpop.permute.xlu1 %2391 }
 0x542   : > { %v2465_v26 = vsel %vm7661_vm12, %v2105_v9, %v2392_v17 }
 0x543   : > { %2522 = vst [vmem:[#allocation6 + $0x1b8] sm:$0xff] %v2465_v26 }
 0x549   : > { %v2234_v33 = vpop.permute.xlu1 %2233 }
 0x54a   : > { %v2426_v52 = vsel %vm7661_vm12, %v1706_v29, %v2234_v33 }
 0x54b   : > { %2525 = vst [vmem:[#allocation6 + $0x1d0] sm:$0xff] %v2426_v52 }
 0x551   : > { %v2330_v15 = vpop.permute.xlu1 %2329 }
 0x552   : > { %v2450_v51 = vsel %vm7661_vm12, %v1946_v34, %v2330_v15 }
 0x553   : > { %2528 = vst [vmem:[#allocation6 + $0x1e8] sm:$0xff] %v2450_v51 }
 0x559   : > { %v2546_v8 = vpop.permute.xlu1 %2545 }
 0x55a   : > { %2563 = vst.msk [vmem:[#allocation7 + $0x38] sm:$0xff] %vm2555_vm2, %v2546_v8 }
 0x55b LB: >> { %v4766_v7 = vmov 3   ;;  %v4767_v6 = vmov 0   ;;  %s6479_s12 = sshll.u32 %s4744_s30, 3  ;;  %v4768_v23 = vmov 5   ;;  %v4769_v36 = vmov 1   ;;  %s4782_s24 = smov 64   ;;  %s4744_s30 = sphi %s6455_s30, %s2587_s30   ;;  %v4740_v22 = vphi %v2566_v22, %v7925_v22   ;;  %v4736_v0 = vphi %v2567_v0, %v7924_v0   ;;  %v4732_v32 = vphi %v2568_v32, %v7923_v32   ;;  %v4728_v46 = vphi %v2569_v46, %v7922_v46   ;;  %v4724_v61 = vphi %v2570_v61, %v7921_v61   ;;  %v4720_v54 = vphi %v2571_v54, %v7920_v54   ;;  %v4716_v25 = vphi %v2572_v25, %v7919_v25   ;;  %v4712_v30 = vphi %v2573_v30, %v7918_v30  }
 0x55c   : >> { %4587 = vset.pattern.permute.xlu2 %v4766_v7  ;;  %4584 = vset.pattern.permute.xlu0 %v4767_v6  ;;  %s2620_s13 = scalar_lea.vmem [#allocation7], %s6479_s12  ;;  %s2597_s15 = sshra.s32 %s6479_s12, 3  ;;  %v4770_v44 = vmov 7   ;;  %v4771_v28 = vmov 15   ;;  %v4772_v53 = vmov 2   ;;  %v4773_v43 = vmov 9  }
 0x55d   : >> { %s4074_s16 = sshll.u32 %s2597_s15, 6  ;;  %4586 = vset.pattern.permute.xlu1 %v4772_v53  ;;  %v4774_v56 = vmov 4   ;;  %v4775_v1 = vmov 11   ;;  %v4776_v9 = vmov 6   ;;  %v4777_v15 = vmov 13   ;;  %s3501_s26 = scalar_lea.vmem [#allocation8], %s6479_s12 }
 0x55e   : >> { %s6489_s17 = scalar_lea.vmem [#allocation5], %s4074_s16  ;;  %s6495_s18 = scalar_lea.vmem [#allocation6], %s4074_s16  ;;  %vm3487_vm2 = vcmask 1040384   ;;  %vm7663_vm6 = vcmask 1041408   ;;  %vm3491_vm7 = vcmask 1042432   ;;  %vm7662_vm8 = vcmask 1043456  }
 0x55f   : >> { %v6492_v38 = vld [vmem:[%s6489_s17 + $0x8] sm:$0xff]  ;;  %v6511_v5 = vld [vmem:[%s6489_s17 + $0x10] sm:$0xff]  ;;  %v6531_v12 = vld [vmem:[%s6489_s17 + $0x18] sm:$0xff]  ;;  %vm3495_vm9 = vcmask 1044480   ;;  %vm3497_vm10 = vcmask 1045504   ;;  %vm3499_vm11 = vcmask 1046528  }
 0x560   : >> { %v2623_v24 = vmul.f32 %v4736_v0, %v6492_v38  ;;  %v6498_v11 = vld [vmem:[%s6495_s18 + $0x8] sm:$0xff]  ;;  %v2624_v42 = vmul.f32 %v4732_v32, %v6511_v5  ;;  %v6515_v63 = vld [vmem:[%s6495_s18 + $0x10] sm:$0xff]  ;;  %v2625_v49 = vmul.f32 %v4728_v46, %v6531_v12  ;;  %v6539_v20 = vld [vmem:[%s6495_s18 + $0x18] sm:$0xff]  ;;  %s2587_s30 = sadd.s32 1, %s4744_s30  }
 0x561   : >> { %v6482_v48 = vld [vmem:[%s2620_s13] sm:$0xff]  ;;  %p2584_p8 = scmp.ge.s32.totalorder %s2587_s30, 8  }
 0x562   : >> { %2661 = vperm.xlu2 %4587, %v6482_v48   ;;  %2640 = vperm.xlu0 %4584, %v6482_v48   ;;  %v6501_v50 = vadd.f32 %v2623_v24, %v6498_v11  ;;  %v6520_v62 = vadd.f32 %v2624_v42, %v6515_v63  ;;  %v6544_v41 = vadd.f32 %v2625_v49, %v6539_v20  ;;  %v6560_v27 = vld [vmem:[%s6489_s17 + $0x20] sm:$0xff] }
 0x563   : >> { %2655 = vperm.xlu1 %4586, %v6482_v48   ;;  %v2626_v32 = vmul.f32 %v4724_v61, %v6560_v27  ;;  %v6572_v17 = vld [vmem:[%s6495_s18 + $0x20] sm:$0xff] }
 0x564   : >> { %7842 = vst [vmem:[#allocation94_spill] sm:$0xff] %v6501_v50  ;;  %v2775_v37 = vrot.slane %v6501_v50, 7  ;;  %v2776_v3 = vrot.slane %v6520_v62, 7  ;;  %v2777_v31 = vrot.slane %v6544_v41, 7 }
 0x565   : >> { %v6578_v33 = vadd.f32 %v2626_v32, %v6572_v17 }
 0x566   : >> { %v2791_v14 = vmul.f32 %v2775_v37, %v6492_v38  ;;  %v2792_v47 = vmul.f32 %v2776_v3, %v6511_v5  ;;  %v2793_v13 = vmul.f32 %v2777_v31, %v6531_v12  ;;  %v6601_v37 = vld [vmem:[%s6489_s17 + $0x28] sm:$0xff] }
 0x567   : >> { %v2778_v51 = vrot.slane %v6578_v33, 7  ;;  %v2627_v42 = vmul.f32 %v4720_v54, %v6601_v37 }
 0x568   : >> { %v6508_v55 = vadd.f32 %v2791_v14, %v6498_v11  ;;  %v6534_v60 = vadd.f32 %v2792_v47, %v6515_v63  ;;  %v6563_v4 = vadd.f32 %v2793_v13, %v6539_v20 }
 0x56a   : >> { %4589 = vset.pattern.permute.xlu2 %v4768_v23  ;;  %4585 = vset.pattern.permute.xlu0 %v4769_v36  ;;  %v2878_v45 = vrot.slane %v6508_v55, 7  ;;  %v2879_v21 = vrot.slane %v6534_v60, 7  ;;  %v2880_v26 = vrot.slane %v6563_v4, 7  ;;  %v2794_v23 = vmul.f32 %v2778_v51, %v6560_v27 }
 0x56b   : >> { %2677 = vperm.xlu2 %4589, %v6482_v48   ;;  %2645 = vperm.xlu0 %4585, %v6482_v48  }
 0x56c   : >> { %v2894_v57 = vmul.f32 %v2878_v45, %v6492_v38  ;;  %4588 = vset.pattern.permute.xlu1 %v4774_v56  ;;  %v2895_v59 = vmul.f32 %v2879_v21, %v6511_v5  ;;  %v2896_v61 = vmul.f32 %v2880_v26, %v6531_v12  ;;  %v6628_v56 = vld [vmem:[%s6495_s18] sm:$0xff] }
 0x56d   : >> { %2671 = vperm.xlu1 %4588, %v6482_v48  }
 0x56e   : >> { %v6526_v10 = vadd.f32 %v2894_v57, %v6498_v11  ;;  %v6554_v2 = vadd.f32 %v2895_v59, %v6515_v63  ;;  %v6588_v8 = vadd.f32 %v2896_v61, %v6539_v20  ;;  %v6611_v57 = vld [vmem:[%s6489_s17] sm:$0xff]  ;;  %v6656_v61 = vld [vmem:[%s6489_s17 + $0x30] sm:$0xff] }
 0x56f   : >> { %v2628_v51 = vmul.f32 %v4716_v25, %v6656_v61 }
 0x570   : >> { %v2981_v58 = vrot.slane %v6526_v10, 7  ;;  %7843 = vst [vmem:[#allocation95_spill] sm:$0xff] %v6554_v2  ;;  %v2982_v19 = vrot.slane %v6554_v2, 7  ;;  %v2983_v36 = vrot.slane %v6588_v8, 7 }
 0x572   : >> { %v2997_v18 = vmul.f32 %v2981_v58, %v6492_v38  ;;  %v2998_v46 = vmul.f32 %v2982_v19, %v6511_v5  ;;  %v2999_v53 = vmul.f32 %v2983_v36, %v6531_v12  ;;  %v2622_v58 = vmul.f32 %v4740_v22, %v6611_v57 }
 0x573   : >> { %4591 = vset.pattern.permute.xlu2 %v4770_v44  ;;  %4600 = vset.pattern.permute.xlu0 %v4771_v28  ;;  %v6598_v44 = vadd.f32 %v2794_v23, %v6572_v17 }
 0x574   : >> { %2693 = vperm.xlu2 %4591, %v6482_v48   ;;  %v6547_v39 = vadd.f32 %v2997_v18, %v6498_v11  ;;  %v6581_v52 = vadd.f32 %v2998_v46, %v6515_v63  ;;  %v6624_v54 = vadd.f32 %v2999_v53, %v6539_v20  ;;  %v6636_v22 = vadd.f32 %v2622_v58, %v6628_v56 }
 0x575   : >> { %4590 = vset.pattern.permute.xlu1 %v4776_v9  ;;  %v2881_v3 = vrot.slane %v6598_v44, 7 }
 0x576   : >> { %v3084_v16 = vrot.slane %v6547_v39, 7  ;;  %2687 = vperm.xlu1 %4590, %v6482_v48   ;;  %7845 = vst [vmem:[#allocation97_spill] sm:$0xff] %v6581_v52  ;;  %v3085_v6 = vrot.slane %v6581_v52, 7  ;;  %v3086_v13 = vrot.slane %v6624_v54, 7 }
 0x577   : >> { %7848 = vst [vmem:[#allocation100_spill] sm:$0xff] %v6624_v54  ;;  %v2897_v21 = vmul.f32 %v2881_v3, %v6560_v27 }
 0x578   : >> { %v3100_v35 = vmul.f32 %v3084_v16, %v6492_v38  ;;  %v3101_v24 = vmul.f32 %v3085_v6, %v6511_v5  ;;  %v3102_v9 = vmul.f32 %v3086_v13, %v6531_v12 }
 0x579   : >> { %v6642_v16 = vadd.f32 %v2897_v21, %v6572_v17 }
 0x57a   : >> { %v6566_v0 = vadd.f32 %v3100_v35, %v6498_v11  ;;  %v6608_v45 = vadd.f32 %v3101_v24, %v6515_v63  ;;  %v6665_v23 = vadd.f32 %v3102_v9, %v6539_v20  ;;  %v6675_v24 = vld [vmem:[%s6495_s18 + $0x30] sm:$0xff] }
 0x57b   : >> { %v2984_v46 = vrot.slane %v6642_v16, 7  ;;  %v6680_v25 = vadd.f32 %v2628_v51, %v6675_v24 }
 0x57c   : >> { %4593 = vset.pattern.permute.xlu2 %v4773_v43  ;;  %7844 = vst [vmem:[#allocation96_spill] sm:$0xff] %v6566_v0  ;;  %v3187_v29 = vrot.slane %v6566_v0, 7  ;;  %v6614_v43 = vld [vmem:[%s6495_s18 + $0x28] sm:$0xff]  ;;  %v3188_v18 = vrot.slane %v6608_v45, 7  ;;  %v3189_v53 = vrot.slane %v6665_v23, 7 }
 0x57d   : >> { %2709 = vperm.xlu2 %4593, %v6482_v48   ;;  %7847 = vst [vmem:[#allocation99_spill] sm:$0xff] %v6608_v45  ;;  %v6621_v49 = vadd.f32 %v2627_v42, %v6614_v43  ;;  %v3000_v6 = vmul.f32 %v2984_v46, %v6560_v27 }
 0x57e   : >> { %v3203_v34 = vmul.f32 %v3187_v29, %v6492_v38  ;;  %v3204_v31 = vmul.f32 %v3188_v18, %v6511_v5  ;;  %7851 = vst [vmem:[#allocation103_spill] sm:$0xff] %v6665_v23  ;;  %v2780_v18 = vrot.slane %v6680_v25, 7  ;;  %v3205_v21 = vmul.f32 %v3189_v53, %v6531_v12 }
 0x580   : >> { %v6591_v7 = vadd.f32 %v3203_v34, %v6498_v11  ;;  %v6649_v32 = vadd.f32 %v3204_v31, %v6515_v63 }
 0x582   : >> { %7846 = vst [vmem:[#allocation98_spill] sm:$0xff] %v6591_v7  ;;  %v3290_v14 = vrot.slane %v6591_v7, 7  ;;  %v3291_v42 = vrot.slane %v6649_v32, 7 }
 0x583   : >> { %7850 = vst [vmem:[#allocation102_spill] sm:$0xff] %v6649_v32 }
 0x584   : >> { %v3306_v47 = vmul.f32 %v3290_v14, %v6492_v38  ;;  %v3307_v58 = vmul.f32 %v3291_v42, %v6511_v5 }
 0x585   : >> { %4595 = vset.pattern.permute.xlu2 %v4775_v1  ;;  %v2779_v1 = vrot.slane %v6621_v49, 7 }
 0x586   : >> { %2725 = vperm.xlu2 %4595, %v6482_v48   ;;  %v6632_v59 = vadd.f32 %v3306_v47, %v6498_v11  ;;  %v6686_v47 = vadd.f32 %v3000_v6, %v6572_v17  ;;  %v4779_v6 = vmov 10  }
 0x587   : >> { %v2795_v19 = vmul.f32 %v2779_v1, %v6601_v37 }
 0x588   : >> { %7849 = vst [vmem:[#allocation101_spill] sm:$0xff] %v6632_v59  ;;  %v3393_v35 = vrot.slane %v6632_v59, 7  ;;  %v3087_v13 = vrot.slane %v6686_v47, 7 }
 0x589   : >> { %v6659_v34 = vadd.f32 %v2795_v19, %v6614_v43  ;;  %7853 = vst [vmem:[#allocation104_spill] sm:$0xff] %v6686_v47  ;;  %v2796_v19 = vmul.f32 %v2780_v18, %v6656_v61 }
 0x58a   : >> { %v3409_v26 = vmul.f32 %v3393_v35, %v6492_v38  ;;  %v6697_v35 = vadd.f32 %v3307_v58, %v6515_v63 }
 0x58b   : >> { %v2882_v14 = vrot.slane %v6659_v34, 7 }
 0x58c   : >> { %v6668_v36 = vadd.f32 %v3409_v26, %v6498_v11  ;;  %7854 = vst [vmem:[#allocation105_spill] sm:$0xff] %v6697_v35  ;;  %v3103_v26 = vmul.f32 %v3087_v13, %v6560_v27  ;;  %v3394_v51 = vrot.slane %v6697_v35, 7 }
 0x58d   : >> { %v2898_v3 = vmul.f32 %v2882_v14, %v6601_v37 }
 0x58e   : >> { %4597 = vset.pattern.permute.xlu2 %v4777_v15  ;;  %v4778_v15 = vmov 8   ;;  %7852 = vst [vmem:[#allocation27_spill] sm:$0xff] %v6668_v36  ;;  %v3410_v18 = vmul.f32 %v3394_v51, %v6511_v5 }
 0x58f   : >> { %2741 = vperm.xlu2 %4597, %v6482_v48   ;;  %4592 = vset.pattern.permute.xlu1 %v4778_v15  ;;  %v6693_v31 = vadd.f32 %v2898_v3, %v6614_v43  ;;  %v6712_v15 = vadd.f32 %v2796_v19, %v6675_v24  ;;  %v6724_v3 = vld [vmem:[%s6495_s18 + $0x38] sm:$0xff] }
 0x590   : >> { %2703 = vperm.xlu1 %4592, %v6482_v48  }
 0x591   : >> { %v2985_v9 = vrot.slane %v6693_v31, 7  ;;  %v2883_v58 = vrot.slane %v6712_v15, 7 }
 0x593   : >> { %v3001_v53 = vmul.f32 %v2985_v9, %v6601_v37  ;;  %v2899_v9 = vmul.f32 %v2883_v58, %v6656_v61 }
 0x595   : >> { %v6734_v13 = vadd.f32 %v3001_v53, %v6614_v43 }
 0x597   : >> { %4599 = vset.pattern.permute.xlu2 %v4771_v28  ;;  %v2774_v28 = vrot.slane %v6636_v22, 7  ;;  %7857 = vst [vmem:[#allocation108_spill] sm:$0xff] %v6734_v13 }
 0x598   : >> { %2757 = vperm.xlu2 %4599, %v6482_v48   ;;  %4594 = vset.pattern.permute.xlu1 %v4779_v6 }
 0x599   : >> { %v2790_v29 = vmul.f32 %v2774_v28, %v6611_v57  ;;  %v6701_v28 = vadd.f32 %v3205_v21, %v6539_v20  ;;  %2719 = vperm.xlu1 %4594, %v6482_v48  }
 0x59b   : >> { %v6672_v38 = vadd.f32 %v2790_v29, %v6628_v56  ;;  %7855 = vst [vmem:[#allocation106_spill] sm:$0xff] %v6701_v28  ;;  %v6709_v29 = vld [vmem:[%s6489_s17 + $0x38] sm:$0xff]  ;;  %v3292_v21 = vrot.slane %v6701_v28, 7 }
 0x59c   : >> { %v2629_v14 = vmul.f32 %v4712_v30, %v6709_v29 }
 0x59d   : >> { %v2877_v11 = vrot.slane %v6672_v38, 7  ;;  %v3308_v6 = vmul.f32 %v3292_v21, %v6531_v12 }
 0x59f   : >> { %v2893_v1 = vmul.f32 %v2877_v11, %v6611_v57  ;;  %v6720_v11 = vadd.f32 %v3103_v26, %v6572_v17  ;;  %v6739_v26 = vadd.f32 %v3410_v18, %v6515_v63  ;;  %v6751_v53 = vadd.f32 %v3308_v6, %v6539_v20 }
 0x5a0   : >> { %v3088_v18 = vrot.slane %v6734_v13, 7  ;;  %v4780_v6 = vmov 12  }
 0x5a1   : >> { %v6704_v46 = vadd.f32 %v2893_v1, %v6628_v56  ;;  %7856 = vst [vmem:[#allocation107_spill] sm:$0xff] %v6720_v11  ;;  %v6730_v1 = vadd.f32 %v2629_v14, %v6724_v3  ;;  %v3190_v19 = vrot.slane %v6720_v11, 7  ;;  %v3395_v40 = vrot.slane %v6751_v53, 7  ;;  %4596 = vset.pattern.permute.xlu1 %v4780_v6 }
 0x5a2   : >> { %7858 = vst [vmem:[#allocation43_spill] sm:$0xff] %v6739_v26  ;;  %2735 = vperm.xlu1 %4596, %v6482_v48  }
 0x5a3   : >> { %v2980_v42 = vrot.slane %v6704_v46, 7  ;;  %v2781_v5 = vrot.slane %v6730_v1, 7  ;;  %v3206_v14 = vmul.f32 %v3190_v19, %v6560_v27  ;;  %7859 = vst [vmem:[#allocation109_spill] sm:$0xff] %v6751_v53  ;;  %v3411_v28 = vmul.f32 %v3395_v40, %v6531_v12 }
 0x5a5   : >> { %v2996_v30 = vmul.f32 %v2980_v42, %v6611_v57  ;;  %v6748_v42 = vadd.f32 %v2899_v9, %v6675_v24  ;;  %v2797_v58 = vmul.f32 %v2781_v5, %v6709_v29  ;;  %v6755_v63 = vadd.f32 %v3206_v14, %v6572_v17 }
 0x5a6   : >> { %v3104_v9 = vmul.f32 %v3088_v18, %v6601_v37 }
 0x5a7   : >> { %v6744_v51 = vadd.f32 %v2996_v30, %v6628_v56  ;;  %7860 = vst [vmem:[#allocation110_spill] sm:$0xff] %v6755_v63  ;;  %v2986_v21 = vrot.slane %v6748_v42, 7  ;;  %v6762_v19 = vadd.f32 %v2797_v58, %v6724_v3  ;;  %v3293_v32 = vrot.slane %v6755_v63, 7 }
 0x5a8   : >> { %v6772_v53 = vadd.f32 %v3104_v9, %v6614_v43 }
 0x5a9   : >> { %v3083_v30 = vrot.slane %v6744_v51, 7  ;;  %v3002_v5 = vmul.f32 %v2986_v21, %v6656_v61  ;;  %v2884_v7 = vrot.slane %v6762_v19, 7  ;;  %v6781_v21 = vadd.f32 %v3411_v28, %v6539_v20 }
 0x5aa   : >> { %7861 = vst [vmem:[#allocation111_spill] sm:$0xff] %v6772_v53  ;;  %v3309_v40 = vmul.f32 %v3293_v32, %v6560_v27 }
 0x5ab   : >> { %v3099_v14 = vmul.f32 %v3083_v30, %v6611_v57  ;;  %v6775_v58 = vadd.f32 %v3002_v5, %v6675_v24  ;;  %7863 = vst [vmem:[#allocation58_spill] sm:$0xff] %v6781_v21  ;;  %v2900_v12 = vmul.f32 %v2884_v7, %v6709_v29  ;;  %v3191_v30 = vrot.slane %v6772_v53, 7 }
 0x5ac   : >> { %v6788_v9 = vadd.f32 %v3309_v40, %v6572_v17  ;;  %v4781_v21 = vmov 14  }
 0x5ad   : >> { %7862 = vst [vmem:[#allocation112_spill] sm:$0xff] %v6775_v58  ;;  %v6778_v18 = vadd.f32 %v3099_v14, %v6628_v56  ;;  %v6791_v5 = vadd.f32 %v2900_v12, %v6724_v3  ;;  %v3089_v14 = vrot.slane %v6775_v58, 7  ;;  %v3207_v63 = vmul.f32 %v3191_v30, %v6601_v37  ;;  %4598 = vset.pattern.permute.xlu1 %v4781_v21 }
 0x5ae   : >> { %7864 = vst [vmem:[#allocation113_spill] sm:$0xff] %v6788_v9  ;;  %v3396_v32 = vrot.slane %v6788_v9, 7  ;;  %2751 = vperm.xlu1 %4598, %v6482_v48  }
 0x5af   : >> { %v3186_v6 = vrot.slane %v6778_v18, 7  ;;  %7865 = vst [vmem:[#allocation114_spill] sm:$0xff] %v6791_v5  ;;  %v2987_v7 = vrot.slane %v6791_v5, 7  ;;  %v3105_v28 = vmul.f32 %v3089_v14, %v6656_v61  ;;  %v6800_v35 = vadd.f32 %v3207_v63, %v6614_v43 }
 0x5b0   : >> { %v3412_v12 = vmul.f32 %v3396_v32, %v6560_v27 }
 0x5b1   : >> { %v3202_v20 = vmul.f32 %v3186_v6, %v6611_v57  ;;  %7866 = vst [vmem:[#allocation115_spill] sm:$0xff] %v6800_v35  ;;  %v3003_v30 = vmul.f32 %v2987_v7, %v6709_v29  ;;  %v6808_v6 = vadd.f32 %v3105_v28, %v6675_v24  ;;  %v3294_v9 = vrot.slane %v6800_v35, 7 }
 0x5b2   : >> { %v6814_v63 = vadd.f32 %v3412_v12, %v6572_v17 }
 0x5b3   : >> { %v6803_v40 = vadd.f32 %v3202_v20, %v6628_v56  ;;  %7867 = vst [vmem:[#allocation116_spill] sm:$0xff] %v6808_v6  ;;  %v3192_v20 = vrot.slane %v6808_v6, 7  ;;  %v3310_v27 = vmul.f32 %v3294_v9, %v6601_v37  ;;  %v6819_v21 = vadd.f32 %v3003_v30, %v6724_v3 }
 0x5b4   : >> { %7868 = vst [vmem:[#allocation28_spill] sm:$0xff] %v6814_v63 }
 0x5b5   : >> { %v3289_v14 = vrot.slane %v6803_v40, 7  ;;  %7869 = vst [vmem:[#allocation117_spill] sm:$0xff] %v6819_v21  ;;  %v3208_v7 = vmul.f32 %v3192_v20, %v6656_v61  ;;  %v6824_v28 = vadd.f32 %v3310_v27, %v6614_v43  ;;  %v3090_v35 = vrot.slane %v6819_v21, 7 }
 0x5b7   : >> { %v3305_v32 = vmul.f32 %v3289_v14, %v6611_v57  ;;  %7870 = vst [vmem:[#allocation118_spill] sm:$0xff] %v6824_v28  ;;  %v3106_v12 = vmul.f32 %v3090_v35, %v6709_v29  ;;  %v6836_v30 = vadd.f32 %v3208_v7, %v6675_v24  ;;  %v3397_v20 = vrot.slane %v6824_v28, 7 }
 0x5b9   : >> { %v6830_v17 = vadd.f32 %v3305_v32, %v6628_v56  ;;  %7871 = vst [vmem:[#allocation119_spill] sm:$0xff] %v6836_v30  ;;  %v6842_v27 = vadd.f32 %v3106_v12, %v6724_v3  ;;  %v3295_v63 = vrot.slane %v6836_v30, 7 }
 0x5bb   : >> { %v3392_v14 = vrot.slane %v6830_v17, 7  ;;  %7872 = vst [vmem:[#allocation120_spill] sm:$0xff] %v6842_v27  ;;  %v3193_v35 = vrot.slane %v6842_v27, 7  ;;  %v3311_v59 = vmul.f32 %v3295_v63, %v6656_v61 }
 0x5bc   : >> { %v6826_v48 = vpop.permute.xlu2 %2661 }
 0x5bd   : >> { %v2664_v9 = vmul.f32 %v6826_v48, %v6501_v50  ;;  %v3408_v32 = vmul.f32 %v3392_v14, %v6611_v57  ;;  %v3413_v50 = vmul.f32 %v3397_v20, %v6601_v37  ;;  %v3209_v28 = vmul.f32 %v3193_v35, %v6709_v29 }
 0x5be   : >> { %v6857_v12 = vadd.f32 %v3311_v59, %v6675_v24  ;;  %v2815_v37 = vmul.f32 %v6508_v55, %v6826_v48 }
 0x5bf   : >> { %2666 = vrot.lane.b32.xlu2 %v2664_v9, %s4782_s24  ;;  %v6849_v7 = vadd.f32 %v3408_v32, %v6628_v56  ;;  %v6853_v9 = vadd.f32 %v3413_v50, %v6614_v43  ;;  %v6867_v56 = vadd.f32 %v3209_v28, %v6724_v3 }
 0x5c0   : >> { %v3398_v50 = vrot.slane %v6857_v12, 7 }
 0x5c1   : >> { %7873 = vst [vmem:[#allocation121_spill] sm:$0xff] %v6867_v56  ;;  %v3296_v43 = vrot.slane %v6867_v56, 7 }
 0x5c2   : >> { %v3414_v59 = vmul.f32 %v3398_v50, %v6656_v61 }
 0x5c3   : >> { %v3312_v63 = vmul.f32 %v3296_v43, %v6709_v29 }
 0x5c4   : >> { %v6875_v20 = vadd.f32 %v3414_v59, %v6675_v24 }
 0x5c5   : >> { %v6859_v57 = vpop.permute.xlu2 %2677  ;;  %v6878_v32 = vadd.f32 %v3312_v63, %v6724_v3 }
 0x5c6   : >> { %v2680_v14 = vmul.f32 %v6859_v57, %v6520_v62 }
 0x5c7   : >> { %2817 = vrot.lane.b32.xlu2 %v2815_v37, %s4782_s24  ;;  %v3399_v37 = vrot.slane %v6878_v32, 7 }
 0x5c8   : >> { %2682 = vrot.lane.b32.xlu0 %v2680_v14, %s4782_s24 }
 0x5c9   : >> { %v3415_v14 = vmul.f32 %v3399_v37, %v6709_v29 }
 0x5cb   : >> { %v6898_v43 = vadd.f32 %v3415_v14, %v6724_v3 }
 0x5ce   : >> { %v6880_v35 = vpop.permute.xlu2 %2693 }
 0x5cf   : >> { %v2696_v28 = vmul.f32 %v6880_v35, %v6544_v41 }
 0x5d1   : >> { %2698 = vrot.lane.b32.xlu0 %v2696_v28, %s4782_s24 }
 0x5d4   : >> { %v6887_v61 = vpop.permute.xlu0 %2640 }
 0x5d5   : >> { %v6891_v24 = vmul.f32 %v6672_v38, %v6887_v61  ;;  %v6895_v50 = vmul.f32 %v6744_v51, %v6887_v61  ;;  %v6902_v59 = vmul.f32 %v6704_v46, %v6887_v61  ;;  %v6906_v29 = vmul.f32 %v6778_v18, %v6887_v61 }
 0x5d6   : >> { %v6910_v63 = vmul.f32 %v6830_v17, %v6887_v61  ;;  %v6916_v37 = vmul.f32 %v6803_v40, %v6887_v61 }
 0x5d7   : >> { %7874 = vst [vmem:[#allocation122_spill] sm:$0xff] %v6902_v59  ;;  %v6912_v28 = vpop.permute.xlu2 %2709 }
 0x5d8   : >> { %7875 = vst [vmem:[#allocation123_spill] sm:$0xff] %v6906_v29  ;;  %v2839_v3 = vmul.f32 %v6598_v44, %v6912_v28  ;;  %v2712_v14 = vmul.f32 %v6912_v28, %v6578_v33 }
 0x5d9   : >> { %7876 = vst [vmem:[#allocation124_spill] sm:$0xff] %v6910_v63 }
 0x5da   : >> { %7877 = vst [vmem:[#allocation125_spill] sm:$0xff] %v6916_v37  ;;  %2841 = vrot.lane.b32.xlu2 %v2839_v3, %s4782_s24  ;;  %2714 = vrot.lane.b32.xlu0 %v2712_v14, %s4782_s24 }
 0x5dd   : >> { %v6924_v29 = vpop.permute.xlu0 %2645 }
 0x5de   : >> { %v2648_v63 = vmul.f32 %v6924_v29, %v6636_v22  ;;  %v2807_v59 = vmul.f32 %v6672_v38, %v6924_v29 }
 0x5e0   : >> { %v6928_v56 = vpop.permute.xlu2 %2725  ;;  %2650 = vrot.lane.b32.xlu1 %v2648_v63, %s4782_s24  ;;  %v2831_v63 = vmul.f32 %v6563_v4, %v6880_v35 }
 0x5e1   : >> { %v2728_v37 = vmul.f32 %v6928_v56, %v6621_v49 }
 0x5e3   : >> { %2730 = vrot.lane.b32.xlu0 %v2728_v37, %s4782_s24 }
 0x5e8   : >> { %2809 = vrot.lane.b32.xlu1 %v2807_v59, %s4782_s24 }
 0x5e9   : >> { %v6937_v3 = vpop.permute.xlu2 %2741 }
 0x5ea   : >> { %v2744_v14 = vmul.f32 %v6937_v3, %v6680_v25  ;;  %v2855_v59 = vmul.f32 %v6712_v15, %v6937_v3 }
 0x5ec   : >> { %2746 = vrot.lane.b32.xlu0 %v2744_v14, %s4782_s24  ;;  %v2926_v14 = vmul.f32 %v6554_v2, %v6859_v57  ;;  %v6978_v2 = vpop.permute.xlu1 %2655 }
 0x5f0   : >> { %2833 = vrot.lane.b32.xlu1 %v2831_v63, %s4782_s24  ;;  %v2823_v63 = vmul.f32 %v6534_v60, %v6859_v57 }
 0x5f2   : >> { %v6945_v30 = vpop.permute.xlu2 %2757 }
 0x5f3   : >> { %v2863_v37 = vmul.f32 %v6762_v19, %v6945_v30  ;;  %v2760_v38 = vmul.f32 %v6945_v30, %v6730_v1 }
 0x5f5   : >> { %2865 = vrot.lane.b32.xlu2 %v2863_v37, %s4782_s24  ;;  %2762 = vrot.lane.b32.xlu0 %v2760_v38, %s4782_s24  ;;  %v2918_v37 = vmul.f32 %v6526_v10, %v6826_v48  ;;  %v2950_v38 = vmul.f32 %v6693_v31, %v6928_v56 }
 0x5f8   : >> { %2857 = vrot.lane.b32.xlu1 %v2855_v59, %s4782_s24  ;;  %v2847_v59 = vmul.f32 %v6659_v34, %v6928_v56 }
 0x5fd   : >> { %2928 = vrot.lane.b32.xlu2 %v2926_v14, %s4782_s24  ;;  %2825 = vrot.lane.b32.xlu0 %v2823_v63, %s4782_s24  ;;  %v2942_v14 = vmul.f32 %v6642_v16, %v6912_v28  ;;  %v3013_v63 = vmul.f32 %v6744_v51, %v6924_v29  ;;  %v2934_v51 = vmul.f32 %v6588_v8, %v6880_v35 }
 0x600   : >> { %2920 = vrot.lane.b32.xlu1 %v2918_v37, %s4782_s24  ;;  %v2910_v37 = vmul.f32 %v6704_v46, %v6924_v29  ;;  %v3029_v46 = vmul.f32 %v6581_v52, %v6859_v57 }
 0x605   : >> { %2952 = vrot.lane.b32.xlu2 %v2950_v38, %s4782_s24  ;;  %2849 = vrot.lane.b32.xlu0 %v2847_v59, %s4782_s24  ;;  %v2966_v38 = vmul.f32 %v6791_v5, %v6945_v30  ;;  %v3037_v59 = vmul.f32 %v6624_v54, %v6880_v35  ;;  %v3132_v5 = vmul.f32 %v6608_v45, %v6859_v57 }
 0x608   : >> { %2944 = vrot.lane.b32.xlu1 %v2942_v14, %s4782_s24  ;;  %v6993_v14 = vpop.permute.xlu1 %2671 }
 0x60d   : >> { %3015 = vrot.lane.b32.xlu2 %v3013_v63, %s4782_s24  ;;  %2912 = vrot.lane.b32.xlu0 %v2910_v37, %s4782_s24  ;;  %v3061_v37 = vmul.f32 %v6775_v58, %v6937_v3  ;;  %v3021_v63 = vmul.f32 %v6547_v39, %v6826_v48 }
 0x610   : >> { %2968 = vrot.lane.b32.xlu1 %v2966_v38, %s4782_s24  ;;  %v2958_v38 = vmul.f32 %v6748_v42, %v6937_v3 }
 0x615   : >> { %3039 = vrot.lane.b32.xlu2 %v3037_v59, %s4782_s24  ;;  %2936 = vrot.lane.b32.xlu0 %v2934_v51, %s4782_s24  ;;  %v3053_v59 = vmul.f32 %v6734_v13, %v6928_v56  ;;  %v7006_v51 = vpop.permute.xlu1 %2687  ;;  %v3045_v13 = vmul.f32 %v6686_v47, %v6912_v28  ;;  %v7880_v47 = vld [vmem:[#allocation28_spill] sm:$0xff] }
 0x618   : >> { %3031 = vrot.lane.b32.xlu1 %v3029_v46, %s4782_s24  ;;  %v3124_v46 = vmul.f32 %v6566_v0, %v6826_v48 }
 0x619   : >> { %v2667_v58 = vpop.permute.xlu2 %2666 }
 0x61d   : >> { %3063 = vrot.lane.b32.xlu2 %v3061_v37, %s4782_s24  ;;  %2960 = vrot.lane.b32.xlu0 %v2958_v38, %s4782_s24  ;;  %v3116_v37 = vmul.f32 %v6778_v18, %v6924_v29  ;;  %v7018_v38 = vpop.permute.xlu1 %2703  ;;  %v3172_v18 = vmul.f32 %v6842_v27, %v6945_v30 }
 0x620   : >> { %3055 = vrot.lane.b32.xlu1 %v3053_v59, %s4782_s24  ;;  %v3148_v59 = vmul.f32 %v6720_v11, %v6912_v28  ;;  %v3156_v11 = vmul.f32 %v6772_v53, %v6928_v56  ;;  %v3441_v53 = vmul.f32 %v6739_v26, %v6859_v57  ;;  %v2643_v26 = vmul.f32 %v6887_v61, %v6636_v22  ;;  %v7884_v22 = vld [vmem:[#allocation109_spill] sm:$0xff] }
 0x621   : >> { %v2818_v27 = vpop.permute.xlu2 %2817 }
 0x625   : >> { %3126 = vrot.lane.b32.xlu2 %v3124_v46, %s4782_s24  ;;  %3023 = vrot.lane.b32.xlu0 %v3021_v63, %s4782_s24  ;;  %v3140_v63 = vmul.f32 %v6665_v23, %v6880_v35  ;;  %v3069_v46 = vmul.f32 %v6819_v21, %v6945_v30  ;;  %v7879_v23 = vld [vmem:[#allocation58_spill] sm:$0xff]  ;;  %v7881_v21 = vld [vmem:[#allocation105_spill] sm:$0xff] }
 0x628   : >> { %3118 = vrot.lane.b32.xlu1 %v3116_v37, %s4782_s24  ;;  %v7034_v37 = vpop.permute.xlu1 %2719 }
 0x62d   : >> { %3150 = vrot.lane.b32.xlu2 %v3148_v59, %s4782_s24  ;;  %3047 = vrot.lane.b32.xlu0 %v3045_v13, %s4782_s24  ;;  %v3164_v13 = vmul.f32 %v6808_v6, %v6937_v3  ;;  %v3433_v6 = vmul.f32 %v6668_v36, %v6826_v48  ;;  %v2690_v36 = vmul.f32 %v7006_v51, %v6544_v41 }
 0x630   : >> { %3142 = vrot.lane.b32.xlu1 %v3140_v63, %s4782_s24  ;;  %v3425_v63 = vmul.f32 %v6849_v7, %v6924_v29 }
 0x635   : >> { %3174 = vrot.lane.b32.xlu2 %v3172_v18, %s4782_s24  ;;  %3071 = vrot.lane.b32.xlu0 %v3069_v46, %s4782_s24  ;;  %v3322_v18 = vmul.f32 %v6830_v17, %v6924_v29  ;;  %v7049_v46 = vpop.permute.xlu1 %2735  ;;  %v7060_v17 = vpop.permute.xlu2 %2841 }
 0x638   : >> { %3166 = vrot.lane.b32.xlu1 %v3164_v13, %s4782_s24 }
 0x63a   : >> { %v2683_v59 = vpop.permute.xlu0 %2682 }
 0x63d   : >> { %3427 = vrot.lane.b32.xlu2 %v3425_v63, %s4782_s24  ;;  %3134 = vrot.lane.b32.xlu0 %v3132_v5, %s4782_s24  ;;  %v7878_v5 = vld [vmem:[#allocation101_spill] sm:$0xff]  ;;  %v7065_v45 = vpop.permute.xlu1 %2751 }
 0x63e   : >> { %v3330_v63 = vmul.f32 %v7878_v5, %v6826_v48 }
 0x640   : >> { %3324 = vrot.lane.b32.xlu1 %v3322_v18, %s4782_s24  ;;  %v3338_v18 = vmul.f32 %v7881_v21, %v6859_v57 }
 0x643   : >> { %v2699_v13 = vpop.permute.xlu0 %2698 }
 0x645   : >> { %3435 = vrot.lane.b32.xlu2 %v3433_v6, %s4782_s24  ;;  %3158 = vrot.lane.b32.xlu0 %v3156_v11, %s4782_s24  ;;  %v3219_v6 = vmul.f32 %v6803_v40, %v6924_v29  ;;  %v7882_v11 = vld [vmem:[#allocation94_spill] sm:$0xff] }
 0x646   : >> { %v2658_v0 = vmul.f32 %v6978_v2, %v7882_v11  ;;  %v2674_v11 = vmul.f32 %v6993_v14, %v6520_v62  ;;  %v2813_v62 = vmul.f32 %v6508_v55, %v6978_v2  ;;  %v2821_v55 = vmul.f32 %v6534_v60, %v6993_v14  ;;  %v7888_v60 = vld [vmem:[#allocation118_spill] sm:$0xff] }
 0x648   : >> { %3332 = vrot.lane.b32.xlu1 %v3330_v63, %s4782_s24 }
 0x64c   : >> { %v2715_v54 = vpop.permute.xlu0 %2714 }
 0x64d   : >> { %3443 = vrot.lane.b32.xlu2 %v3441_v53, %s4782_s24  ;;  %3221 = vrot.lane.b32.xlu0 %v3219_v6, %s4782_s24  ;;  %v3449_v53 = vmul.f32 %v7879_v23, %v6880_v35  ;;  %v7883_v6 = vld [vmem:[#allocation98_spill] sm:$0xff] }
 0x64e   : >> { %v3227_v21 = vmul.f32 %v7883_v6, %v6826_v48 }
 0x64f   : >> { %v7076_v5 = vpop.permute.xlu2 %2865 }
 0x650   : >> { %3340 = vrot.lane.b32.xlu1 %v3338_v18, %s4782_s24 }
 0x652   : >> { %v2651_v40 = vpop.permute.xlu1 %2650 }
 0x653   : >> { %v2653_v29 = vadd.f32 %v2651_v40, %v2643_v26  ;;  %v3346_v26 = vmul.f32 %v7884_v22, %v6880_v35 }
 0x655   : >> { %v2659_v52 = vadd.f32 %v2658_v0, %v2653_v29  ;;  %v2731_v63 = vpop.permute.xlu0 %2730  ;;  %3451 = vrot.lane.b32.xlu2 %v3449_v53, %s4782_s24  ;;  %3229 = vrot.lane.b32.xlu0 %v3227_v21, %s4782_s24  ;;  %v3457_v0 = vmul.f32 %v7880_v47, %v6912_v28  ;;  %v7885_v29 = vld [vmem:[#allocation102_spill] sm:$0xff] }
 0x656   : >> { %v3235_v53 = vmul.f32 %v7885_v29, %v6859_v57 }
 0x657   : >> { %v2669_v18 = vadd.f32 %v2667_v58, %v2659_v52  ;;  %v7095_v40 = vpop.permute.xlu2 %2928 }
 0x658   : >> { %3348 = vrot.lane.b32.xlu1 %v3346_v26, %s4782_s24 }
 0x659   : >> { %v2675_v48 = vadd.f32 %v2674_v11, %v2669_v18  ;;  %v7886_v18 = vld [vmem:[#allocation113_spill] sm:$0xff] }
 0x65a   : >> { %v2810_v6 = vpop.permute.xlu1 %2809  ;;  %v3354_v11 = vmul.f32 %v7886_v18, %v6912_v28 }
 0x65b   : >> { %v2685_v21 = vadd.f32 %v2683_v59, %v2675_v48  ;;  %v2812_v52 = vadd.f32 %v2810_v6, %v6891_v24  ;;  %v2706_v59 = vmul.f32 %v7018_v38, %v6578_v33  ;;  %v7887_v33 = vld [vmem:[#allocation106_spill] sm:$0xff] }
 0x65d   : >> { %v2691_v58 = vadd.f32 %v2690_v36, %v2685_v21  ;;  %v2814_v22 = vadd.f32 %v2813_v62, %v2812_v52  ;;  %3459 = vrot.lane.b32.xlu2 %v3457_v0, %s4782_s24  ;;  %3237 = vrot.lane.b32.xlu0 %v3235_v53, %s4782_s24  ;;  %v2722_v53 = vmul.f32 %v7034_v37, %v6621_v49 }
 0x65e   : >> { %v2747_v26 = vpop.permute.xlu0 %2746  ;;  %v3243_v21 = vmul.f32 %v7887_v33, %v6880_v35  ;;  %v3019_v35 = vmul.f32 %v6547_v39, %v6978_v2  ;;  %v3370_v39 = vmul.f32 %v6857_v12, %v6937_v3 }
 0x65f   : >> { %v2701_v57 = vadd.f32 %v2699_v13, %v2691_v58  ;;  %v7113_v41 = vpop.permute.xlu2 %2952  ;;  %v2820_v24 = vadd.f32 %v2818_v27, %v2814_v22  ;;  %v3465_v13 = vmul.f32 %v6853_v9, %v6928_v56  ;;  %v3362_v27 = vmul.f32 %v7888_v60, %v6928_v56 }
 0x660   : >> { %3356 = vrot.lane.b32.xlu1 %v3354_v11, %s4782_s24 }
 0x661   : >> { %v2707_v36 = vadd.f32 %v2706_v59, %v2701_v57  ;;  %v2822_v6 = vadd.f32 %v2821_v55, %v2820_v24  ;;  %v7889_v55 = vld [vmem:[#allocation110_spill] sm:$0xff] }
 0x662   : >> { %v2834_v48 = vpop.permute.xlu1 %2833 }
 0x663   : >> { %v2717_v0 = vadd.f32 %v2715_v54, %v2707_v36  ;;  %v2738_v54 = vmul.f32 %v7049_v46, %v6680_v25  ;;  %v3473_v25 = vmul.f32 %v6875_v20, %v6937_v3  ;;  %v3251_v36 = vmul.f32 %v7889_v55, %v6912_v28 }
 0x665   : >> { %v2723_v52 = vadd.f32 %v2722_v53, %v2717_v0  ;;  %3467 = vrot.lane.b32.xlu2 %v3465_v13, %s4782_s24  ;;  %3245 = vrot.lane.b32.xlu0 %v3243_v21, %s4782_s24 }
 0x667   : >> { %v2733_v22 = vadd.f32 %v2731_v63, %v2723_v52  ;;  %v3016_v62 = vpop.permute.xlu2 %3015  ;;  %v2763_v49 = vpop.permute.xlu0 %2762  ;;  %v2754_v63 = vmul.f32 %v7065_v45, %v6730_v1  ;;  %v2829_v1 = vmul.f32 %v6563_v4, %v7006_v51  ;;  %v3481_v52 = vmul.f32 %v6898_v43, %v6945_v30 }
 0x668   : >> { %v3018_v58 = vadd.f32 %v3016_v62, %v6895_v50  ;;  %3364 = vrot.lane.b32.xlu1 %v3362_v27, %s4782_s24  ;;  %v7890_v27 = vld [vmem:[#allocation115_spill] sm:$0xff]  ;;  %v2837_v62 = vmul.f32 %v6598_v44, %v7018_v38 }
 0x669   : >> { %v2739_v11 = vadd.f32 %v2738_v54, %v2733_v22  ;;  %v3259_v22 = vmul.f32 %v7890_v27, %v6928_v56  ;;  %v2845_v56 = vmul.f32 %v6659_v34, %v7034_v37 }
 0x66a   : >> { %v2858_v57 = vpop.permute.xlu1 %2857  ;;  %v7134_v59 = vadd.f32 %v3019_v35, %v3018_v58 }
 0x66b   : >> { %v2749_v24 = vadd.f32 %v2747_v26, %v2739_v11  ;;  %v7891_v11 = vld [vmem:[#allocation119_spill] sm:$0xff] }
 0x66d   : >> { %v2755_v50 = vadd.f32 %v2754_v63, %v2749_v24  ;;  %3475 = vrot.lane.b32.xlu2 %v3473_v25, %s4782_s24  ;;  %3253 = vrot.lane.b32.xlu0 %v3251_v36, %s4782_s24  ;;  %v3267_v24 = vmul.f32 %v7891_v11, %v6937_v3  ;;  %v2853_v63 = vmul.f32 %v6712_v15, %v7049_v46  ;;  %v7893_v15 = vld [vmem:[#allocation121_spill] sm:$0xff] }
 0x66f   : >> { %v2765_v0 = vadd.f32 %v2763_v49, %v2755_v50  ;;  %v7146_v53 = vpop.permute.xlu2 %3039  ;;  %v2826_v26 = vpop.permute.xlu0 %2825 }
 0x670   : >> { %v2828_v13 = vadd.f32 %v2826_v26, %v2822_v6  ;;  %3372 = vrot.lane.b32.xlu1 %v3370_v39, %s4782_s24  ;;  %v3378_v6 = vmul.f32 %v6878_v32, %v6945_v30  ;;  %v2916_v26 = vmul.f32 %v6526_v10, %v6978_v2 }
 0x672   : >> { %v2830_v21 = vadd.f32 %v2829_v1, %v2828_v13  ;;  %v2921_v28 = vpop.permute.xlu1 %2920  ;;  %v7892_v1 = vld [vmem:[#allocation122_spill] sm:$0xff] }
 0x674   : >> { %v2836_v54 = vadd.f32 %v2834_v48, %v2830_v21 }
 0x675   : >> { %3483 = vrot.lane.b32.xlu2 %v3481_v52, %s4782_s24  ;;  %3261 = vrot.lane.b32.xlu0 %v3259_v22, %s4782_s24  ;;  %v3275_v22 = vmul.f32 %v7893_v15, %v6945_v30  ;;  %v2932_v30 = vmul.f32 %v6588_v8, %v7006_v51  ;;  %v2956_v8 = vmul.f32 %v6748_v42, %v7049_v46 }
 0x676   : >> { %v2838_v4 = vadd.f32 %v2837_v62, %v2836_v54 }
 0x677   : >> { %v7161_v49 = vpop.permute.xlu2 %3063  ;;  %v2850_v58 = vpop.permute.xlu0 %2849 }
 0x678   : >> { %v2844_v35 = vadd.f32 %v7060_v17, %v2838_v4  ;;  %3380 = vrot.lane.b32.xlu1 %v3378_v6, %s4782_s24  ;;  %v2861_v17 = vmul.f32 %v6762_v19, %v7065_v45  ;;  %v7894_v4 = vld [vmem:[#allocation95_spill] sm:$0xff] }
 0x679   : >> { %v2924_v6 = vmul.f32 %v7894_v4, %v6993_v14 }
 0x67a   : >> { %v2846_v48 = vadd.f32 %v2845_v56, %v2844_v35  ;;  %v2945_v44 = vpop.permute.xlu1 %2944 }
 0x67c   : >> { %v2852_v25 = vadd.f32 %v2850_v58, %v2846_v48 }
 0x67d   : >> { %3269 = vrot.lane.b32.xlu0 %v3267_v24, %s4782_s24 }
 0x67e   : >> { %v2854_v36 = vadd.f32 %v2853_v63, %v2852_v25 }
 0x67f   : >> { %v3127_v50 = vpop.permute.xlu2 %3126  ;;  %v2913_v39 = vpop.permute.xlu0 %2912 }
 0x680   : >> { %v2860_v34 = vadd.f32 %v2858_v57, %v2854_v36  ;;  %v2915_v13 = vadd.f32 %v2913_v39, %v7892_v1  ;;  %v7895_v1 = vld [vmem:[#allocation97_spill] sm:$0xff] }
 0x682   : >> { %v2862_v21 = vadd.f32 %v2861_v17, %v2860_v34  ;;  %v2917_v3 = vadd.f32 %v2916_v26, %v2915_v13  ;;  %v2969_v52 = vpop.permute.xlu1 %2968  ;;  %v3027_v13 = vmul.f32 %v7895_v1, %v6993_v14  ;;  %v7902_v1 = vld [vmem:[#allocation104_spill] sm:$0xff] }
 0x684   : >> { %v2868_v54 = vadd.f32 %v7076_v5, %v2862_v21  ;;  %v2923_v62 = vadd.f32 %v2921_v28, %v2917_v3  ;;  %v2940_v5 = vmul.f32 %v6642_v16, %v7018_v38  ;;  %v3424_v16 = vmul.f32 %v6849_v7, %v6887_v61  ;;  %v7898_v61 = vld [vmem:[#allocation96_spill] sm:$0xff] }
 0x685   : >> { %3277 = vrot.lane.b32.xlu0 %v3275_v22, %s4782_s24 }
 0x686   : >> { %v2925_v19 = vadd.f32 %v2924_v6, %v2923_v62  ;;  %v3488_v10 = vsel %vm3487_vm2, %v2765_v0, %v2868_v54  ;;  %v2948_v0 = vmul.f32 %v6693_v31, %v7034_v37  ;;  %v7897_v31 = vld [vmem:[#allocation114_spill] sm:$0xff] }
 0x687   : >> { %v7184_v57 = vpop.permute.xlu2 %3150  ;;  %v2937_v58 = vpop.permute.xlu0 %2936  ;;  %v2964_v3 = vmul.f32 %v7897_v31, %v7065_v45 }
 0x688   : >> { %v2931_v35 = vadd.f32 %v7095_v40, %v2925_v19  ;;  %v3122_v19 = vmul.f32 %v7898_v61, %v6978_v2  ;;  %v3447_v61 = vmul.f32 %v7879_v23, %v7006_v51 }
 0x68a   : >> { %v2933_v56 = vadd.f32 %v2932_v30, %v2931_v35  ;;  %v3032_v48 = vpop.permute.xlu1 %3031 }
 0x68c   : >> { %v2939_v28 = vadd.f32 %v2937_v58, %v2933_v56  ;;  %v7899_v58 = vld [vmem:[#allocation123_spill] sm:$0xff] }
 0x68e   : >> { %v2941_v24 = vadd.f32 %v2940_v5, %v2939_v28  ;;  %v7900_v5 = vld [vmem:[#allocation100_spill] sm:$0xff] }
 0x68f   : >> { %v7191_v63 = vpop.permute.xlu2 %3174  ;;  %v2961_v25 = vpop.permute.xlu0 %2960  ;;  %v3035_v28 = vmul.f32 %v7900_v5, %v7006_v51 }
 0x690   : >> { %v2947_v36 = vadd.f32 %v2945_v44, %v2941_v24 }
 0x692   : >> { %v2949_v39 = vadd.f32 %v2948_v0, %v2947_v36  ;;  %v3056_v17 = vpop.permute.xlu1 %3055  ;;  %v7896_v0 = vld [vmem:[#allocation27_spill] sm:$0xff] }
 0x693   : >> { %v3431_v44 = vmul.f32 %v7896_v0, %v6978_v2  ;;  %v7924_v0 = vrot.slane %v7896_v0, 7  }
 0x694   : >> { %v2955_v40 = vadd.f32 %v7113_v41, %v2949_v39 }
 0x696   : >> { %v2957_v34 = vadd.f32 %v2956_v8, %v2955_v40  ;;  %v7901_v8 = vld [vmem:[#allocation99_spill] sm:$0xff] }
 0x697   : >> { %v3428_v26 = vpop.permute.xlu2 %3427  ;;  %v3024_v21 = vpop.permute.xlu0 %3023 }
 0x698   : >> { %v2963_v22 = vadd.f32 %v2961_v25, %v2957_v34  ;;  %v3430_v41 = vadd.f32 %v3428_v26, %v3424_v16  ;;  %v3026_v54 = vadd.f32 %v3024_v21, %v7134_v59  ;;  %v3130_v34 = vmul.f32 %v7901_v8, %v6993_v14 }
 0x69a   : >> { %v2965_v42 = vadd.f32 %v2964_v3, %v2963_v22  ;;  %v3028_v62 = vadd.f32 %v3027_v13, %v3026_v54  ;;  %v3119_v4 = vpop.permute.xlu1 %3118  ;;  %v3432_v6 = vadd.f32 %v3431_v44, %v3430_v41 }
 0x69b   : >> { %v3121_v35 = vadd.f32 %v3119_v4, %v7899_v58 }
 0x69c   : >> { %v2971_v30 = vadd.f32 %v2969_v52, %v2965_v42  ;;  %v3034_v56 = vadd.f32 %v3032_v48, %v3028_v62  ;;  %v3043_v52 = vmul.f32 %v7902_v1, %v7018_v38  ;;  %v7903_v48 = vld [vmem:[#allocation43_spill] sm:$0xff] }
 0x69d   : >> { %v3123_v24 = vadd.f32 %v3122_v19, %v3121_v35  ;;  %v3439_v13 = vmul.f32 %v7903_v48, %v6993_v14 }
 0x69e   : >> { %v3036_v25 = vadd.f32 %v3035_v28, %v3034_v56  ;;  %v3490_v36 = vsel %vm7663_vm6, %v3488_v10, %v2971_v30  ;;  %v7904_v10 = vld [vmem:[#allocation108_spill] sm:$0xff]  ;;  %v7906_v56 = vld [vmem:[#allocation117_spill] sm:$0xff] }
 0x69f   : >> { %v3436_v59 = vpop.permute.xlu2 %3435  ;;  %v3048_v39 = vpop.permute.xlu0 %3047  ;;  %v3129_v40 = vadd.f32 %v3127_v50, %v3123_v24  ;;  %v3051_v22 = vmul.f32 %v7904_v10, %v7034_v37  ;;  %v3067_v5 = vmul.f32 %v7906_v56, %v7065_v45 }
 0x6a0   : >> { %v3438_v16 = vadd.f32 %v3436_v59, %v3432_v6  ;;  %v3042_v26 = vadd.f32 %v7146_v53, %v3036_v25  ;;  %v7905_v53 = vld [vmem:[#allocation112_spill] sm:$0xff] }
 0x6a1   : >> { %v3131_v21 = vadd.f32 %v3130_v34, %v3129_v40  ;;  %v3059_v6 = vmul.f32 %v7905_v53, %v7049_v46  ;;  %v3455_v34 = vmul.f32 %v7880_v47, %v7018_v38 }
 0x6a2   : >> { %v3044_v44 = vadd.f32 %v3043_v52, %v3042_v26  ;;  %v3143_v31 = vpop.permute.xlu1 %3142  ;;  %v3440_v3 = vadd.f32 %v3439_v13, %v3438_v16  ;;  %v7908_v52 = vld [vmem:[#allocation124_spill] sm:$0xff] }
 0x6a4   : >> { %v3050_v50 = vadd.f32 %v3048_v39, %v3044_v44  ;;  %v7909_v44 = vld [vmem:[#allocation101_spill] sm:$0xff] }
 0x6a6   : >> { %v3052_v41 = vadd.f32 %v3051_v22, %v3050_v50  ;;  %v7910_v22 = vld [vmem:[#allocation107_spill] sm:$0xff] }
 0x6a7   : >> { %v3444_v54 = vpop.permute.xlu2 %3443  ;;  %v3072_v42 = vpop.permute.xlu0 %3071  ;;  %v3146_v50 = vmul.f32 %v7910_v22, %v7018_v38 }
 0x6a8   : >> { %v3058_v62 = vadd.f32 %v3056_v17, %v3052_v41  ;;  %v3446_v4 = vadd.f32 %v3444_v54, %v3440_v3  ;;  %v7907_v17 = vld [vmem:[#allocation103_spill] sm:$0xff]  ;;  %v3328_v3 = vmul.f32 %v7909_v44, %v6978_v2 }
 0x6a9   : >> { %v3138_v25 = vmul.f32 %v7907_v17, %v7006_v51 }
 0x6aa   : >> { %v3060_v19 = vadd.f32 %v3059_v6, %v3058_v62  ;;  %v3167_v58 = vpop.permute.xlu1 %3166  ;;  %v3448_v35 = vadd.f32 %v3447_v61, %v3446_v4  ;;  %v3463_v6 = vmul.f32 %v6853_v9, %v7034_v37 }
 0x6ac   : >> { %v3066_v30 = vadd.f32 %v7161_v49, %v3060_v19 }
 0x6ae   : >> { %v3068_v28 = vadd.f32 %v3067_v5, %v3066_v30  ;;  %v7912_v30 = vld [vmem:[#allocation105_spill] sm:$0xff]  ;;  %v7913_v5 = vld [vmem:[#allocation116_spill] sm:$0xff] }
 0x6af   : >> { %v3452_v24 = vpop.permute.xlu2 %3451  ;;  %v3135_v59 = vpop.permute.xlu0 %3134  ;;  %v3336_v56 = vmul.f32 %v7912_v30, %v6993_v14 }
 0x6b0   : >> { %v3074_v39 = vadd.f32 %v3072_v42, %v3068_v28  ;;  %v3454_v40 = vadd.f32 %v3452_v24, %v3448_v35  ;;  %v3137_v8 = vadd.f32 %v3135_v59, %v3131_v21  ;;  %v3162_v28 = vmul.f32 %v7913_v5, %v7049_v46 }
 0x6b1   : >> { %v3241_v5 = vmul.f32 %v7887_v33, %v7006_v51 }
 0x6b2   : >> { %v3492_v16 = vsel %vm3491_vm7, %v3490_v36, %v3074_v39  ;;  %v3139_v26 = vadd.f32 %v3138_v25, %v3137_v8  ;;  %v3325_v1 = vpop.permute.xlu1 %3324  ;;  %v3456_v49 = vadd.f32 %v3455_v34, %v3454_v40  ;;  %v7911_v36 = vld [vmem:[#allocation111_spill] sm:$0xff]  ;;  %v3471_v39 = vmul.f32 %v6875_v20, %v7049_v46  ;;  %v7914_v40 = vld [vmem:[#allocation98_spill] sm:$0xff]  ;;  %v7915_v34 = vld [vmem:[#allocation120_spill] sm:$0xff] }
 0x6b3   : >> { %v3327_v13 = vadd.f32 %v3325_v1, %v7908_v52  ;;  %v3154_v53 = vmul.f32 %v7911_v36, %v7034_v37  ;;  %v3225_v8 = vmul.f32 %v7914_v40, %v6978_v2  ;;  %v7916_v52 = vld [vmem:[#allocation125_spill] sm:$0xff] }
 0x6b4   : >> { %v3145_v10 = vadd.f32 %v3143_v31, %v3139_v26  ;;  %v3170_v26 = vmul.f32 %v7915_v34, %v7065_v45 }
 0x6b5   : >> { %v3329_v41 = vadd.f32 %v3328_v3, %v3327_v13 }
 0x6b6   : >> { %v3147_v54 = vadd.f32 %v3146_v50, %v3145_v10 }
 0x6b7   : >> { %v3460_v42 = vpop.permute.xlu2 %3459  ;;  %v3159_v21 = vpop.permute.xlu0 %3158 }
 0x6b8   : >> { %v3462_v62 = vadd.f32 %v3460_v42, %v3456_v49  ;;  %v3153_v4 = vadd.f32 %v7184_v57, %v3147_v54 }
 0x6ba   : >> { %v3155_v61 = vadd.f32 %v3154_v53, %v3153_v4  ;;  %v3333_v19 = vpop.permute.xlu1 %3332  ;;  %v3464_v35 = vadd.f32 %v3463_v6, %v3462_v62  ;;  %v3479_v53 = vmul.f32 %v6898_v43, %v7065_v45  ;;  %v3233_v6 = vmul.f32 %v7885_v29, %v6993_v14 }
 0x6bb   : >> { %v3335_v31 = vadd.f32 %v3333_v19, %v3329_v41  ;;  %v7917_v41 = vld [vmem:[#allocation109_spill] sm:$0xff] }
 0x6bc   : >> { %v3161_v24 = vadd.f32 %v3159_v21, %v3155_v61  ;;  %v3344_v54 = vmul.f32 %v7917_v41, %v7006_v51 }
 0x6bd   : >> { %v3337_v17 = vadd.f32 %v3336_v56, %v3335_v31 }
 0x6be   : >> { %v3163_v25 = vadd.f32 %v3162_v28, %v3161_v24 }
 0x6bf   : >> { %v3468_v57 = vpop.permute.xlu2 %3467  ;;  %v3222_v59 = vpop.permute.xlu0 %3221 }
 0x6c0   : >> { %v3169_v1 = vadd.f32 %v3167_v58, %v3163_v25  ;;  %v3470_v49 = vadd.f32 %v3468_v57, %v3464_v35  ;;  %v3224_v13 = vadd.f32 %v3222_v59, %v7916_v52  ;;  %v3360_v25 = vmul.f32 %v7888_v60, %v7034_v37 }
 0x6c1   : >> { %v3249_v59 = vmul.f32 %v7889_v55, %v7018_v38  ;;  %v3376_v52 = vmul.f32 %v6878_v32, %v7065_v45 }
 0x6c2   : >> { %v3171_v44 = vadd.f32 %v3170_v26, %v3169_v1  ;;  %v3341_v3 = vpop.permute.xlu1 %3340  ;;  %v3472_v10 = vadd.f32 %v3471_v39, %v3470_v49  ;;  %v3226_v22 = vadd.f32 %v3225_v8, %v3224_v13  ;;  %v3368_v8 = vmul.f32 %v6857_v12, %v7049_v46 }
 0x6c3   : >> { %v3343_v50 = vadd.f32 %v3341_v3, %v3337_v17  ;;  %v3257_v26 = vmul.f32 %v7890_v27, %v7034_v37 }
 0x6c4   : >> { %v3177_v42 = vadd.f32 %v7191_v63, %v3171_v44  ;;  %v3352_v63 = vmul.f32 %v7886_v18, %v7018_v38  ;;  %v3265_v44 = vmul.f32 %v7891_v11, %v7049_v46 }
 0x6c5   : >> { %v3345_v21 = vadd.f32 %v3344_v54, %v3343_v50 }
 0x6c6   : >> { %v3494_v2 = vsel %vm7662_vm8, %v3492_v16, %v3177_v42 }
 0x6c7   : >> { %v3476_v62 = vpop.permute.xlu2 %3475  ;;  %v3230_v4 = vpop.permute.xlu0 %3229 }
 0x6c8   : >> { %v3478_v58 = vadd.f32 %v3476_v62, %v3472_v10  ;;  %v3232_v36 = vadd.f32 %v3230_v4, %v3226_v22  ;;  %v3273_v22 = vmul.f32 %v7893_v15, %v7065_v45  ;;  %v7926_v45 = vld [vmem:[#allocation9_spill] sm:$0xff] (%p2584_p8)  ;;  %v7928_v15 = vld [vmem:[#allocation10_spill] sm:$0xff] (%p2584_p8) }
 0x6ca   : >> { %v3349_v61 = vpop.permute.xlu1 %3348  ;;  %v3480_v19 = vadd.f32 %v3479_v53, %v3478_v58  ;;  %v3234_v35 = vadd.f32 %v3233_v6, %v3232_v36  ;;  %v7930_v58 = vld [vmem:[#allocation17_spill] sm:$0xff] (%p2584_p8)  ;;  %v7931_v53 = vld [vmem:[#allocation15_spill] sm:$0xff] (%p2584_p8) }
 0x6cb   : >> { %v3351_v31 = vadd.f32 %v3349_v61, %v3345_v21  ;;  %v7921_v61 = vrot.slane %v7880_v47, 7   ;;  %v4042_v47 = vmul.f32 (%p2584_p8), -1.442695, %v7926_v45  ;;  %v4049_v36 = vmul.f32 (%p2584_p8), -1.442695, %v7930_v58 }
 0x6cc   : > { %v4048_v6 = vmul.f32 (%p2584_p8), -1.442695, %v7931_v53 }
 0x6cd   : >> { %v3353_v30 = vadd.f32 %v3352_v63, %v3351_v31  ;;  %4602 = vpow2.f32 (%p2584_p8), %v4042_v47 }
 0x6cf   : >> { %v3238_v56 = vpop.permute.xlu0 %3237  ;;  %v3484_v50 = vpop.permute.xlu2 %3483 }
 0x6d0   : >> { %v3240_v16 = vadd.f32 %v3238_v56, %v3234_v35  ;;  %v3486_v42 = vadd.f32 %v3484_v50, %v3480_v19 }
 0x6d2   : >> { %v3357_v28 = vpop.permute.xlu1 %3356  ;;  %v3242_v24 = vadd.f32 %v3241_v5, %v3240_v16 }
 0x6d3   : >> { %v3359_v17 = vadd.f32 %v3357_v28, %v3353_v30  ;;  %v7918_v30 = vrot.slane %v6898_v43, 7   ;;  %v4603_v19 = vpop.eup (%p2584_p8), %4602 }
 0x6d4   : > { %v3610_v0 = vadd.f32 (%p2584_p8), 1.0, %v4603_v19 }
 0x6d5   : >> { %v3361_v14 = vadd.f32 %v3360_v25, %v3359_v17  ;;  %v7919_v25 = vrot.slane %v6875_v20, 7  }
 0x6d6   : > { %v3627_v28 = vand.u32 (%p2584_p8), 2147483647, %v3610_v0  ;;  %vm3623_vm13 = vweird.f32 (%p2584_p8), %v3610_v0 }
 0x6d7   : >> { %v3246_v29 = vpop.permute.xlu0 %3245 }
 0x6d8   : >> { %v3248_v57 = vadd.f32 %v3246_v29, %v3242_v24  ;;  %v3629_v24 = vand.u32 (%p2584_p8), 2147483648, %v3610_v0  ;;  %vm7338_vm15 = vcmp.eq.f32.partialorder (%p2584_p8), %v3627_v28, 8.507059e+37 }
 0x6da   : >> { %v3365_v39 = vpop.permute.xlu1 %3364  ;;  %v3250_v18 = vadd.f32 %v3249_v59, %v3248_v57 }
 0x6db   : >> { %v3367_v40 = vadd.f32 %v3365_v39, %v3361_v14 }
 0x6dd   : >> { %v3369_v34 = vadd.f32 %v3368_v8, %v3367_v40 }
 0x6df   : >> { %v3254_v51 = vpop.permute.xlu0 %3253 }
 0x6e0   : >> { %v3256_v33 = vadd.f32 %v3254_v51, %v3250_v18 }
 0x6e2   : >> { %v3373_v1 = vpop.permute.xlu1 %3372  ;;  %v3258_v60 = vadd.f32 %v3257_v26, %v3256_v33  ;;  %v3630_v33 = vor.u32 (%p2584_p8), 1.1754944e-38, %v3629_v24 }
 0x6e3   : >> { %v3375_v49 = vadd.f32 %v3373_v1, %v3369_v34 }
 0x6e5   : >> { %v3377_v13 = vadd.f32 %v3376_v52, %v3375_v49 }
 0x6e7   : >> { %v3262_v38 = vpop.permute.xlu0 %3261 }
 0x6e8   : >> { %v3264_v55 = vadd.f32 %v3262_v38, %v3258_v60 }
 0x6ea   : >> { %v3266_v3 = vadd.f32 %v3265_v44, %v3264_v55  ;;  %v3381_v27 = vpop.permute.xlu1 %3380 }
 0x6eb   : >> { %v3383_v54 = vadd.f32 %v3381_v27, %v3377_v13 }
 0x6ef   : >> { %v3270_v12 = vpop.permute.xlu0 %3269 }
 0x6f0   : >> { %v3272_v10 = vadd.f32 %v3270_v12, %v3266_v3 }
 0x6f2   : >> { %v3274_v37 = vadd.f32 %v3273_v22, %v3272_v10  ;;  %v7925_v22 = vrot.slane %v6849_v7, 7  }
 0x6f7   : >> { %v3278_v41 = vpop.permute.xlu0 %3277 }
 0x6f8   : >> { %v3280_v32 = vadd.f32 %v3278_v41, %v3274_v37  ;;  %v4079_v41 = vld [vmem:[%s7555_s10 + $0x18] sm:$0xff] (%p2584_p8) }
 0x6f9   : > { %2586 = sbr.rel (!%p2584_p8) target bundleno = 1371 (0x55b), region = 109  ;;  %3838 = vmatpush.bf16.msra.mxu2 (%p2584_p8), %v4079_v41  ;;  %4088 = vmatpush.bf16.msrb.mxu3 (%p2584_p8), %v4079_v41 }
 0x6fa   : >> { %v3496_v21 = vsel %vm3495_vm9, %v3494_v2, %v3280_v32  ;;  %v7923_v32 = vrot.slane %v7903_v48, 7   ;;  %v4043_v2 = vmul.f32 (%p2584_p8), -1.442695, %v7928_v15  ;;  %v7929_v48 = vld [vmem:[#allocation12_spill] sm:$0xff] (%p2584_p8) }
 0x6fb   : >> { %v3498_v62 = vsel %vm3497_vm10, %v3496_v21, %v3383_v54  ;;  %v7920_v54 = vrot.slane %v6853_v9, 7   ;;  %v4045_v4 = vmul.f32 (%p2584_p8), -1.442695, %v7929_v48 }
 0x6fc   : >> { %v3500_v46 = vsel %vm3499_vm11, %v3498_v62, %v3486_v42 }
 0x6fd   : >> { %3502 = vst.msk [vmem:[%s3501_s26] sm:$0xff] %vm7661_vm12, %v3500_v46  ;;  %v7922_v46 = vrot.slane %v7879_v23, 7   ;;  %v7927_v23 = vld [vmem:[#allocation11_spill] sm:$0xff] (%p2584_p8) }
 0x6fe   : > { %v4044_v11 = vmul.f32 -1.442695, %v7927_v23 }
 0x700   : > { %4604 = vpow2.f32 %v4044_v11 }
 0x701   : > { %4606 = vpow2.f32 %v4043_v2 }
 0x702   : > { %4608 = vpow2.f32 %v4045_v4 }
 0x703   : > { %4610 = vpow2.f32 %v4049_v36  ;;  %v7944_v36 = vld [vmem:[#allocation13_spill] sm:$0xff] }
 0x704   : > { %4612 = vpow2.f32 %v4048_v6  ;;  %v4046_v6 = vmul.f32 -1.442695, %v7944_v36 }
 0x705   : > { %4614 = vrcp.f32 %v3610_v0 }
 0x706   : > { %v4605_v35 = vpop.eup %4604 }
 0x707   : > { %v4607_v61 = vpop.eup %4606  ;;  %v3612_v31 = vadd.f32 1.0, %v4605_v35 }
 0x708   : > { %v4609_v63 = vpop.eup %4608  ;;  %v7323_v16 = vadd.f32 1.0, %v4607_v61 }
 0x709   : > { %v4611_v30 = vpop.eup %4610  ;;  %4616 = vrcp.f32 %v3612_v31  ;;  %v7325_v5 = vadd.f32 1.0, %v4609_v63  ;;  %v3657_v17 = vand.u32 2147483647, %v3612_v31  ;;  %v3659_v14 = vand.u32 2147483648, %v3612_v31 }
 0x70a   : > { %v4613_v56 = vpop.eup %4612  ;;  %v7327_v25 = vadd.f32 1.0, %v4611_v30  ;;  %4618 = vrcp.f32 %v7323_v16  ;;  %v3642_v29 = vand.u32 2147483647, %v7323_v16  ;;  %v3644_v57 = vand.u32 2147483648, %v7323_v16 }
 0x70b   : > { %4620 = vrcp.f32 %v7325_v5  ;;  %v7333_v59 = vadd.f32 1.0, %v4613_v56  ;;  %v4615_v39 = vpop.eup %4614  ;;  %vm3653_vm14 = vweird.f32 %v3612_v31  ;;  %v3672_v18 = vand.u32 2147483647, %v7325_v5 }
 0x70c   : > { %v3674_v40 = vand.u32 2147483648, %v7325_v5  ;;  %4622 = vrcp.f32 %v7327_v25  ;;  %v3619_v34 = vmul.f32 %v4615_v39, %v3610_v0  ;;  %vm7342_vm0 = vcmp.eq.f32.partialorder %v3657_v17, 8.507059e+37 }
 0x70d   : > { %v3660_v60 = vor.u32 1.1754944e-38, %v3659_v14  ;;  %vm3638_vm3 = vweird.f32 %v7323_v16  ;;  %vm3668_vm4 = vweird.f32 %v7325_v5  ;;  %vm3624_vm5 = vweird.f32 %v4615_v39 }
 0x70e   : > { %v3620_v49 = vsub.f32 1.0, %v3619_v34  ;;  %vm7348_vm7 = vcmp.eq.f32.partialorder %v3642_v29, 8.507059e+37  ;;  %v3645_v13 = vor.u32 1.1754944e-38, %v3644_v57  ;;  %4624 = vrcp.f32 %v7333_v59  ;;  %vm7366_vm12 = vmor %vm3623_vm13, %vm3624_vm5 }
 0x70f   : > { %v4617_v8 = vpop.eup %4616  ;;  %vm7353_vm10 = vcmp.eq.f32.partialorder %v3672_v18, 8.507059e+37  ;;  %v3675_v3 = vor.u32 1.1754944e-38, %v3674_v40  ;;  %vm3728_vm11 = vweird.f32 %v7327_v25  ;;  %v3732_v12 = vand.u32 2147483647, %v7327_v25 }
 0x710   : > { %v3649_v1 = vmul.f32 %v4617_v8, %v3612_v31  ;;  %v4619_v38 = vpop.eup %4618  ;;  %vm3654_vm9 = vweird.f32 %v4617_v8  ;;  %v3621_v22 = vmul.f32 %v4615_v39, %v3620_v49  ;;  %v3734_v27 = vand.u32 2147483648, %v7327_v25  ;;  %v7945_v31 = vld [vmem:[#allocation14_spill] sm:$0xff] }
 0x711   : > { %v4621_v10 = vpop.eup %4620  ;;  %v3634_v37 = vmul.f32 %v4619_v38, %v7323_v16  ;;  %vm3713_vm1 = vweird.f32 %v7333_v59  ;;  %v3717_v42 = vand.u32 2147483647, %v7333_v59  ;;  %v3719_v21 = vand.u32 2147483648, %v7333_v59  ;;  %vm7375_vm8 = vmor %vm3653_vm14, %vm3654_vm9 }
 0x712   : > { %v3650_v55 = vsub.f32 1.0, %v3649_v1  ;;  %v7362_v50 = vpop.eup %4622  ;;  %v3664_v54 = vmul.f32 %v4621_v10, %v7325_v5  ;;  %v3622_v62 = vadd.f32 %v4615_v39, %v3621_v22  ;;  %vm3639_vm6 = vweird.f32 %v4619_v38 }
 0x713   : > { %v3635_v47 = vsub.f32 1.0, %v3634_v37  ;;  %v3724_v11 = vmul.f32 %v7362_v50, %v7327_v25  ;;  %vm3669_vm13 = vweird.f32 %v4621_v10  ;;  %v4047_v63 = vmul.f32 -1.442695, %v7945_v31  ;;  %vm7393_vm14 = vmor %vm3638_vm3, %vm3639_vm6  ;;  %v7962_v37 = vld [vmem:[#allocation58_spill] sm:$0xff] }
 0x714   : > { %v3651_v32 = vmul.f32 %v4617_v8, %v3650_v55  ;;  %v3665_v4 = vsub.f32 1.0, %v3664_v54  ;;  %v7382_v19 = vpop.eup %4624  ;;  %v3626_v35 = vsel %vm7366_vm12, %v4615_v39, %v3622_v62  ;;  %vm7405_vm12 = vmor %vm3668_vm4, %vm3669_vm13  ;;  %vm3729_vm6 = vweird.f32 %v7362_v50  ;;  %v7958_v55 = vld [vmem:[#allocation27_spill] sm:$0xff] }
 0x715   : > { %v3636_v0 = vmul.f32 %v4619_v38, %v3635_v47  ;;  %v3725_v61 = vsub.f32 1.0, %v3724_v11  ;;  %v3631_v30 = vsel %vm7338_vm15, %v3630_v33, %v3626_v35  ;;  %v3709_v17 = vmul.f32 %v7382_v19, %v7333_v59  ;;  %vm7427_vm15 = vmor %vm3728_vm11, %vm3729_vm6 }
 0x716   : > { %v3652_v2 = vadd.f32 %v4617_v8, %v3651_v32  ;;  %v3666_v24 = vmul.f32 %v4621_v10, %v3665_v4  ;;  %v3738_v14 = vmul.f32 %v3631_v30, %v7926_v45  ;;  %4626 = vpow2.f32 %v4046_v6 }
 0x717   : > { %v3637_v57 = vadd.f32 %v4619_v38, %v3636_v0  ;;  %v3726_v16 = vmul.f32 %v7362_v50, %v3725_v61  ;;  %4628 = vpow2.f32 %v4047_v63  ;;  %vm7442_vm4 = vcmp.eq.f32.partialorder %v3717_v42, 8.507059e+37 }
 0x718   : > { %v3656_v56 = vsel %vm7375_vm8, %v4617_v8, %v3652_v2  ;;  %v3667_v40 = vadd.f32 %v4621_v10, %v3666_v24  ;;  %v3710_v8 = vsub.f32 1.0, %v3709_v17  ;;  %3754 = vrot.lane.b32.xlu0 %v3738_v14, %s4765_s25  ;;  %vm3714_vm8 = vweird.f32 %v7382_v19 }
 0x719   : > { %v3661_v29 = vsel %vm7342_vm0, %v3660_v60, %v3656_v56  ;;  %v3641_v45 = vsel %vm7393_vm14, %v4619_v38, %v3637_v57  ;;  %v3727_v34 = vadd.f32 %v7362_v50, %v3726_v16  ;;  %vm7431_vm0 = vcmp.eq.f32.partialorder %v3732_v12, 8.507059e+37  ;;  %vm7438_vm3 = vmor %vm3713_vm1, %vm3714_vm8  ;;  %v7960_v12 = vld [vmem:[#allocation43_spill] sm:$0xff] }
 0x71a   : > { %v3740_v18 = vmul.f32 %v3661_v29, %v7927_v23  ;;  %v3646_v5 = vsel %vm7348_vm7, %v3645_v13, %v3641_v45  ;;  %v3671_v23 = vsel %vm7405_vm12, %v4621_v10, %v3667_v40  ;;  %v3711_v51 = vmul.f32 %v7382_v19, %v3710_v8 }
 0x71b   : > { %v3676_v33 = vsel %vm7353_vm10, %v3675_v3, %v3671_v23  ;;  %v3735_v60 = vor.u32 1.1754944e-38, %v3734_v27  ;;  %v3720_v25 = vor.u32 1.1754944e-38, %v3719_v21  ;;  %v3739_v38 = vmul.f32 %v3646_v5, %v7928_v15  ;;  %v7964_v15 = vld [vmem:[#allocation28_spill] sm:$0xff] }
 0x71c   : > { %3758 = vrot.lane.b32.xlu1 %v3740_v18, %s4765_s25  ;;  %v3712_v49 = vadd.f32 %v7382_v19, %v3711_v51  ;;  %v7959_v44 = vrot.slane %v7958_v55, 7   ;;  %v7961_v10 = vrot.slane %v7960_v12, 7   ;;  %v7963_v27 = vrot.slane %v7962_v37, 7   ;;  %v4627_v47 = vpop.eup %4626  ;;  %v3558_v37 = vld [vmem:[#allocation8] sm:$0xff] }
 0x71d   : > { %v3741_v32 = vmul.f32 %v3676_v33, %v7929_v48  ;;  %v3731_v54 = vsel %vm7427_vm15, %v7362_v50, %v3727_v34  ;;  %v7965_v42 = vrot.slane %v7964_v15, 7   ;;  %v7966_v62 = vrot.slane %v6853_v9, 7   ;;  %v4629_v50 = vpop.eup %4628 }
 0x71e   : > { %v3535_v3 = vrot.slane %v7959_v44, 7  ;;  %v3536_v22 = vrot.slane %v7961_v10, 6  ;;  %v3537_v59 = vrot.slane %v7963_v27, 5  ;;  %v3716_v11 = vsel %vm7438_vm3, %v7382_v19, %v3712_v49  ;;  %v7972_v44 = vld [vmem:[#allocation16_spill] sm:$0xff]  ;;  %v7973_v10 = vld [vmem:[#allocation18_spill] sm:$0xff] }
 0x71f   : > { %v3538_v21 = vrot.slane %v7965_v42, 4  ;;  %v3539_v46 = vrot.slane %v7966_v62, 3  ;;  %v7967_v2 = vrot.slane %v6875_v20, 7   ;;  %v7968_v48 = vrot.slane %v6898_v43, 7   ;;  %v3559_v27 = vld [vmem:[#allocation8 + $0x8] sm:$0xff] }
 0x720   : > { %vm3544_vm1 = vcmask 1042434   ;;  %v3614_v35 = vadd.f32 1.0, %v4627_v47  ;;  %v7969_v0 = vrot.slane %v6849_v7, 7   ;;  %vm3548_vm5 = vcmask 1044484   ;;  %3756 = vrot.lane.b32.xlu0 %v3739_v38, %s4765_s25  ;;  %v4077_v38 = vld [vmem:[%s7555_s10 + $0x8] sm:$0xff] }
 0x721   : > { %v3540_v4 = vrot.slane %v7967_v2, 2  ;;  %v3541_v6 = vrot.slane %v7968_v48, 1  ;;  %v3545_v61 = vsel %vm3544_vm1, %v3536_v22, %v3537_v59  ;;  %v3615_v19 = vadd.f32 1.0, %v4629_v50  ;;  %v7977_v50 = vld [vmem:[#allocation19_spill] sm:$0xff] }
 0x722   : > { %v3543_v9 = vsel %vm3487_vm2, %v7969_v0, %v3535_v3  ;;  %vm3550_vm7 = vcmask 1046534   ;;  %v3721_v20 = vsel %vm7442_vm4, %v3720_v25, %v3716_v11  ;;  %4630 = vrcp.f32 %v3614_v35  ;;  %v4078_v25 = vld [vmem:[%s7555_s10 + $0x10] sm:$0xff]  ;;  %v3564_v11 = vld [vmem:[#allocation8 + $0x30] sm:$0xff] }
 0x723   : > { %v3549_v43 = vsel %vm3548_vm5, %v3538_v21, %v3539_v46  ;;  %v3736_v63 = vsel %vm7431_vm0, %v3735_v60, %v3731_v54  ;;  %4632 = vrcp.f32 %v3615_v19  ;;  %vm7970_vm9 = vcmask 1041408   ;;  %3839 = vmatpush.bf16.msra.mxu2 %v4078_v25  ;;  %4089 = vmatpush.bf16.msrb.mxu3 %v4078_v25  ;;  %v7974_v21 = vld [vmem:[#allocation23_spill] sm:$0xff]  ;;  %v7975_v46 = vld [vmem:[#allocation24_spill] sm:$0xff] }
 0x724   : > { %3760 = vrot.lane.b32.xlu1 %v3741_v32, %s4765_s25  ;;  %v3547_v7 = vsel %vm7970_vm9, %v3543_v9, %v3545_v61  ;;  %v3551_v30 = vsel %vm3550_vm7, %v3540_v4, %v3541_v6  ;;  %vm3552_vm2 = vcmask 1045508   ;;  %v3744_v56 = vmul.f32 %v3721_v20, %v7931_v53  ;;  %v3565_v4 = vld [vmem:[#allocation8 + $0x38] sm:$0xff]  ;;  %v3560_v61 = vld [vmem:[#allocation8 + $0x10] sm:$0xff] }
 0x725   : > { %v3553_v28 = vsel %vm3552_vm2, %v3549_v43, %v3551_v30  ;;  %v3745_v24 = vmul.f32 %v3736_v63, %v7930_v58  ;;  %vm7971_vm10 = vcmask 1043456   ;;  %v3689_v39 = vand.u32 2147483648, %v3614_v35  ;;  %v7978_v0 = vld [vmem:[#allocation20_spill] sm:$0xff] }
 0x726   : > { %v3555_v17 = vsel %vm7971_vm10, %v3547_v7, %v3553_v28  ;;  %vm3683_vm11 = vweird.f32 %v3614_v35  ;;  %v3687_v40 = vand.u32 2147483647, %v3614_v35  ;;  %vm3698_vm14 = vweird.f32 %v3615_v19 }
 0x727   : > { %3557 = vst [vmem:[#allocation4] sm:$0xff] %v3555_v17  ;;  %v3690_v58 = vor.u32 1.1754944e-38, %v3689_v39  ;;  %v3704_v34 = vand.u32 2147483648, %v3615_v19  ;;  %v3702_v23 = vand.u32 2147483647, %v3615_v19  ;;  %3840 = vmatpush.bf16.msra.mxu2 %v4077_v38  ;;  %4090 = vmatpush.bf16.msrb.mxu3 %v4077_v38  ;;  %vm7976_vm3 = vcmask 523264  }
 0x728   : > { %v4631_v14 = vpop.eup %4630  ;;  %3766 = vrot.lane.b32.xlu0 %v3744_v56, %s4765_s25  ;;  %vm3688_vm8 = vcmp.eq.f32.partialorder %v3687_v40, 8.507059e+37  ;;  %vm7979_vm4 = vmmov %vm7976_vm3  ;;  %v3562_v40 = vld [vmem:[#allocation8 + $0x20] sm:$0xff]  ;;  %vm7984_vm7 = vcmask 261120  }
 0x729   : > { %v4633_v29 = vpop.eup %4632  ;;  %v3679_v57 = vmul.f32 %v4631_v14, %v3614_v35  ;;  %vm3684_vm13 = vweird.f32 %v4631_v14  ;;  %v3705_v1 = vor.u32 1.1754944e-38, %v3704_v34  ;;  %vm3703_vm0 = vcmp.eq.f32.partialorder %v3702_v23, 8.507059e+37  ;;  %vm7980_vm1 = vmmov %vm7976_vm3 }
 0x72a   : > { %v3694_v16 = vmul.f32 %v4633_v29, %v3615_v19  ;;  %vm3699_vm12 = vweird.f32 %v4633_v29  ;;  %vm3685_vm6 = vmor %vm3683_vm11, %vm3684_vm13  ;;  %v3561_v19 = vld [vmem:[#allocation8 + $0x18] sm:$0xff] }
 0x72b   : > { %v3680_v18 = vsub.f32 1.0, %v3679_v57  ;;  %vm3700_vm15 = vmor %vm3698_vm14, %vm3699_vm12  ;;  %v7981_v57 = vld [vmem:[#allocation21_spill] sm:$0xff] }
 0x72c   : > { %3768 = vrot.lane.b32.xlu1 %v3745_v24, %s4765_s25  ;;  %v3695_v53 = vsub.f32 1.0, %v3694_v16  ;;  %v7982_v16 = vld [vmem:[#allocation22_spill] sm:$0xff]  ;;  %vm7983_vm5 = vmmov %vm7980_vm1 }
 0x72d   : > { %v3681_v8 = vmul.f32 %v4631_v14, %v3680_v18  ;;  %vm7985_vm9 = vmmov %vm7984_vm7 }
 0x72e   : > { %v3696_v45 = vmul.f32 %v4633_v29, %v3695_v53  ;;  %v3563_v53 = vld [vmem:[#allocation8 + $0x28] sm:$0xff]  ;;  %vm7986_vm2 = vmmov %vm7984_vm7 }
 0x72f   : > { %v3682_v5 = vadd.f32 %v4631_v14, %v3681_v8  ;;  %vm7987_vm10 = vmmov %vm7986_vm2 }
 0x730   : > { %v3697_v51 = vadd.f32 %v4633_v29, %v3696_v45  ;;  %vm7988_vm11 = vmmov %vm7986_vm2 }
 0x731   : > { %v3686_v33 = vsel %vm3685_vm6, %v4631_v14, %v3682_v5  ;;  %vm7989_vm13 = vmmov %vm7986_vm2 }
 0x732   : > { %v3691_v26 = vsel %vm3688_vm8, %v3690_v58, %v3686_v33  ;;  %v3701_v49 = vsel %vm3700_vm15, %v4633_v29, %v3697_v51  ;;  %vm7990_vm14 = vmmov %vm7986_vm2 }
 0x733   : > { %v3742_v60 = vmul.f32 %v3691_v26, %v7944_v36  ;;  %v3706_v52 = vsel %vm3703_vm0, %v3705_v1, %v3701_v49  ;;  %v4076_v36 = vld [vmem:[%s7555_s10] sm:$0xff]  ;;  %vm7991_vm12 = vmmov %vm7986_vm2 }
 0x734   : > { %v3743_v13 = vmul.f32 %v3706_v52, %v7945_v31  ;;  %3841 = vmatpush.bf16.msra.mxu2 %v4076_v36  ;;  %4091 = vmatpush.bf16.msrb.mxu3 %v4076_v36  ;;  %v4601_v31 = vld [vmem:[%s7554_s9] ss:$0 sm:$0xff] }
 0x735   : > { %3762 = vrot.lane.b32.xlu2 %v3742_v60, %s4765_s25  ;;  %v3570_v3 = vmul.f32 %v4601_v31, %v7972_v44  ;;  %v3571_v22 = vmul.f32 %v4601_v31, %v7973_v10  ;;  %v3576_v62 = vmul.f32 %v4601_v31, %v7974_v21  ;;  %v3577_v47 = vmul.f32 %v4601_v31, %v7975_v46 }
 0x736   : > { %v3572_v35 = vmul.f32 %v4601_v31, %v7977_v50  ;;  %v3573_v9 = vmul.f32 %v4601_v31, %v7978_v0  ;;  %v3574_v39 = vmul.f32 %v4601_v31, %v7981_v57  ;;  %v3575_v18 = vmul.f32 %v4601_v31, %v7982_v16 }
 0x737   : > { %v3578_v59 = vadd.f32 %v3570_v3, %v3558_v37  ;;  %v3579_v41 = vadd.f32 %v3571_v22, %v3559_v27  ;;  %v3584_v48 = vadd.f32 %v3576_v62, %v3564_v11  ;;  %v3585_v6 = vadd.f32 %v3577_v47, %v3565_v4 }
 0x738   : > { %v3580_v30 = vadd.f32 %v3572_v35, %v3560_v61  ;;  %v3581_v56 = vadd.f32 %v3573_v9, %v3561_v19  ;;  %v3582_v8 = vadd.f32 %v3574_v39, %v3562_v40  ;;  %v3583_v58 = vadd.f32 %v3575_v18, %v3563_v53 }
 0x73d   : > { %3764 = vrot.lane.b32.xlu2 %v3743_v13, %s4765_s25 }
 0x78a   : > { %v3755_v55 = vpop.permute.xlu0 %3754 }
 0x78b   : > { %v3778_v54 = vmul.f32 %v3755_v55, %v3578_v59 }
 0x78e   : > { %v3759_v12 = vpop.permute.xlu1 %3758 }
 0x78f   : > { %v3780_v24 = vmul.f32 %v3759_v12, %v3580_v30  ;;  %v3763_v14 = vpop.permute.xlu2 %3762 }
 0x790   : > { %v3782_v34 = vmul.f32 %v3763_v14, %v3582_v8 }
 0x792   : > { %v3757_v32 = vpop.permute.xlu0 %3756 }
 0x793   : > { %v3779_v15 = vmul.f32 %v3757_v32, %v3579_v41 }
 0x795   : > { %v3786_v2 = vpack.c.bf16 %v3779_v15, %v3778_v54 }
 0x796   : > { %v3761_v42 = vpop.permute.xlu1 %3760 }
 0x797   : > { %4066 = vmatmul.msk.bf16.vlgmr.msra.gmra.mxu2 %vm7976_vm3, %v3786_v2  ;;  %v3781_v17 = vmul.f32 %v3761_v42, %v3581_v56  ;;  %v3765_v45 = vpop.permute.xlu2 %3764 }
 0x798   : > { %v3783_v5 = vmul.f32 %v3765_v45, %v3583_v58 }
 0x799   : > { %v3787_v29 = vpack.c.bf16 %v3781_v17, %v3780_v24 }
 0x79a   : > { %v3767_v20 = vpop.permute.xlu0 %3766  ;;  %v3788_v23 = vpack.c.bf16 %v3783_v5, %v3782_v34 }
 0x79b   : > { %v3784_v63 = vmul.f32 %v3767_v20, %v3584_v48 }
 0x79e   : > { %v3769_v43 = vpop.permute.xlu1 %3768 }
 0x79f   : > { %v3785_v7 = vmul.f32 %v3769_v43, %v3585_v6 }
 0x7a1   : > { %v3789_v28 = vpack.c.bf16 %v3785_v7, %v3784_v63 }
 0x7a3   : > { %4069 = vmatmul.msk.bf16.vlgmr.msrb.gmra.mxu3 %vm7979_vm4, %v3789_v28 }
 0x7a7   : > { %4067 = vmatmul.msk.bf16.gmra.mxu2 %vm7980_vm1, %v3787_v29 }
 0x7b7   : > { %4068 = vmatmul.msk.bf16.gmra.mxu2 %vm7983_vm5, %v3788_v23 }
 0x81a   : > { %v3843_v51 = vpop.f32.mrf.mxu2 }
 0x81b   : > { %3863 = vst.msk [vmem:[%s4879_s14] sm:$0xff] %vm7984_vm7, %v3843_v51 }
 0x822   : > { %v3845_v33 = vpop.f32.mrf.mxu2 }
 0x823   : > { %3864 = vst.msk [vmem:[%s4879_s14 + $0x8] sm:$0xff] %vm7985_vm9, %v3845_v33 }
 0x826   : > { %v3858_v26 = vpop.f32.mrf.mxu3 }
 0x827   : > { %3869 = vst.msk [vmem:[%s4879_s14 + $0x30] sm:$0xff] %vm7986_vm2, %v3858_v26 }
 0x82a   : > { %v3848_v1 = vpop.f32.mrf.mxu2 }
 0x82b   : > { %3865 = vst.msk [vmem:[%s4879_s14 + $0x10] sm:$0xff] %vm7987_vm10, %v3848_v1 }
 0x82e   : > { %v3860_v60 = vpop.f32.mrf.mxu3 }
 0x82f   : > { %3870 = vst.msk [vmem:[%s4879_s14 + $0x38] sm:$0xff] %vm7988_vm11, %v3860_v60 }
 0x832   : > { %v3850_v49 = vpop.f32.mrf.mxu2 }
 0x833   : > { %3866 = vst.msk [vmem:[%s4879_s14 + $0x18] sm:$0xff] %vm7989_vm13, %v3850_v49 }
 0x83a   : > { %v3853_v52 = vpop.f32.mrf.mxu2 }
 0x83b   : > { %3867 = vst.msk [vmem:[%s4879_s14 + $0x20] sm:$0xff] %vm7990_vm14, %v3853_v52 }
 0x842   : > { %v3855_v13 = vpop.f32.mrf.mxu2 }
 0x843   : > { %3868 = vst.msk [vmem:[%s4879_s14 + $0x28] sm:$0xff] %vm7991_vm12, %v3855_v13 }
 0x844 PF: > { %s21_s21 = sadd.s32 1, %s4708_s21   ;;  %s7992_s17 = smov %s4700_s19 }
 0x845   : > { %p18_p9 = scmp.ge.s32.totalorder %s21_s21, 6   ;;  %s7993_s18 = smov %s4704_s20 }
 0x846   : > { %s7994_s19 = smov %s7997_s22  ;;  %s7995_s20 = smov %s8001_s23 }
 0x847   :  { %20 = sbr.rel (!%p18_p9) target bundleno = 3 (0x3), region = 120 }

</bundles_post_ra>
